<compile_context>
chip_gen: v7x
topology: tpu7x:2x2x1
jax: 0.10.0
libtpu: 0.0.40
codegen_flags: <defaults>
</compile_context>

<pallas_src>
import functools
import math

import jax
import jax.numpy as jnp
from jax.experimental import pallas as pl
from jax.experimental.pallas import tpu as pltpu


# Set to jnp.bfloat16 for ~2x MXU throughput on v5e/v6e/v7x (accumulation stays
# f32 via preferred_element_type).  Default f32 matches the PyTorch reference.
_MXU_DTYPE = jnp.float32


def _mxu_dot(a, b):
    return jnp.dot(a.astype(_MXU_DTYPE), b.astype(_MXU_DTYPE),
                   preferred_element_type=jnp.float32)


@functools.lru_cache(maxsize=1)
def _vmem_limit_bytes():
    # ~75% of physical VMEM (128 MiB on v5e/v6e, 64 MiB on v7x); conservative
    # fallback when the query is unavailable.
    try:
        cap = int(pltpu.get_tpu_info().vmem_capacity_bytes)
    except Exception:
        cap = 64 * 1024 * 1024
    return max(32 * 1024 * 1024, (cap * 3) // 4)


def _pick_rows(m):
    # Biggest row tile that still yields >= 4 grid steps (pipeline depth on one
    # TC, >= 2 steps per TC on v7x megacore); fall back to any 8-aligned divisor.
    for t in (1024, 512, 256, 128, 64, 32, 16, 8):
        if m % t == 0 and m // t >= 4:
            return t
    for t in (1024, 512, 256, 128, 64, 32, 16, 8):
        if m % t == 0:
            return t
    return m


def _pick_row_tile(H, W, Ca, hidden, n_batch, limit_bytes):
    # Row tile for the fused coupling-NN kernel: largest divisor of H whose
    # working set fits comfortably in VMEM, preferring >= 4 total grid steps.
    budget = int(limit_bytes * 0.55)

    def usage(th):
        the = th + 2
        return 4 * (2 * H * W * Ca                     # xb (resident, dbl-buffered)
                    + 4 * th * W * Ca                  # xa + ya (dbl-buffered)
                    + 2 * (9 * Ca * hidden + hidden * hidden
                           + 9 * hidden * 2 * Ca + 4 * hidden + 4 * Ca)
                    + 3 * (H + 4) * W * Ca             # col1 scratch
                    + 3 * the * W * hidden             # col2 scratch
                    + 3 * the * W * hidden)            # h1/h2/acc live temporaries

    divisors = [t for t in range(H, 0, -1) if H % t == 0]
    fitting = [t for t in divisors if usage(t) <= budget]
    if not fitting:
        return 1
    pref = [t for t in fitting if n_batch * (H // t) >= 4]
    return max(pref) if pref else max(fitting)


# ------------------------------------------------------------------ kernels
def _actnorm_stats_kernel(a_ref, b_ref, ma_ref, la_ref, mb_ref, lb_ref, dl_ref,
                          *, m_total, hw):
    # Tiled sum / sum-of-squares reduction; finalize to mean, 3*logscale and
    # dlogdet on the last step.  Reproduces ActNorm's data-dependent init (the
    # torch module's first forward call): bias = -mean,
    # logscale = log(1/(std+1e-9))/3 with torch-style unbiased std.
    @pl.when(pl.program_id(0) == 0)
    def _():
        ma_ref[...] = jnp.zeros_like(ma_ref)
        la_ref[...] = jnp.zeros_like(la_ref)
        mb_ref[...] = jnp.zeros_like(mb_ref)
        lb_ref[...] = jnp.zeros_like(lb_ref)

    a = a_ref[...]
    b = b_ref[...]
    ma_ref[...] += jnp.sum(a, axis=0, keepdims=True)
    la_ref[...] += jnp.sum(a * a, axis=0, keepdims=True)
    mb_ref[...] += jnp.sum(b, axis=0, keepdims=True)
    lb_ref[...] += jnp.sum(b * b, axis=0, keepdims=True)

    @pl.when(pl.program_id(0) == pl.num_programs(0) - 1)
    def _():
        inv_m = 1.0 / m_total
        mean_a = ma_ref[...] * inv_m
        mean_b = mb_ref[...] * inv_m
        var_a = (la_ref[...] - m_total * mean_a * mean_a) / (m_total - 1.0)
        var_b = (lb_ref[...] - m_total * mean_b * mean_b) / (m_total - 1.0)
        ls3_a = jnp.log(1.0 / (jnp.sqrt(jnp.maximum(var_a, 0.0)) + 1e-9))
        ls3_b = jnp.log(1.0 / (jnp.sqrt(jnp.maximum(var_b, 0.0)) + 1e-9))
        ma_ref[...] = mean_a
        la_ref[...] = ls3_a
        mb_ref[...] = mean_b
        lb_ref[...] = ls3_b
        dl_ref[...] = jnp.reshape((jnp.sum(ls3_a) + jnp.sum(ls3_b)) * hw, (1, 1))


def _actnorm_invconv_kernel(a_ref, b_ref, ma_ref, la_ref, mb_ref, lb_ref,
                            waa_ref, wba_ref, wab_ref, wbb_ref, xa_ref, xb_ref):
    # Fused ActNorm forward + InvConv2dLU 1x1 conv.  W.T is pre-split at init
    # into its four (ca, ca) blocks -> no in-kernel weight slicing.
    fa = jnp.exp(la_ref[...]) + 1e-9            # exp(3*logscale) + eps, as in torch
    fb = jnp.exp(lb_ref[...]) + 1e-9
    xna = (a_ref[...] - ma_ref[...]) * fa       # (x + bias) * scale
    xnb = (b_ref[...] - mb_ref[...]) * fb
    xa_ref[...] = _mxu_dot(xna, waa_ref[...]) + _mxu_dot(xnb, wba_ref[...])
    xb_ref[...] = _mxu_dot(xna, wab_ref[...]) + _mxu_dot(xnb, wbb_ref[...])


def _coupling_nn_kernel(xb_ref, xa_ref, w1_ref, b1_ref, w2_ref, b2_ref,
                        wz_ref, bz_ref, scz_ref, ya_ref, ld_ref,
                        col1_ref, col2_ref, *, H, W, Ca, hidden, th, R):
    # Fused coupling NN for one (batch, row-tile) grid point.  Row tile = th
    # output rows; h1/h2 are computed for th+2 rows (1-row halo) so the
    # ZeroConv2d never needs neighbouring tiles.  All conv taps are read from
    # leading-dim-stacked dx-im2col scratch buffers (no per-tap relayout copies).
    r = pl.program_id(1)
    the = th + 2

    # -- per-batch prologue: zero-padded dx-im2col of xb (small, Ca channels) --
    @pl.when(r == 0)
    def _():
        xb = xb_ref[0]                                        # (H, W, Ca)
        zrow = jnp.zeros((2, W, Ca), jnp.float32)
        zcol = jnp.zeros((H, 1, Ca), jnp.float32)
        for dx in range(3):
            col1_ref[dx, 0:2] = zrow                          # pad row 0 + virtual
            col1_ref[dx, H + 2:H + 4] = zrow                  # pad row H+1 + virtual
        col1_ref[1, 2:H + 2] = xb                             # dx = 1 (center)
        col1_ref[0, 2:H + 2, 1:W] = xb[:, 0:W - 1, :]         # dx = 0 (left nbr)
        col1_ref[0, 2:H + 2, 0:1] = zcol
        col1_ref[2, 2:H + 2, 0:W - 1] = xb[:, 1:W, :]         # dx = 2 (right nbr)
        col1_ref[2, 2:H + 2, W - 1:W] = zcol
        ld_ref[...] = jnp.zeros_like(ld_ref)

    # -- conv1 (3x3, zero pad) + ReLU on the extended rows, conv2 (1x1) + ReLU --
    r0 = r * th
    acc1 = jnp.zeros((the * W, hidden), jnp.float32)
    for dy in range(3):
        for dx in range(3):
            patch = col1_ref[dx, pl.ds(r0 + dy, the)]         # (the, W, Ca)
            acc1 = acc1 + _mxu_dot(patch.reshape(the * W, Ca), w1_ref[dy * 3 + dx])
    h1 = jnp.maximum(acc1 + b1_ref[...], 0.0)
    h2 = jnp.maximum(_mxu_dot(h1, w2_ref[...]) + b2_ref[...], 0.0)
    h2 = h2.reshape(the, W, hidden)

    # -- dx-im2col of h2 for the ZeroConv2d (F.pad value = 1 at image borders) --
    ones_col = jnp.ones((the, 1, hidden), jnp.float32)
    col2_ref[1] = h2
    col2_ref[0, :, 1:W] = h2[:, 0:W - 1, :]
    col2_ref[0, :, 0:1] = ones_col
    col2_ref[2, :, 0:W - 1] = h2[:, 1:W, :]
    col2_ref[2, :, W - 1:W] = ones_col

    @pl.when(r == 0)
    def _():                                                  # image top halo row
        col2_ref[:, 0:1] = jnp.ones((3, 1, W, hidden), jnp.float32)

    @pl.when(r == R - 1)
    def _():                                                  # image bottom halo row
        col2_ref[:, the - 1:the] = jnp.ones((3, 1, W, hidden), jnp.float32)

    # -- ZeroConv2d ([t | s] packed in the output columns) + affine coupling --
    ca = Ca
    accz = jnp.zeros((th * W, 2 * ca), jnp.float32)
    for dy in range(3):
        for dx in range(3):
            patch = col2_ref[dx, dy:dy + th]                  # (th, W, hidden)
            accz = accz + _mxu_dot(patch.reshape(th * W, hidden),
                                   wz_ref[dy * 3 + dx])
    ts = (accz + bz_ref[...]) * jnp.exp(3.0 * scz_ref[...])
    t = ts[:, :ca]
    s = 1.0 / (1.0 + jnp.exp(-(ts[:, ca:] + 2.0))) + 1e-9
    xa = xa_ref[0].reshape(th * W, ca)
    ya_ref[...] = ((xa + t) * s).reshape(1, th, W, ca)
    ld_ref[...] += jnp.reshape(jnp.sum(jnp.log(s)), (1, 1, 1))


def _prior_logp_kernel(*refs, H, W, Cin, half, zero_input):
    # Fused prior ZeroConv2d (pad=1 with value 1, 3x3, * exp(3*scale)) with
    # mean|log_sd as a single matmul, plus gaussian_log_p reduced per batch.
    if zero_input:
        z_ref, w_ref, b_ref, sc_ref, lp_ref, col_ref = refs
        x = jnp.zeros((H, W, Cin), jnp.float32)               # no x DMA needed
    else:
        x_ref, z_ref, w_ref, b_ref, sc_ref, lp_ref, col_ref = refs
        x = x_ref[0]

    col_ref[:, 0:1] = jnp.ones((3, 1, W, Cin), jnp.float32)   # border strips only
    col_ref[:, H + 1:H + 2] = jnp.ones((3, 1, W, Cin), jnp.float32)
    ones_col = jnp.ones((H, 1, Cin), jnp.float32)
    col_ref[1, 1:H + 1] = x
    col_ref[0, 1:H + 1, 1:W] = x[:, 0:W - 1, :]
    col_ref[0, 1:H + 1, 0:1] = ones_col
    col_ref[2, 1:H + 1, 0:W - 1] = x[:, 1:W, :]
    col_ref[2, 1:H + 1, W - 1:W] = ones_col

    acc = jnp.zeros((H * W, 2 * half), jnp.float32)
    for dy in range(3):
        for dx in range(3):
            patch = col_ref[dx, dy:dy + H]
            acc = acc + _mxu_dot(patch.reshape(H * W, Cin), w_ref[dy * 3 + dx])
    ml = (acc + b_ref[...]) * jnp.exp(3.0 * sc_ref[...])
    mean = ml[:, :half]
    log_sd = ml[:, half:]
    z = z_ref[0].reshape(H * W, half)
    lp = (-0.5 * math.log(2.0 * math.pi) - log_sd
          - 0.5 * (z - mean) * (z - mean) * jnp.exp(-2.0 * log_sd))
    lp_ref[...] = jnp.reshape(jnp.sum(lp), (1, 1, 1))


# ------------------------------------------------------------------ wrappers
def actnorm_stats(a, b, hw):
    M, Ca = a.shape
    tm = _pick_rows(M)
    vec = jax.ShapeDtypeStruct((1, Ca), jnp.float32)
    return pl.pallas_call(
        functools.partial(_actnorm_stats_kernel, m_total=float(M), hw=float(hw)),
        out_shape=(vec, vec, vec, vec, jax.ShapeDtypeStruct((1, 1), jnp.float32)),
        grid=(M // tm,),
        in_specs=[pl.BlockSpec((tm, Ca), lambda i: (i, 0)),
                  pl.BlockSpec((tm, Ca), lambda i: (i, 0))],
        out_specs=((pl.BlockSpec((1, Ca), lambda i: (0, 0)),) * 4
                   + (pl.BlockSpec((1, 1), lambda i: (0, 0)),)),
        compiler_params=pltpu.CompilerParams(
            dimension_semantics=("arbitrary",),
            vmem_limit_bytes=_vmem_limit_bytes()),
    )(a, b)


def actnorm_invconv(a, b, ma, la, mb, lb, waa, wba, wab, wbb):
    M, ca = a.shape
    tm = _pick_rows(M)
    ce = pl.CostEstimate(flops=int(8 * M * ca * ca), transcendentals=int(4 * ca),
                         bytes_accessed=int(4 * (4 * M * ca + 4 * ca * ca)))
    row_spec = pl.BlockSpec((tm, ca), lambda i: (i, 0))
    vec_spec = pl.BlockSpec((1, ca), lambda i: (0, 0))
    w_spec = pl.BlockSpec((ca, ca), lambda i: (0, 0))
    return pl.pallas_call(
        _actnorm_invconv_kernel,
        out_shape=(jax.ShapeDtypeStruct((M, ca), jnp.float32),
                   jax.ShapeDtypeStruct((M, ca), jnp.float32)),
        grid=(M // tm,),
        in_specs=[row_spec, row_spec,
                  vec_spec, vec_spec, vec_spec, vec_spec,
                  w_spec, w_spec, w_spec, w_spec],
        out_specs=(pl.BlockSpec((tm, ca), lambda i: (i, 0)),
                   pl.BlockSpec((tm, ca), lambda i: (i, 0))),
        compiler_params=pltpu.CompilerParams(
            dimension_semantics=("parallel",),
            vmem_limit_bytes=_vmem_limit_bytes()),
        cost_estimate=ce,
    )(a, b, ma, la, mb, lb, waa, wba, wab, wbb)


def coupling_nn(xb_img, xa_img, w1, b1, w2, b2, wz, bz, scz):
    N, H, W, Ca = xb_img.shape
    hidden = w1.shape[-1]
    limit = _vmem_limit_bytes()
    th = _pick_row_tile(H, W, Ca, hidden, N, limit)
    R = H // th
    flops = 2 * N * H * W * (9 * Ca * hidden + hidden * hidden + 9 * hidden * 2 * Ca)
    ce = pl.CostEstimate(
        flops=int(flops), transcendentals=int(4 * N * H * W * Ca),
        bytes_accessed=int(4 * (3 * N * H * W * Ca + 9 * Ca * hidden
                                + hidden * hidden + 18 * hidden * Ca)))
    kernel = functools.partial(_coupling_nn_kernel, H=H, W=W, Ca=Ca,
                               hidden=hidden, th=th, R=R)
    return pl.pallas_call(
        kernel,
        out_shape=(jax.ShapeDtypeStruct((N, H, W, Ca), jnp.float32),
                   jax.ShapeDtypeStruct((N, 1, 1), jnp.float32)),
        grid=(N, R),
        in_specs=[
            pl.BlockSpec((1, H, W, Ca), lambda n, r: (n, 0, 0, 0)),     # xb resident
            pl.BlockSpec((1, th, W, Ca), lambda n, r: (n, r, 0, 0)),    # xa row tile
            pl.BlockSpec((9, Ca, hidden), lambda n, r: (0, 0, 0)),      # conv1 w
            pl.BlockSpec((1, hidden), lambda n, r: (0, 0)),             # conv1 b
            pl.BlockSpec((hidden, hidden), lambda n, r: (0, 0)),        # conv2 w
            pl.BlockSpec((1, hidden), lambda n, r: (0, 0)),             # conv2 b
            pl.BlockSpec((9, hidden, 2 * Ca), lambda n, r: (0, 0, 0)),  # zconv w (t|s)
            pl.BlockSpec((1, 2 * Ca), lambda n, r: (0, 0)),             # zconv b
            pl.BlockSpec((1, 2 * Ca), lambda n, r: (0, 0)),             # zconv scale
        ],
        out_specs=(pl.BlockSpec((1, th, W, Ca), lambda n, r: (n, r, 0, 0)),
                   pl.BlockSpec((1, 1, 1), lambda n, r: (n, 0, 0))),
        scratch_shapes=[pltpu.VMEM((3, H + 4, W, Ca), jnp.float32),      # xb im2col
                        pltpu.VMEM((3, th + 2, W, hidden), jnp.float32)],  # h2 im2col
        compiler_params=pltpu.CompilerParams(
            dimension_semantics=("parallel", "arbitrary"),
            vmem_limit_bytes=limit),
        cost_estimate=ce,
    )(xb_img, xa_img, w1, b1.reshape(1, hidden), w2, b2.reshape(1, hidden),
      wz, bz.reshape(1, 2 * Ca), scz.reshape(1, 2 * Ca))


def prior_logp(x_img, z_img, pp, *, zero_input):
    N, H, W, Cz = z_img.shape
    Cin = pp["w"].shape[1]
    half = pp["w"].shape[2] // 2
    ce = pl.CostEstimate(flops=int(2 * N * H * W * 9 * Cin * 2 * half),
                         transcendentals=int(3 * N * H * W * half),
                         bytes_accessed=int(4 * (N * H * W * (Cin + Cz)
                                                 + 18 * Cin * half)))
    in_specs = []
    args = []
    if not zero_input:
        in_specs.append(pl.BlockSpec((1, H, W, Cin), lambda n: (n, 0, 0, 0)))
        args.append(x_img)
    in_specs += [pl.BlockSpec((1, H, W, Cz), lambda n: (n, 0, 0, 0)),
                 pl.BlockSpec((9, Cin, 2 * half), lambda n: (0, 0, 0)),
                 pl.BlockSpec((1, 2 * half), lambda n: (0, 0)),
                 pl.BlockSpec((1, 2 * half), lambda n: (0, 0))]
    args += [z_img, pp["w"], pp["b"].reshape(1, 2 * half),
             pp["sc"].reshape(1, 2 * half)]
    return pl.pallas_call(
        functools.partial(_prior_logp_kernel, H=H, W=W, Cin=Cin, half=half,
                          zero_input=zero_input),
        out_shape=jax.ShapeDtypeStruct((N, 1, 1), jnp.float32),
        grid=(N,),
        in_specs=in_specs,
        out_specs=pl.BlockSpec((1, 1, 1), lambda n: (n, 0, 0)),
        scratch_shapes=[pltpu.VMEM((3, H + 2, W, Cin), jnp.float32)],
        compiler_params=pltpu.CompilerParams(
            dimension_semantics=("parallel",),
            vmem_limit_bytes=_vmem_limit_bytes()),
        cost_estimate=ce,
    )(*args)


# ------------------------------------------------------------------ forward
def multi_scale_block_forward(x_nchw, logdet, params, *, n_flows, split=True):
    N, C, H, W = x_nchw.shape
    H2, W2 = H // 2, W // 2
    C4 = C * 4
    Ca = C4 // 2
    M = N * H2 * W2
    hw = H2 * W2

    # squeeze (identical view/permute as torch), then NHWC for the kernels
    sq = x_nchw.reshape(N, C, H2, 2, W2, 2).transpose(0, 1, 3, 5, 2, 4)
    out_nhwc = jnp.transpose(sq.reshape(N, C4, H2, W2), (0, 2, 3, 1))
    a = out_nhwc[..., :Ca].reshape(M, Ca)    # first C4/2 channels
    b = out_nhwc[..., Ca:].reshape(M, Ca)    # last C4/2 channels

    for i in range(n_flows):
        p = params["flows"][i]

        # ActNorm statistics (data-dependent init == torch first-call semantics)
        ma, la, mb, lb, dl = actnorm_stats(a, b, hw)
        logdet = logdet + dl[0, 0]

        # fused ActNorm apply + InvConv2dLU (outputs already split xa | xb)
        xa, xb = actnorm_invconv(a, b, ma, la, mb, lb,
                                 p["w_aa"], p["w_ba"], p["w_ab"], p["w_bb"])
        logdet = logdet + float(hw) * p["inv_logabsdet"]

        # fused coupling NN (+ per-batch logdet); h1/h2 never touch HBM
        ya, ld = coupling_nn(xb.reshape(N, H2, W2, Ca), xa.reshape(N, H2, W2, Ca),
                             p["conv1_w"], p["conv1_b"], p["conv2_w"], p["conv2_b"],
                             p["zconv_w"], p["zconv_b"], p["zconv_sc"])
        logdet = logdet + ld[:, 0, 0]

        a = ya.reshape(M, Ca)
        b = xb                   # yb == xb passes through untouched (no rewrite)

    # prior (ZeroConv2d) fused with the gaussian log-density
    pp = params["prior"]
    a_img = a.reshape(N, H2, W2, Ca)
    b_img = b.reshape(N, H2, W2, Ca)
    if split:
        # out.chunk(2,1): out == a, z_new == b
        lp = prior_logp(a_img, b_img, pp, zero_input=False)
        out_ret, z_new = a_img, b_img
    else:
        out_full = jnp.concatenate([a_img, b_img], axis=-1)
        lp = prior_logp(None, out_full, pp, zero_input=True)
        out_ret, z_new = out_full, out_full
    log_p = lp[:, 0, 0]

    # NCHW on the way out to preserve the PyTorch-facing interface.
    return (jnp.transpose(out_ret, (0, 3, 1, 2)), logdet, log_p,
            jnp.transpose(z_new, (0, 3, 1, 2)))


# ------------------------------------------------------------------ params
def init_params(key, C, n_flows, hidden, split=True):
    C4 = C * 4
    Ca = C4 // 2
    flows = []
    for _ in range(n_flows):
        key, k1, k2, k3, k4, k5 = jax.random.split(key, 6)
        # InvConv2dLU: W = QR(randn); torch reconstructs exactly this W from its
        # LU factors and sum(w_logs) == log|det W|.  Stored as the four (ca, ca)
        # blocks of W.T (forward is y = x @ W.T).
        q, _ = jnp.linalg.qr(jax.random.normal(k1, (C4, C4), jnp.float32))
        _, logabsdet = jnp.linalg.slogdet(q)
        wt = q.T
        conv1_w = 0.1 * jax.random.normal(k2, (hidden, Ca, 3, 3), jnp.float32)
        conv1_b = 0.1 * jax.random.normal(k3, (hidden,), jnp.float32)
        conv2_w = 0.1 * jax.random.normal(k4, (hidden, hidden, 1, 1), jnp.float32)
        conv2_b = 0.1 * jax.random.normal(k5, (hidden,), jnp.float32)
        flows.append(dict(
            w_aa=wt[:Ca, :Ca], w_ba=wt[Ca:, :Ca],
            w_ab=wt[:Ca, Ca:], w_bb=wt[Ca:, Ca:],
            inv_logabsdet=logabsdet,
            # conv1 packed as (9 taps, Cin, Cout) with tap index dy*3+dx
            conv1_w=jnp.transpose(conv1_w, (2, 3, 1, 0)).reshape(9, Ca, hidden),
            conv1_b=conv1_b,
            conv2_w=conv2_w[:, :, 0, 0].T,                     # (Cin, Cout)
            conv2_b=conv2_b,
            # ZeroConv2d of the coupling NN is zero-initialized in torch; its
            # output columns are packed [t | s] == torch channels [0::2 | 1::2]
            # so the kernel never does runtime stride-2 channel gathers.
            zconv_w=jnp.zeros((9, hidden, 2 * Ca), jnp.float32),
            zconv_b=jnp.zeros((2 * Ca,), jnp.float32),
            zconv_sc=jnp.zeros((2 * Ca,), jnp.float32),
        ))
    prior_cin, prior_cout = (C * 2, C * 4) if split else (C * 4, C * 8)
    half = prior_cout // 2
    # prior ZeroConv2d is zero-initialized; output columns are the contiguous
    # [mean | log_sd] halves used by .chunk(2, 1).
    prior = dict(
        w=jnp.zeros((9, prior_cin, 2 * half), jnp.float32),
        b=jnp.zeros((2 * half,), jnp.float32),
        sc=jnp.zeros((2 * half,), jnp.float32),
    )
    return dict(flows=flows, prior=prior)


if __name__ == "__main__":
    key = jax.random.PRNGKey(0)
    kx, kp = jax.random.split(key)
    N, C, H, W = 2, 4, 16, 16
    n_flows, hidden = 2, 32   # hidden reduced from 512 for a small synthetic run
    x = jax.random.normal(kx, (N, C, H, W), jnp.float32)
    logdet0 = jnp.zeros((N,), jnp.float32)
    params = init_params(kp, C, n_flows, hidden, split=True)

    fwd = jax.jit(functools.partial(multi_scale_block_forward,
                                    n_flows=n_flows, split=True))
    out, logdet, log_p, z_new = fwd(x, logdet0, params)
    jax.block_until_ready((out, logdet, log_p, z_new))
    print("KERNEL_OK")
</pallas_src>

<mosaic_0001>
module attributes {stable_mosaic.version = 11 : i64} {
  func.func @_actnorm_stats_kernel(%arg0: i32, %arg1: memref<32x8xf32, #tpu.memory_space<vmem>>, %arg2: memref<32x8xf32, #tpu.memory_space<vmem>>, %arg3: memref<1x8xf32, #tpu.memory_space<vmem>>, %arg4: memref<1x8xf32, #tpu.memory_space<vmem>>, %arg5: memref<1x8xf32, #tpu.memory_space<vmem>>, %arg6: memref<1x8xf32, #tpu.memory_space<vmem>>, %arg7: memref<1x1xf32, #tpu.memory_space<vmem>>) attributes {dimension_semantics = [#tpu.dimension_semantics<arbitrary>], iteration_bounds = array<i64: 4>, scalar_prefetch = 0 : i64, scratch_operands = 0 : i64, tpu.core_type = #tpu.core_type<tc>, window_params = [{transform_indices = @transform_0, window_bounds = array<i64: 32, 8>}, {transform_indices = @transform_1, window_bounds = array<i64: 32, 8>}, {pipeline_mode = #tpu.pipeline_mode<synchronous>, transform_indices = @transform_2, window_bounds = array<i64: 1, 8>}, {pipeline_mode = #tpu.pipeline_mode<synchronous>, transform_indices = @transform_3, window_bounds = array<i64: 1, 8>}, {pipeline_mode = #tpu.pipeline_mode<synchronous>, transform_indices = @transform_4, window_bounds = array<i64: 1, 8>}, {pipeline_mode = #tpu.pipeline_mode<synchronous>, transform_indices = @transform_5, window_bounds = array<i64: 1, 8>}, {pipeline_mode = #tpu.pipeline_mode<synchronous>, transform_indices = @transform_6, window_bounds = array<i64: 1, 1>}]} {
    %c0_i32 = arith.constant 0 : i32
    %0 = arith.cmpi eq, %arg0, %c0_i32 : i32
    %1 = arith.extui %0 : i1 to i32
    %c0_i32_0 = arith.constant 0 : i32
    %2 = arith.cmpi ne, %1, %c0_i32_0 : i32
    scf.if %2 {
      %cst_24 = arith.constant 0.000000e+00 : f32
      %30 = vector.broadcast %cst_24 : f32 to vector<1x8xf32>
      %c0_25 = arith.constant 0 : index
      %c0_26 = arith.constant 0 : index
      %31 = vector.load %arg3[%c0_25, %c0_26] : memref<1x8xf32, #tpu.memory_space<vmem>>, vector<1x8xf32>
      tpu.vector_store %arg3[%c0_25, %c0_26], %30 {strides = array<i32>} : memref<1x8xf32, #tpu.memory_space<vmem>>, vector<1x8xf32>,
      %cst_27 = arith.constant 0.000000e+00 : f32
      %32 = vector.broadcast %cst_27 : f32 to vector<1x8xf32>
      %c0_28 = arith.constant 0 : index
      %c0_29 = arith.constant 0 : index
      %33 = vector.load %arg4[%c0_28, %c0_29] : memref<1x8xf32, #tpu.memory_space<vmem>>, vector<1x8xf32>
      tpu.vector_store %arg4[%c0_28, %c0_29], %32 {strides = array<i32>} : memref<1x8xf32, #tpu.memory_space<vmem>>, vector<1x8xf32>,
      %cst_30 = arith.constant 0.000000e+00 : f32
      %34 = vector.broadcast %cst_30 : f32 to vector<1x8xf32>
      %c0_31 = arith.constant 0 : index
      %c0_32 = arith.constant 0 : index
      %35 = vector.load %arg5[%c0_31, %c0_32] : memref<1x8xf32, #tpu.memory_space<vmem>>, vector<1x8xf32>
      tpu.vector_store %arg5[%c0_31, %c0_32], %34 {strides = array<i32>} : memref<1x8xf32, #tpu.memory_space<vmem>>, vector<1x8xf32>,
      %cst_33 = arith.constant 0.000000e+00 : f32
      %36 = vector.broadcast %cst_33 : f32 to vector<1x8xf32>
      %c0_34 = arith.constant 0 : index
      %c0_35 = arith.constant 0 : index
      %37 = vector.load %arg6[%c0_34, %c0_35] : memref<1x8xf32, #tpu.memory_space<vmem>>, vector<1x8xf32>
      tpu.vector_store %arg6[%c0_34, %c0_35], %36 {strides = array<i32>} : memref<1x8xf32, #tpu.memory_space<vmem>>, vector<1x8xf32>,
    } else {
    }
    %c0 = arith.constant 0 : index
    %c0_1 = arith.constant 0 : index
    %3 = vector.load %arg1[%c0, %c0_1] : memref<32x8xf32, #tpu.memory_space<vmem>>, vector<32x8xf32>
    %c0_2 = arith.constant 0 : index
    %c0_3 = arith.constant 0 : index
    %4 = vector.load %arg2[%c0_2, %c0_3] : memref<32x8xf32, #tpu.memory_space<vmem>>, vector<32x8xf32>
    %c0_4 = arith.constant 0 : index
    %c0_5 = arith.constant 0 : index
    %5 = vector.load %arg3[%c0_4, %c0_5] : memref<1x8xf32, #tpu.memory_space<vmem>>, vector<1x8xf32>
    %cst = arith.constant dense<0.000000e+00> : vector<8xf32>
    %6 = vector.multi_reduction <add>, %3, %cst [0] : vector<32x8xf32> to vector<8xf32>
    %7 = vector.shape_cast %6 : vector<8xf32> to vector<1x8xf32>
    %8 = arith.addf %5, %7 : vector<1x8xf32>
    %c0_6 = arith.constant 0 : index
    %c0_7 = arith.constant 0 : index
    %9 = vector.load %arg3[%c0_6, %c0_7] : memref<1x8xf32, #tpu.memory_space<vmem>>, vector<1x8xf32>
    tpu.vector_store %arg3[%c0_6, %c0_7], %8 {strides = array<i32>} : memref<1x8xf32, #tpu.memory_space<vmem>>, vector<1x8xf32>,
    %c0_8 = arith.constant 0 : index
    %c0_9 = arith.constant 0 : index
    %10 = vector.load %arg4[%c0_8, %c0_9] : memref<1x8xf32, #tpu.memory_space<vmem>>, vector<1x8xf32>
    %11 = arith.mulf %3, %3 : vector<32x8xf32>
    %cst_10 = arith.constant dense<0.000000e+00> : vector<8xf32>
    %12 = vector.multi_reduction <add>, %11, %cst_10 [0] : vector<32x8xf32> to vector<8xf32>
    %13 = vector.shape_cast %12 : vector<8xf32> to vector<1x8xf32>
    %14 = arith.addf %10, %13 : vector<1x8xf32>
    %c0_11 = arith.constant 0 : index
    %c0_12 = arith.constant 0 : index
    %15 = vector.load %arg4[%c0_11, %c0_12] : memref<1x8xf32, #tpu.memory_space<vmem>>, vector<1x8xf32>
    tpu.vector_store %arg4[%c0_11, %c0_12], %14 {strides = array<i32>} : memref<1x8xf32, #tpu.memory_space<vmem>>, vector<1x8xf32>,
    %c0_13 = arith.constant 0 : index
    %c0_14 = arith.constant 0 : index
    %16 = vector.load %arg5[%c0_13, %c0_14] : memref<1x8xf32, #tpu.memory_space<vmem>>, vector<1x8xf32>
    %cst_15 = arith.constant dense<0.000000e+00> : vector<8xf32>
    %17 = vector.multi_reduction <add>, %4, %cst_15 [0] : vector<32x8xf32> to vector<8xf32>
    %18 = vector.shape_cast %17 : vector<8xf32> to vector<1x8xf32>
    %19 = arith.addf %16, %18 : vector<1x8xf32>
    %c0_16 = arith.constant 0 : index
    %c0_17 = arith.constant 0 : index
    %20 = vector.load %arg5[%c0_16, %c0_17] : memref<1x8xf32, #tpu.memory_space<vmem>>, vector<1x8xf32>
    tpu.vector_store %arg5[%c0_16, %c0_17], %19 {strides = array<i32>} : memref<1x8xf32, #tpu.memory_space<vmem>>, vector<1x8xf32>,
    %c0_18 = arith.constant 0 : index
    %c0_19 = arith.constant 0 : index
    %21 = vector.load %arg6[%c0_18, %c0_19] : memref<1x8xf32, #tpu.memory_space<vmem>>, vector<1x8xf32>
    %22 = arith.mulf %4, %4 : vector<32x8xf32>
    %cst_20 = arith.constant dense<0.000000e+00> : vector<8xf32>
    %23 = vector.multi_reduction <add>, %22, %cst_20 [0] : vector<32x8xf32> to vector<8xf32>
    %24 = vector.shape_cast %23 : vector<8xf32> to vector<1x8xf32>
    %25 = arith.addf %21, %24 : vector<1x8xf32>
    %c0_21 = arith.constant 0 : index
    %c0_22 = arith.constant 0 : index
    %26 = vector.load %arg6[%c0_21, %c0_22] : memref<1x8xf32, #tpu.memory_space<vmem>>, vector<1x8xf32>
    tpu.vector_store %arg6[%c0_21, %c0_22], %25 {strides = array<i32>} : memref<1x8xf32, #tpu.memory_space<vmem>>, vector<1x8xf32>,
    %c3_i32 = arith.constant 3 : i32
    %27 = arith.cmpi eq, %arg0, %c3_i32 : i32
    %28 = arith.extui %27 : i1 to i32
    %c0_i32_23 = arith.constant 0 : i32
    %29 = arith.cmpi ne, %28, %c0_i32_23 : i32
    scf.if %29 {
      %c0_24 = arith.constant 0 : index
      %c0_25 = arith.constant 0 : index
      %30 = vector.load %arg3[%c0_24, %c0_25] : memref<1x8xf32, #tpu.memory_space<vmem>>, vector<1x8xf32>
      %cst_26 = arith.constant 7.812500e-03 : f32
      %31 = vector.broadcast %cst_26 : f32 to vector<1x8xf32>
      %32 = arith.mulf %30, %31 : vector<1x8xf32>
      %c0_27 = arith.constant 0 : index
      %c0_28 = arith.constant 0 : index
      %33 = vector.load %arg5[%c0_27, %c0_28] : memref<1x8xf32, #tpu.memory_space<vmem>>, vector<1x8xf32>
      %cst_29 = arith.constant 7.812500e-03 : f32
      %34 = vector.broadcast %cst_29 : f32 to vector<1x8xf32>
      %35 = arith.mulf %33, %34 : vector<1x8xf32>
      %c0_30 = arith.constant 0 : index
      %c0_31 = arith.constant 0 : index
      %36 = vector.load %arg4[%c0_30, %c0_31] : memref<1x8xf32, #tpu.memory_space<vmem>>, vector<1x8xf32>
      %cst_32 = arith.constant 1.280000e+02 : f32
      %37 = vector.broadcast %cst_32 : f32 to vector<1x8xf32>
      %38 = arith.mulf %37, %32 : vector<1x8xf32>
      %39 = arith.mulf %38, %32 : vector<1x8xf32>
      %40 = arith.subf %36, %39 : vector<1x8xf32>
      %cst_33 = arith.constant 1.270000e+02 : f32
      %41 = vector.broadcast %cst_33 : f32 to vector<1x8xf32>
      %42 = arith.divf %40, %41 : vector<1x8xf32>
      %c0_34 = arith.constant 0 : index
      %c0_35 = arith.constant 0 : index
      %43 = vector.load %arg6[%c0_34, %c0_35] : memref<1x8xf32, #tpu.memory_space<vmem>>, vector<1x8xf32>
      %cst_36 = arith.constant 1.280000e+02 : f32
      %44 = vector.broadcast %cst_36 : f32 to vector<1x8xf32>
      %45 = arith.mulf %44, %35 : vector<1x8xf32>
      %46 = arith.mulf %45, %35 : vector<1x8xf32>
      %47 = arith.subf %43, %46 : vector<1x8xf32>
      %cst_37 = arith.constant 1.270000e+02 : f32
      %48 = vector.broadcast %cst_37 : f32 to vector<1x8xf32>
      %49 = arith.divf %47, %48 : vector<1x8xf32>
      %cst_38 = arith.constant 0.000000e+00 : f32
      %50 = vector.broadcast %cst_38 : f32 to vector<1x8xf32>
      %51 = arith.maximumf %42, %50 : vector<1x8xf32>
      %52 = math.sqrt %51 : vector<1x8xf32>
      %cst_39 = arith.constant 9.99999971E-10 : f32
      %53 = vector.broadcast %cst_39 : f32 to vector<1x8xf32>
      %54 = arith.addf %52, %53 : vector<1x8xf32>
      %cst_40 = arith.constant 1.000000e+00 : f32
      %55 = vector.broadcast %cst_40 : f32 to vector<1x8xf32>
      %56 = arith.divf %55, %54 : vector<1x8xf32>
      %57 = math.log %56 : vector<1x8xf32>
      %cst_41 = arith.constant 0.000000e+00 : f32
      %58 = vector.broadcast %cst_41 : f32 to vector<1x8xf32>
      %59 = arith.maximumf %49, %58 : vector<1x8xf32>
      %60 = math.sqrt %59 : vector<1x8xf32>
      %cst_42 = arith.constant 9.99999971E-10 : f32
      %61 = vector.broadcast %cst_42 : f32 to vector<1x8xf32>
      %62 = arith.addf %60, %61 : vector<1x8xf32>
      %cst_43 = arith.constant 1.000000e+00 : f32
      %63 = vector.broadcast %cst_43 : f32 to vector<1x8xf32>
      %64 = arith.divf %63, %62 : vector<1x8xf32>
      %65 = math.log %64 : vector<1x8xf32>
      %c0_44 = arith.constant 0 : index
      %c0_45 = arith.constant 0 : index
      %66 = vector.load %arg3[%c0_44, %c0_45] : memref<1x8xf32, #tpu.memory_space<vmem>>, vector<1x8xf32>
      tpu.vector_store %arg3[%c0_44, %c0_45], %32 {strides = array<i32>} : memref<1x8xf32, #tpu.memory_space<vmem>>, vector<1x8xf32>,
      %c0_46 = arith.constant 0 : index
      %c0_47 = arith.constant 0 : index
      %67 = vector.load %arg4[%c0_46, %c0_47] : memref<1x8xf32, #tpu.memory_space<vmem>>, vector<1x8xf32>
      tpu.vector_store %arg4[%c0_46, %c0_47], %57 {strides = array<i32>} : memref<1x8xf32, #tpu.memory_space<vmem>>, vector<1x8xf32>,
      %c0_48 = arith.constant 0 : index
      %c0_49 = arith.constant 0 : index
      %68 = vector.load %arg5[%c0_48, %c0_49] : memref<1x8xf32, #tpu.memory_space<vmem>>, vector<1x8xf32>
      tpu.vector_store %arg5[%c0_48, %c0_49], %35 {strides = array<i32>} : memref<1x8xf32, #tpu.memory_space<vmem>>, vector<1x8xf32>,
      %c0_50 = arith.constant 0 : index
      %c0_51 = arith.constant 0 : index
      %69 = vector.load %arg6[%c0_50, %c0_51] : memref<1x8xf32, #tpu.memory_space<vmem>>, vector<1x8xf32>
      tpu.vector_store %arg6[%c0_50, %c0_51], %65 {strides = array<i32>} : memref<1x8xf32, #tpu.memory_space<vmem>>, vector<1x8xf32>,
      %70 = vector.shape_cast %57 : vector<1x8xf32> to vector<1x1x8xf32>
      %cst_52 = arith.constant dense<0.000000e+00> : vector<1xf32>
      %71 = vector.multi_reduction <add>, %70, %cst_52 [1, 2] : vector<1x1x8xf32> to vector<1xf32>
      %72 = vector.shape_cast %71 : vector<1xf32> to vector<1x1x1xf32>
      %73 = vector.extract %72[0, 0, 0] : f32 from vector<1x1x1xf32>
      %74 = vector.shape_cast %65 : vector<1x8xf32> to vector<1x1x8xf32>
      %cst_53 = arith.constant dense<0.000000e+00> : vector<1xf32>
      %75 = vector.multi_reduction <add>, %74, %cst_53 [1, 2] : vector<1x1x8xf32> to vector<1xf32>
      %76 = vector.shape_cast %75 : vector<1xf32> to vector<1x1x1xf32>
      %77 = vector.extract %76[0, 0, 0] : f32 from vector<1x1x1xf32>
      %78 = arith.addf %73, %77 : f32
      %cst_54 = arith.constant 6.400000e+01 : f32
      %79 = arith.mulf %78, %cst_54 : f32
      %80 = vector.broadcast %79 : f32 to vector<1x1xf32>
      %c0_55 = arith.constant 0 : index
      %c0_56 = arith.constant 0 : index
      %81 = vector.load %arg7[%c0_55, %c0_56] : memref<1x1xf32, #tpu.memory_space<vmem>>, vector<1x1xf32>
      tpu.vector_store %arg7[%c0_55, %c0_56], %80 {strides = array<i32>} : memref<1x1xf32, #tpu.memory_space<vmem>>, vector<1x1xf32>,
    } else {
    }
    return
  }
  func.func @transform_0(%arg0: i32) -> (i32, i32) {
    %c0_i32 = arith.constant 0 : i32
    %c0_i32_0 = arith.constant 0 : i32
    return %arg0, %c0_i32 : i32, i32
  }
  func.func @transform_1(%arg0: i32) -> (i32, i32) {
    %c0_i32 = arith.constant 0 : i32
    %c0_i32_0 = arith.constant 0 : i32
    return %arg0, %c0_i32 : i32, i32
  }
  func.func @transform_2(%arg0: i32) -> (i32, i32) {
    %c0_i32 = arith.constant 0 : i32
    %c0_i32_0 = arith.constant 0 : i32
    %c0_i32_1 = arith.constant 0 : i32
    return %c0_i32, %c0_i32_0 : i32, i32
  }
  func.func @transform_3(%arg0: i32) -> (i32, i32) {
    %c0_i32 = arith.constant 0 : i32
    %c0_i32_0 = arith.constant 0 : i32
    %c0_i32_1 = arith.constant 0 : i32
    return %c0_i32, %c0_i32_0 : i32, i32
  }
  func.func @transform_4(%arg0: i32) -> (i32, i32) {
    %c0_i32 = arith.constant 0 : i32
    %c0_i32_0 = arith.constant 0 : i32
    %c0_i32_1 = arith.constant 0 : i32
    return %c0_i32, %c0_i32_0 : i32, i32
  }
  func.func @transform_5(%arg0: i32) -> (i32, i32) {
    %c0_i32 = arith.constant 0 : i32
    %c0_i32_0 = arith.constant 0 : i32
    %c0_i32_1 = arith.constant 0 : i32
    return %c0_i32, %c0_i32_0 : i32, i32
  }
  func.func @transform_6(%arg0: i32) -> (i32, i32) {
    %c0_i32 = arith.constant 0 : i32
    %c0_i32_0 = arith.constant 0 : i32
    %c0_i32_1 = arith.constant 0 : i32
    return %c0_i32, %c0_i32_0 : i32, i32
  }
}

module attributes {stable_mosaic.version = 11 : i64} {
  func.func @_actnorm_invconv_kernel(%arg0: i32, %arg1: memref<32x8xf32, #tpu.memory_space<vmem>>, %arg2: memref<32x8xf32, #tpu.memory_space<vmem>>, %arg3: memref<1x8xf32, #tpu.memory_space<vmem>>, %arg4: memref<1x8xf32, #tpu.memory_space<vmem>>, %arg5: memref<1x8xf32, #tpu.memory_space<vmem>>, %arg6: memref<1x8xf32, #tpu.memory_space<vmem>>, %arg7: memref<8x8xf32, #tpu.memory_space<vmem>>, %arg8: memref<8x8xf32, #tpu.memory_space<vmem>>, %arg9: memref<8x8xf32, #tpu.memory_space<vmem>>, %arg10: memref<8x8xf32, #tpu.memory_space<vmem>>, %arg11: memref<32x8xf32, #tpu.memory_space<vmem>>, %arg12: memref<32x8xf32, #tpu.memory_space<vmem>>) attributes {dimension_semantics = [#tpu.dimension_semantics<parallel>], iteration_bounds = array<i64: 4>, scalar_prefetch = 0 : i64, scratch_operands = 0 : i64, tpu.core_type = #tpu.core_type<tc>, window_params = [{transform_indices = @transform_0, window_bounds = array<i64: 32, 8>}, {transform_indices = @transform_1, window_bounds = array<i64: 32, 8>}, {pipeline_mode = #tpu.pipeline_mode<synchronous>, transform_indices = @transform_2, window_bounds = array<i64: 1, 8>}, {pipeline_mode = #tpu.pipeline_mode<synchronous>, transform_indices = @transform_3, window_bounds = array<i64: 1, 8>}, {pipeline_mode = #tpu.pipeline_mode<synchronous>, transform_indices = @transform_4, window_bounds = array<i64: 1, 8>}, {pipeline_mode = #tpu.pipeline_mode<synchronous>, transform_indices = @transform_5, window_bounds = array<i64: 1, 8>}, {pipeline_mode = #tpu.pipeline_mode<synchronous>, transform_indices = @transform_6, window_bounds = array<i64: 8, 8>}, {pipeline_mode = #tpu.pipeline_mode<synchronous>, transform_indices = @transform_7, window_bounds = array<i64: 8, 8>}, {pipeline_mode = #tpu.pipeline_mode<synchronous>, transform_indices = @transform_8, window_bounds = array<i64: 8, 8>}, {pipeline_mode = #tpu.pipeline_mode<synchronous>, transform_indices = @transform_9, window_bounds = array<i64: 8, 8>}, {transform_indices = @transform_10, window_bounds = array<i64: 32, 8>}, {transform_indices = @transform_11, window_bounds = array<i64: 32, 8>}]} {
    %c0 = arith.constant 0 : index
    %c0_0 = arith.constant 0 : index
    %0 = vector.load %arg4[%c0, %c0_0] : memref<1x8xf32, #tpu.memory_space<vmem>>, vector<1x8xf32>
    %1 = math.exp %0 : vector<1x8xf32>
    %cst = arith.constant 9.99999971E-10 : f32
    %2 = vector.broadcast %cst : f32 to vector<1x8xf32>
    %3 = arith.addf %1, %2 : vector<1x8xf32>
    %c0_1 = arith.constant 0 : index
    %c0_2 = arith.constant 0 : index
    %4 = vector.load %arg6[%c0_1, %c0_2] : memref<1x8xf32, #tpu.memory_space<vmem>>, vector<1x8xf32>
    %5 = math.exp %4 : vector<1x8xf32>
    %cst_3 = arith.constant 9.99999971E-10 : f32
    %6 = vector.broadcast %cst_3 : f32 to vector<1x8xf32>
    %7 = arith.addf %5, %6 : vector<1x8xf32>
    %c0_4 = arith.constant 0 : index
    %c0_5 = arith.constant 0 : index
    %8 = vector.load %arg1[%c0_4, %c0_5] : memref<32x8xf32, #tpu.memory_space<vmem>>, vector<32x8xf32>
    %c0_6 = arith.constant 0 : index
    %c0_7 = arith.constant 0 : index
    %9 = vector.load %arg3[%c0_6, %c0_7] : memref<1x8xf32, #tpu.memory_space<vmem>>, vector<1x8xf32>
    %10 = vector.broadcast %9 : vector<1x8xf32> to vector<32x8xf32>
    %11 = arith.subf %8, %10 : vector<32x8xf32>
    %12 = vector.broadcast %3 : vector<1x8xf32> to vector<32x8xf32>
    %13 = arith.mulf %11, %12 : vector<32x8xf32>
    %c0_8 = arith.constant 0 : index
    %c0_9 = arith.constant 0 : index
    %14 = vector.load %arg2[%c0_8, %c0_9] : memref<32x8xf32, #tpu.memory_space<vmem>>, vector<32x8xf32>
    %c0_10 = arith.constant 0 : index
    %c0_11 = arith.constant 0 : index
    %15 = vector.load %arg5[%c0_10, %c0_11] : memref<1x8xf32, #tpu.memory_space<vmem>>, vector<1x8xf32>
    %16 = vector.broadcast %15 : vector<1x8xf32> to vector<32x8xf32>
    %17 = arith.subf %14, %16 : vector<32x8xf32>
    %18 = vector.broadcast %7 : vector<1x8xf32> to vector<32x8xf32>
    %19 = arith.mulf %17, %18 : vector<32x8xf32>
    %c0_12 = arith.constant 0 : index
    %c0_13 = arith.constant 0 : index
    %20 = vector.load %arg7[%c0_12, %c0_13] : memref<8x8xf32, #tpu.memory_space<vmem>>, vector<8x8xf32>
    %cst_14 = arith.constant dense<0.000000e+00> : vector<32x8xf32>
    %21 = tpu.matmul %13, %20, %cst_14 {dimension_numbers = #tpu.dot_dimension_numbers<[1], [0], [0], [1], [0, 0, 1, 1], [], []>} : vector<32x8xf32>, vector<8x8xf32>, vector<32x8xf32> -> vector<32x8xf32>
    %c0_15 = arith.constant 0 : index
    %c0_16 = arith.constant 0 : index
    %22 = vector.load %arg8[%c0_15, %c0_16] : memref<8x8xf32, #tpu.memory_space<vmem>>, vector<8x8xf32>
    %cst_17 = arith.constant dense<0.000000e+00> : vector<32x8xf32>
    %23 = tpu.matmul %19, %22, %cst_17 {dimension_numbers = #tpu.dot_dimension_numbers<[1], [0], [0], [1], [0, 0, 1, 1], [], []>} : vector<32x8xf32>, vector<8x8xf32>, vector<32x8xf32> -> vector<32x8xf32>
    %24 = arith.addf %21, %23 : vector<32x8xf32>
    %c0_18 = arith.constant 0 : index
    %c0_19 = arith.constant 0 : index
    %25 = vector.load %arg11[%c0_18, %c0_19] : memref<32x8xf32, #tpu.memory_space<vmem>>, vector<32x8xf32>
    tpu.vector_store %arg11[%c0_18, %c0_19], %24 {strides = array<i32>} : memref<32x8xf32, #tpu.memory_space<vmem>>, vector<32x8xf32>,
    %c0_20 = arith.constant 0 : index
    %c0_21 = arith.constant 0 : index
    %26 = vector.load %arg9[%c0_20, %c0_21] : memref<8x8xf32, #tpu.memory_space<vmem>>, vector<8x8xf32>
    %cst_22 = arith.constant dense<0.000000e+00> : vector<32x8xf32>
    %27 = tpu.matmul %13, %26, %cst_22 {dimension_numbers = #tpu.dot_dimension_numbers<[1], [0], [0], [1], [0, 0, 1, 1], [], []>} : vector<32x8xf32>, vector<8x8xf32>, vector<32x8xf32> -> vector<32x8xf32>
    %c0_23 = arith.constant 0 : index
    %c0_24 = arith.constant 0 : index
    %28 = vector.load %arg10[%c0_23, %c0_24] : memref<8x8xf32, #tpu.memory_space<vmem>>, vector<8x8xf32>
    %cst_25 = arith.constant dense<0.000000e+00> : vector<32x8xf32>
    %29 = tpu.matmul %19, %28, %cst_25 {dimension_numbers = #tpu.dot_dimension_numbers<[1], [0], [0], [1], [0, 0, 1, 1], [], []>} : vector<32x8xf32>, vector<8x8xf32>, vector<32x8xf32> -> vector<32x8xf32>
    %30 = arith.addf %27, %29 : vector<32x8xf32>
    %c0_26 = arith.constant 0 : index
    %c0_27 = arith.constant 0 : index
    %31 = vector.load %arg12[%c0_26, %c0_27] : memref<32x8xf32, #tpu.memory_space<vmem>>, vector<32x8xf32>
    tpu.vector_store %arg12[%c0_26, %c0_27], %30 {strides = array<i32>} : memref<32x8xf32, #tpu.memory_space<vmem>>, vector<32x8xf32>,
    return
  }
  func.func @transform_0(%arg0: i32) -> (i32, i32) {
    %c0_i32 = arith.constant 0 : i32
    %c0_i32_0 = arith.constant 0 : i32
    return %arg0, %c0_i32 : i32, i32
  }
  func.func @transform_1(%arg0: i32) -> (i32, i32) {
    %c0_i32 = arith.constant 0 : i32
    %c0_i32_0 = arith.constant 0 : i32
    return %arg0, %c0_i32 : i32, i32
  }
  func.func @transform_2(%arg0: i32) -> (i32, i32) {
    %c0_i32 = arith.constant 0 : i32
    %c0_i32_0 = arith.constant 0 : i32
    %c0_i32_1 = arith.constant 0 : i32
    return %c0_i32, %c0_i32_0 : i32, i32
  }
  func.func @transform_3(%arg0: i32) -> (i32, i32) {
    %c0_i32 = arith.constant 0 : i32
    %c0_i32_0 = arith.constant 0 : i32
    %c0_i32_1 = arith.constant 0 : i32
    return %c0_i32, %c0_i32_0 : i32, i32
  }
  func.func @transform_4(%arg0: i32) -> (i32, i32) {
    %c0_i32 = arith.constant 0 : i32
    %c0_i32_0 = arith.constant 0 : i32
    %c0_i32_1 = arith.constant 0 : i32
    return %c0_i32, %c0_i32_0 : i32, i32
  }
  func.func @transform_5(%arg0: i32) -> (i32, i32) {
    %c0_i32 = arith.constant 0 : i32
    %c0_i32_0 = arith.constant 0 : i32
    %c0_i32_1 = arith.constant 0 : i32
    return %c0_i32, %c0_i32_0 : i32, i32
  }
  func.func @transform_6(%arg0: i32) -> (i32, i32) {
    %c0_i32 = arith.constant 0 : i32
    %c0_i32_0 = arith.constant 0 : i32
    %c0_i32_1 = arith.constant 0 : i32
    return %c0_i32, %c0_i32_0 : i32, i32
  }
  func.func @transform_7(%arg0: i32) -> (i32, i32) {
    %c0_i32 = arith.constant 0 : i32
    %c0_i32_0 = arith.constant 0 : i32
    %c0_i32_1 = arith.constant 0 : i32
    return %c0_i32, %c0_i32_0 : i32, i32
  }
  func.func @transform_8(%arg0: i32) -> (i32, i32) {
    %c0_i32 = arith.constant 0 : i32
    %c0_i32_0 = arith.constant 0 : i32
    %c0_i32_1 = arith.constant 0 : i32
    return %c0_i32, %c0_i32_0 : i32, i32
  }
  func.func @transform_9(%arg0: i32) -> (i32, i32) {
    %c0_i32 = arith.constant 0 : i32
    %c0_i32_0 = arith.constant 0 : i32
    %c0_i32_1 = arith.constant 0 : i32
    return %c0_i32, %c0_i32_0 : i32, i32
  }
  func.func @transform_10(%arg0: i32) -> (i32, i32) {
    %c0_i32 = arith.constant 0 : i32
    %c0_i32_0 = arith.constant 0 : i32
    return %arg0, %c0_i32 : i32, i32
  }
  func.func @transform_11(%arg0: i32) -> (i32, i32) {
    %c0_i32 = arith.constant 0 : i32
    %c0_i32_0 = arith.constant 0 : i32
    return %arg0, %c0_i32 : i32, i32
  }
}

module attributes {stable_mosaic.version = 11 : i64} {
  func.func @_coupling_nn_kernel(%arg0: i32, %arg1: i32, %arg2: memref<1x8x8x8xf32, #tpu.memory_space<vmem>>, %arg3: memref<1x4x8x8xf32, #tpu.memory_space<vmem>>, %arg4: memref<9x8x32xf32, #tpu.memory_space<vmem>>, %arg5: memref<1x32xf32, #tpu.memory_space<vmem>>, %arg6: memref<32x32xf32, #tpu.memory_space<vmem>>, %arg7: memref<1x32xf32, #tpu.memory_space<vmem>>, %arg8: memref<9x32x16xf32, #tpu.memory_space<vmem>>, %arg9: memref<1x16xf32, #tpu.memory_space<vmem>>, %arg10: memref<1x16xf32, #tpu.memory_space<vmem>>, %arg11: memref<1x4x8x8xf32, #tpu.memory_space<vmem>>, %arg12: memref<1x1x1xf32, #tpu.memory_space<vmem>>, %arg13: memref<3x12x8x8xf32, #tpu.memory_space<vmem>>, %arg14: memref<3x6x8x32xf32, #tpu.memory_space<vmem>>) attributes {dimension_semantics = [#tpu.dimension_semantics<parallel>, #tpu.dimension_semantics<arbitrary>], iteration_bounds = array<i64: 2, 2>, scalar_prefetch = 0 : i64, scratch_operands = 2 : i64, tpu.core_type = #tpu.core_type<tc>, window_params = [{transform_indices = @transform_0, window_bounds = array<i64: 1, 8, 8, 8>}, {transform_indices = @transform_1, window_bounds = array<i64: 1, 4, 8, 8>}, {pipeline_mode = #tpu.pipeline_mode<synchronous>, transform_indices = @transform_2, window_bounds = array<i64: 9, 8, 32>}, {pipeline_mode = #tpu.pipeline_mode<synchronous>, transform_indices = @transform_3, window_bounds = array<i64: 1, 32>}, {pipeline_mode = #tpu.pipeline_mode<synchronous>, transform_indices = @transform_4, window_bounds = array<i64: 32, 32>}, {pipeline_mode = #tpu.pipeline_mode<synchronous>, transform_indices = @transform_5, window_bounds = array<i64: 1, 32>}, {pipeline_mode = #tpu.pipeline_mode<synchronous>, transform_indices = @transform_6, window_bounds = array<i64: 9, 32, 16>}, {pipeline_mode = #tpu.pipeline_mode<synchronous>, transform_indices = @transform_7, window_bounds = array<i64: 1, 16>}, {pipeline_mode = #tpu.pipeline_mode<synchronous>, transform_indices = @transform_8, window_bounds = array<i64: 1, 16>}, {transform_indices = @transform_9, window_bounds = array<i64: 1, 4, 8, 8>}, {transform_indices = @transform_10, window_bounds = array<i64: 1, 1, 1>}]} {
    %c0_i32 = arith.constant 0 : i32
    %0 = arith.cmpi eq, %arg1, %c0_i32 : i32
    %1 = arith.extui %0 : i1 to i32
    %c0_i32_0 = arith.constant 0 : i32
    %2 = arith.cmpi ne, %1, %c0_i32_0 : i32
    scf.if %2 {
      %c0_194 = arith.constant 0 : index
      %c0_195 = arith.constant 0 : index
      %c0_196 = arith.constant 0 : index
      %c0_197 = arith.constant 0 : index
      %225 = vector.load %arg2[%c0_194, %c0_195, %c0_196, %c0_197] : memref<1x8x8x8xf32, #tpu.memory_space<vmem>>, vector<1x8x8x8xf32>
      %226 = vector.shape_cast %225 : vector<1x8x8x8xf32> to vector<8x8x8xf32>
      %cst_198 = arith.constant 0.000000e+00 : f32
      %227 = vector.broadcast %cst_198 : f32 to vector<2x8x8xf32>
      %cst_199 = arith.constant 0.000000e+00 : f32
      %228 = vector.broadcast %cst_199 : f32 to vector<8x1x8xf32>
      %c0_200 = arith.constant 0 : index
      %c0_201 = arith.constant 0 : index
      %c0_202 = arith.constant 0 : index
      %c0_203 = arith.constant 0 : index
      %229 = vector.load %arg13[%c0_200, %c0_201, %c0_202, %c0_203] : memref<3x12x8x8xf32, #tpu.memory_space<vmem>>, vector<1x2x8x8xf32>
      %230 = vector.shape_cast %229 : vector<1x2x8x8xf32> to vector<2x8x8xf32>
      %231 = vector.shape_cast %227 : vector<2x8x8xf32> to vector<1x2x8x8xf32>
      tpu.vector_store %arg13[%c0_200, %c0_201, %c0_202, %c0_203], %231 {strides = array<i32>} : memref<3x12x8x8xf32, #tpu.memory_space<vmem>>, vector<1x2x8x8xf32>,
      %c0_204 = arith.constant 0 : index
      %c10 = arith.constant 10 : index
      %c0_205 = arith.constant 0 : index
      %c0_206 = arith.constant 0 : index
      %232 = vector.load %arg13[%c0_204, %c10, %c0_205, %c0_206] : memref<3x12x8x8xf32, #tpu.memory_space<vmem>>, vector<1x2x8x8xf32>
      %233 = vector.shape_cast %232 : vector<1x2x8x8xf32> to vector<2x8x8xf32>
      %234 = vector.shape_cast %227 : vector<2x8x8xf32> to vector<1x2x8x8xf32>
      tpu.vector_store %arg13[%c0_204, %c10, %c0_205, %c0_206], %234 {strides = array<i32>} : memref<3x12x8x8xf32, #tpu.memory_space<vmem>>, vector<1x2x8x8xf32>,
      %c1_207 = arith.constant 1 : index
      %c0_208 = arith.constant 0 : index
      %c0_209 = arith.constant 0 : index
      %c0_210 = arith.constant 0 : index
      %235 = vector.load %arg13[%c1_207, %c0_208, %c0_209, %c0_210] : memref<3x12x8x8xf32, #tpu.memory_space<vmem>>, vector<1x2x8x8xf32>
      %236 = vector.shape_cast %235 : vector<1x2x8x8xf32> to vector<2x8x8xf32>
      %237 = vector.shape_cast %227 : vector<2x8x8xf32> to vector<1x2x8x8xf32>
      tpu.vector_store %arg13[%c1_207, %c0_208, %c0_209, %c0_210], %237 {strides = array<i32>} : memref<3x12x8x8xf32, #tpu.memory_space<vmem>>, vector<1x2x8x8xf32>,
      %c1_211 = arith.constant 1 : index
      %c10_212 = arith.constant 10 : index
      %c0_213 = arith.constant 0 : index
      %c0_214 = arith.constant 0 : index
      %238 = vector.load %arg13[%c1_211, %c10_212, %c0_213, %c0_214] : memref<3x12x8x8xf32, #tpu.memory_space<vmem>>, vector<1x2x8x8xf32>
      %239 = vector.shape_cast %238 : vector<1x2x8x8xf32> to vector<2x8x8xf32>
      %240 = vector.shape_cast %227 : vector<2x8x8xf32> to vector<1x2x8x8xf32>
      tpu.vector_store %arg13[%c1_211, %c10_212, %c0_213, %c0_214], %240 {strides = array<i32>} : memref<3x12x8x8xf32, #tpu.memory_space<vmem>>, vector<1x2x8x8xf32>,
      %c2_215 = arith.constant 2 : index
      %c0_216 = arith.constant 0 : index
      %c0_217 = arith.constant 0 : index
      %c0_218 = arith.constant 0 : index
      %241 = vector.load %arg13[%c2_215, %c0_216, %c0_217, %c0_218] : memref<3x12x8x8xf32, #tpu.memory_space<vmem>>, vector<1x2x8x8xf32>
      %242 = vector.shape_cast %241 : vector<1x2x8x8xf32> to vector<2x8x8xf32>
      %243 = vector.shape_cast %227 : vector<2x8x8xf32> to vector<1x2x8x8xf32>
      tpu.vector_store %arg13[%c2_215, %c0_216, %c0_217, %c0_218], %243 {strides = array<i32>} : memref<3x12x8x8xf32, #tpu.memory_space<vmem>>, vector<1x2x8x8xf32>,
      %c2_219 = arith.constant 2 : index
      %c10_220 = arith.constant 10 : index
      %c0_221 = arith.constant 0 : index
      %c0_222 = arith.constant 0 : index
      %244 = vector.load %arg13[%c2_219, %c10_220, %c0_221, %c0_222] : memref<3x12x8x8xf32, #tpu.memory_space<vmem>>, vector<1x2x8x8xf32>
      %245 = vector.shape_cast %244 : vector<1x2x8x8xf32> to vector<2x8x8xf32>
      %246 = vector.shape_cast %227 : vector<2x8x8xf32> to vector<1x2x8x8xf32>
      tpu.vector_store %arg13[%c2_219, %c10_220, %c0_221, %c0_222], %246 {strides = array<i32>} : memref<3x12x8x8xf32, #tpu.memory_space<vmem>>, vector<1x2x8x8xf32>,
      %c1_223 = arith.constant 1 : index
      %c2_224 = arith.constant 2 : index
      %c0_225 = arith.constant 0 : index
      %c0_226 = arith.constant 0 : index
      %247 = vector.load %arg13[%c1_223, %c2_224, %c0_225, %c0_226] : memref<3x12x8x8xf32, #tpu.memory_space<vmem>>, vector<1x8x8x8xf32>
      %248 = vector.shape_cast %247 : vector<1x8x8x8xf32> to vector<8x8x8xf32>
      %249 = vector.shape_cast %226 : vector<8x8x8xf32> to vector<1x8x8x8xf32>
      tpu.vector_store %arg13[%c1_223, %c2_224, %c0_225, %c0_226], %249 {strides = array<i32>} : memref<3x12x8x8xf32, #tpu.memory_space<vmem>>, vector<1x8x8x8xf32>,
      %250 = vector.extract_strided_slice %226 {offsets = [0, 0, 0], sizes = [8, 7, 8], strides = [1, 1, 1]} : vector<8x8x8xf32> to vector<8x7x8xf32>
      %c0_227 = arith.constant 0 : index
      %c2_228 = arith.constant 2 : index
      %c1_229 = arith.constant 1 : index
      %c0_230 = arith.constant 0 : index
      %251 = vector.load %arg13[%c0_227, %c2_228, %c1_229, %c0_230] : memref<3x12x8x8xf32, #tpu.memory_space<vmem>>, vector<1x8x7x8xf32>
      %252 = vector.shape_cast %251 : vector<1x8x7x8xf32> to vector<8x7x8xf32>
      %253 = vector.shape_cast %250 : vector<8x7x8xf32> to vector<1x8x7x8xf32>
      tpu.vector_store %arg13[%c0_227, %c2_228, %c1_229, %c0_230], %253 {strides = array<i32>} : memref<3x12x8x8xf32, #tpu.memory_space<vmem>>, vector<1x8x7x8xf32>,
      %c0_231 = arith.constant 0 : index
      %c2_232 = arith.constant 2 : index
      %c0_233 = arith.constant 0 : index
      %c0_234 = arith.constant 0 : index
      %254 = vector.load %arg13[%c0_231, %c2_232, %c0_233, %c0_234] : memref<3x12x8x8xf32, #tpu.memory_space<vmem>>, vector<1x8x1x8xf32>
      %255 = vector.shape_cast %254 : vector<1x8x1x8xf32> to vector<8x1x8xf32>
      %256 = vector.shape_cast %228 : vector<8x1x8xf32> to vector<1x8x1x8xf32>
      tpu.vector_store %arg13[%c0_231, %c2_232, %c0_233, %c0_234], %256 {strides = array<i32>} : memref<3x12x8x8xf32, #tpu.memory_space<vmem>>, vector<1x8x1x8xf32>,
      %257 = vector.extract_strided_slice %226 {offsets = [0, 1, 0], sizes = [8, 7, 8], strides = [1, 1, 1]} : vector<8x8x8xf32> to vector<8x7x8xf32>
      %c2_235 = arith.constant 2 : index
      %c2_236 = arith.constant 2 : index
      %c0_237 = arith.constant 0 : index
      %c0_238 = arith.constant 0 : index
      %258 = vector.load %arg13[%c2_235, %c2_236, %c0_237, %c0_238] : memref<3x12x8x8xf32, #tpu.memory_space<vmem>>, vector<1x8x7x8xf32>
      %259 = vector.shape_cast %258 : vector<1x8x7x8xf32> to vector<8x7x8xf32>
      %260 = vector.shape_cast %257 : vector<8x7x8xf32> to vector<1x8x7x8xf32>
      tpu.vector_store %arg13[%c2_235, %c2_236, %c0_237, %c0_238], %260 {strides = array<i32>} : memref<3x12x8x8xf32, #tpu.memory_space<vmem>>, vector<1x8x7x8xf32>,
      %c2_239 = arith.constant 2 : index
      %c2_240 = arith.constant 2 : index
      %c7_241 = arith.constant 7 : index
      %c0_242 = arith.constant 0 : index
      %261 = vector.load %arg13[%c2_239, %c2_240, %c7_241, %c0_242] : memref<3x12x8x8xf32, #tpu.memory_space<vmem>>, vector<1x8x1x8xf32>
      %262 = vector.shape_cast %261 : vector<1x8x1x8xf32> to vector<8x1x8xf32>
      %263 = vector.shape_cast %228 : vector<8x1x8xf32> to vector<1x8x1x8xf32>
      tpu.vector_store %arg13[%c2_239, %c2_240, %c7_241, %c0_242], %263 {strides = array<i32>} : memref<3x12x8x8xf32, #tpu.memory_space<vmem>>, vector<1x8x1x8xf32>,
      %cst_243 = arith.constant 0.000000e+00 : f32
      %264 = vector.broadcast %cst_243 : f32 to vector<1x1x1xf32>
      %c0_244 = arith.constant 0 : index
      %c0_245 = arith.constant 0 : index
      %c0_246 = arith.constant 0 : index
      %265 = vector.load %arg12[%c0_244, %c0_245, %c0_246] : memref<1x1x1xf32, #tpu.memory_space<vmem>>, vector<1x1x1xf32>
      tpu.vector_store %arg12[%c0_244, %c0_245, %c0_246], %264 {strides = array<i32>} : memref<1x1x1xf32, #tpu.memory_space<vmem>>, vector<1x1x1xf32>,
    } else {
    }
    %c4_i32 = arith.constant 4 : i32
    %3 = arith.muli %arg1, %c4_i32 : i32
    %cst = arith.constant 0.000000e+00 : f32
    %4 = vector.broadcast %cst : f32 to vector<48x32xf32>
    %c0_i32_1 = arith.constant 0 : i32
    %5 = arith.addi %3, %c0_i32_1 : i32
    %c0 = arith.constant 0 : index
    %6 = arith.index_cast %5 : i32 to index
    %c0_2 = arith.constant 0 : index
    %c0_3 = arith.constant 0 : index
    %7 = vector.load %arg13[%c0, %6, %c0_2, %c0_3] : memref<3x12x8x8xf32, #tpu.memory_space<vmem>>, vector<1x6x8x8xf32>
    %8 = vector.shape_cast %7 : vector<1x6x8x8xf32> to vector<6x8x8xf32>
    %9 = vector.shape_cast %8 : vector<6x8x8xf32> to vector<48x8xf32>
    %c0_4 = arith.constant 0 : index
    %c0_5 = arith.constant 0 : index
    %c0_6 = arith.constant 0 : index
    %10 = vector.load %arg4[%c0_4, %c0_5, %c0_6] : memref<9x8x32xf32, #tpu.memory_space<vmem>>, vector<1x8x32xf32>
    %11 = vector.shape_cast %10 : vector<1x8x32xf32> to vector<8x32xf32>
    %cst_7 = arith.constant dense<0.000000e+00> : vector<48x32xf32>
    %12 = tpu.matmul %9, %11, %cst_7 {dimension_numbers = #tpu.dot_dimension_numbers<[1], [0], [0], [1], [0, 0, 1, 1], [], []>} : vector<48x8xf32>, vector<8x32xf32>, vector<48x32xf32> -> vector<48x32xf32>
    %13 = arith.addf %4, %12 : vector<48x32xf32>
    %c0_i32_8 = arith.constant 0 : i32
    %14 = arith.addi %3, %c0_i32_8 : i32
    %c1 = arith.constant 1 : index
    %15 = arith.index_cast %14 : i32 to index
    %c0_9 = arith.constant 0 : index
    %c0_10 = arith.constant 0 : index
    %16 = vector.load %arg13[%c1, %15, %c0_9, %c0_10] : memref<3x12x8x8xf32, #tpu.memory_space<vmem>>, vector<1x6x8x8xf32>
    %17 = vector.shape_cast %16 : vector<1x6x8x8xf32> to vector<6x8x8xf32>
    %18 = vector.shape_cast %17 : vector<6x8x8xf32> to vector<48x8xf32>
    %c1_11 = arith.constant 1 : index
    %c0_12 = arith.constant 0 : index
    %c0_13 = arith.constant 0 : index
    %19 = vector.load %arg4[%c1_11, %c0_12, %c0_13] : memref<9x8x32xf32, #tpu.memory_space<vmem>>, vector<1x8x32xf32>
    %20 = vector.shape_cast %19 : vector<1x8x32xf32> to vector<8x32xf32>
    %cst_14 = arith.constant dense<0.000000e+00> : vector<48x32xf32>
    %21 = tpu.matmul %18, %20, %cst_14 {dimension_numbers = #tpu.dot_dimension_numbers<[1], [0], [0], [1], [0, 0, 1, 1], [], []>} : vector<48x8xf32>, vector<8x32xf32>, vector<48x32xf32> -> vector<48x32xf32>
    %22 = arith.addf %13, %21 : vector<48x32xf32>
    %c0_i32_15 = arith.constant 0 : i32
    %23 = arith.addi %3, %c0_i32_15 : i32
    %c2 = arith.constant 2 : index
    %24 = arith.index_cast %23 : i32 to index
    %c0_16 = arith.constant 0 : index
    %c0_17 = arith.constant 0 : index
    %25 = vector.load %arg13[%c2, %24, %c0_16, %c0_17] : memref<3x12x8x8xf32, #tpu.memory_space<vmem>>, vector<1x6x8x8xf32>
    %26 = vector.shape_cast %25 : vector<1x6x8x8xf32> to vector<6x8x8xf32>
    %27 = vector.shape_cast %26 : vector<6x8x8xf32> to vector<48x8xf32>
    %c2_18 = arith.constant 2 : index
    %c0_19 = arith.constant 0 : index
    %c0_20 = arith.constant 0 : index
    %28 = vector.load %arg4[%c2_18, %c0_19, %c0_20] : memref<9x8x32xf32, #tpu.memory_space<vmem>>, vector<1x8x32xf32>
    %29 = vector.shape_cast %28 : vector<1x8x32xf32> to vector<8x32xf32>
    %cst_21 = arith.constant dense<0.000000e+00> : vector<48x32xf32>
    %30 = tpu.matmul %27, %29, %cst_21 {dimension_numbers = #tpu.dot_dimension_numbers<[1], [0], [0], [1], [0, 0, 1, 1], [], []>} : vector<48x8xf32>, vector<8x32xf32>, vector<48x32xf32> -> vector<48x32xf32>
    %31 = arith.addf %22, %30 : vector<48x32xf32>
    %c1_i32 = arith.constant 1 : i32
    %32 = arith.addi %3, %c1_i32 : i32
    %c0_22 = arith.constant 0 : index
    %33 = arith.index_cast %32 : i32 to index
    %c0_23 = arith.constant 0 : index
    %c0_24 = arith.constant 0 : index
    %34 = vector.load %arg13[%c0_22, %33, %c0_23, %c0_24] : memref<3x12x8x8xf32, #tpu.memory_space<vmem>>, vector<1x6x8x8xf32>
    %35 = vector.shape_cast %34 : vector<1x6x8x8xf32> to vector<6x8x8xf32>
    %36 = vector.shape_cast %35 : vector<6x8x8xf32> to vector<48x8xf32>
    %c3 = arith.constant 3 : index
    %c0_25 = arith.constant 0 : index
    %c0_26 = arith.constant 0 : index
    %37 = vector.load %arg4[%c3, %c0_25, %c0_26] : memref<9x8x32xf32, #tpu.memory_space<vmem>>, vector<1x8x32xf32>
    %38 = vector.shape_cast %37 : vector<1x8x32xf32> to vector<8x32xf32>
    %cst_27 = arith.constant dense<0.000000e+00> : vector<48x32xf32>
    %39 = tpu.matmul %36, %38, %cst_27 {dimension_numbers = #tpu.dot_dimension_numbers<[1], [0], [0], [1], [0, 0, 1, 1], [], []>} : vector<48x8xf32>, vector<8x32xf32>, vector<48x32xf32> -> vector<48x32xf32>
    %40 = arith.addf %31, %39 : vector<48x32xf32>
    %c1_i32_28 = arith.constant 1 : i32
    %41 = arith.addi %3, %c1_i32_28 : i32
    %c1_29 = arith.constant 1 : index
    %42 = arith.index_cast %41 : i32 to index
    %c0_30 = arith.constant 0 : index
    %c0_31 = arith.constant 0 : index
    %43 = vector.load %arg13[%c1_29, %42, %c0_30, %c0_31] : memref<3x12x8x8xf32, #tpu.memory_space<vmem>>, vector<1x6x8x8xf32>
    %44 = vector.shape_cast %43 : vector<1x6x8x8xf32> to vector<6x8x8xf32>
    %45 = vector.shape_cast %44 : vector<6x8x8xf32> to vector<48x8xf32>
    %c4 = arith.constant 4 : index
    %c0_32 = arith.constant 0 : index
    %c0_33 = arith.constant 0 : index
    %46 = vector.load %arg4[%c4, %c0_32, %c0_33] : memref<9x8x32xf32, #tpu.memory_space<vmem>>, vector<1x8x32xf32>
    %47 = vector.shape_cast %46 : vector<1x8x32xf32> to vector<8x32xf32>
    %cst_34 = arith.constant dense<0.000000e+00> : vector<48x32xf32>
    %48 = tpu.matmul %45, %47, %cst_34 {dimension_numbers = #tpu.dot_dimension_numbers<[1], [0], [0], [1], [0, 0, 1, 1], [], []>} : vector<48x8xf32>, vector<8x32xf32>, vector<48x32xf32> -> vector<48x32xf32>
    %49 = arith.addf %40, %48 : vector<48x32xf32>
    %c1_i32_35 = arith.constant 1 : i32
    %50 = arith.addi %3, %c1_i32_35 : i32
    %c2_36 = arith.constant 2 : index
    %51 = arith.index_cast %50 : i32 to index
    %c0_37 = arith.constant 0 : index
    %c0_38 = arith.constant 0 : index
    %52 = vector.load %arg13[%c2_36, %51, %c0_37, %c0_38] : memref<3x12x8x8xf32, #tpu.memory_space<vmem>>, vector<1x6x8x8xf32>
    %53 = vector.shape_cast %52 : vector<1x6x8x8xf32> to vector<6x8x8xf32>
    %54 = vector.shape_cast %53 : vector<6x8x8xf32> to vector<48x8xf32>
    %c5 = arith.constant 5 : index
    %c0_39 = arith.constant 0 : index
    %c0_40 = arith.constant 0 : index
    %55 = vector.load %arg4[%c5, %c0_39, %c0_40] : memref<9x8x32xf32, #tpu.memory_space<vmem>>, vector<1x8x32xf32>
    %56 = vector.shape_cast %55 : vector<1x8x32xf32> to vector<8x32xf32>
    %cst_41 = arith.constant dense<0.000000e+00> : vector<48x32xf32>
    %57 = tpu.matmul %54, %56, %cst_41 {dimension_numbers = #tpu.dot_dimension_numbers<[1], [0], [0], [1], [0, 0, 1, 1], [], []>} : vector<48x8xf32>, vector<8x32xf32>, vector<48x32xf32> -> vector<48x32xf32>
    %58 = arith.addf %49, %57 : vector<48x32xf32>
    %c2_i32 = arith.constant 2 : i32
    %59 = arith.addi %3, %c2_i32 : i32
    %c0_42 = arith.constant 0 : index
    %60 = arith.index_cast %59 : i32 to index
    %c0_43 = arith.constant 0 : index
    %c0_44 = arith.constant 0 : index
    %61 = vector.load %arg13[%c0_42, %60, %c0_43, %c0_44] : memref<3x12x8x8xf32, #tpu.memory_space<vmem>>, vector<1x6x8x8xf32>
    %62 = vector.shape_cast %61 : vector<1x6x8x8xf32> to vector<6x8x8xf32>
    %63 = vector.shape_cast %62 : vector<6x8x8xf32> to vector<48x8xf32>
    %c6 = arith.constant 6 : index
    %c0_45 = arith.constant 0 : index
    %c0_46 = arith.constant 0 : index
    %64 = vector.load %arg4[%c6, %c0_45, %c0_46] : memref<9x8x32xf32, #tpu.memory_space<vmem>>, vector<1x8x32xf32>
    %65 = vector.shape_cast %64 : vector<1x8x32xf32> to vector<8x32xf32>
    %cst_47 = arith.constant dense<0.000000e+00> : vector<48x32xf32>
    %66 = tpu.matmul %63, %65, %cst_47 {dimension_numbers = #tpu.dot_dimension_numbers<[1], [0], [0], [1], [0, 0, 1, 1], [], []>} : vector<48x8xf32>, vector<8x32xf32>, vector<48x32xf32> -> vector<48x32xf32>
    %67 = arith.addf %58, %66 : vector<48x32xf32>
    %c2_i32_48 = arith.constant 2 : i32
    %68 = arith.addi %3, %c2_i32_48 : i32
    %c1_49 = arith.constant 1 : index
    %69 = arith.index_cast %68 : i32 to index
    %c0_50 = arith.constant 0 : index
    %c0_51 = arith.constant 0 : index
    %70 = vector.load %arg13[%c1_49, %69, %c0_50, %c0_51] : memref<3x12x8x8xf32, #tpu.memory_space<vmem>>, vector<1x6x8x8xf32>
    %71 = vector.shape_cast %70 : vector<1x6x8x8xf32> to vector<6x8x8xf32>
    %72 = vector.shape_cast %71 : vector<6x8x8xf32> to vector<48x8xf32>
    %c7 = arith.constant 7 : index
    %c0_52 = arith.constant 0 : index
    %c0_53 = arith.constant 0 : index
    %73 = vector.load %arg4[%c7, %c0_52, %c0_53] : memref<9x8x32xf32, #tpu.memory_space<vmem>>, vector<1x8x32xf32>
    %74 = vector.shape_cast %73 : vector<1x8x32xf32> to vector<8x32xf32>
    %cst_54 = arith.constant dense<0.000000e+00> : vector<48x32xf32>
    %75 = tpu.matmul %72, %74, %cst_54 {dimension_numbers = #tpu.dot_dimension_numbers<[1], [0], [0], [1], [0, 0, 1, 1], [], []>} : vector<48x8xf32>, vector<8x32xf32>, vector<48x32xf32> -> vector<48x32xf32>
    %76 = arith.addf %67, %75 : vector<48x32xf32>
    %c2_i32_55 = arith.constant 2 : i32
    %77 = arith.addi %3, %c2_i32_55 : i32
    %c2_56 = arith.constant 2 : index
    %78 = arith.index_cast %77 : i32 to index
    %c0_57 = arith.constant 0 : index
    %c0_58 = arith.constant 0 : index
    %79 = vector.load %arg13[%c2_56, %78, %c0_57, %c0_58] : memref<3x12x8x8xf32, #tpu.memory_space<vmem>>, vector<1x6x8x8xf32>
    %80 = vector.shape_cast %79 : vector<1x6x8x8xf32> to vector<6x8x8xf32>
    %81 = vector.shape_cast %80 : vector<6x8x8xf32> to vector<48x8xf32>
    %c8 = arith.constant 8 : index
    %c0_59 = arith.constant 0 : index
    %c0_60 = arith.constant 0 : index
    %82 = vector.load %arg4[%c8, %c0_59, %c0_60] : memref<9x8x32xf32, #tpu.memory_space<vmem>>, vector<1x8x32xf32>
    %83 = vector.shape_cast %82 : vector<1x8x32xf32> to vector<8x32xf32>
    %cst_61 = arith.constant dense<0.000000e+00> : vector<48x32xf32>
    %84 = tpu.matmul %81, %83, %cst_61 {dimension_numbers = #tpu.dot_dimension_numbers<[1], [0], [0], [1], [0, 0, 1, 1], [], []>} : vector<48x8xf32>, vector<8x32xf32>, vector<48x32xf32> -> vector<48x32xf32>
    %85 = arith.addf %76, %84 : vector<48x32xf32>
    %c0_62 = arith.constant 0 : index
    %c0_63 = arith.constant 0 : index
    %86 = vector.load %arg5[%c0_62, %c0_63] : memref<1x32xf32, #tpu.memory_space<vmem>>, vector<1x32xf32>
    %87 = vector.broadcast %86 : vector<1x32xf32> to vector<48x32xf32>
    %88 = arith.addf %85, %87 : vector<48x32xf32>
    %cst_64 = arith.constant 0.000000e+00 : f32
    %89 = vector.broadcast %cst_64 : f32 to vector<48x32xf32>
    %90 = arith.maximumf %88, %89 : vector<48x32xf32>
    %c0_65 = arith.constant 0 : index
    %c0_66 = arith.constant 0 : index
    %91 = vector.load %arg6[%c0_65, %c0_66] : memref<32x32xf32, #tpu.memory_space<vmem>>, vector<32x32xf32>
    %cst_67 = arith.constant dense<0.000000e+00> : vector<48x32xf32>
    %92 = tpu.matmul %90, %91, %cst_67 {dimension_numbers = #tpu.dot_dimension_numbers<[1], [0], [0], [1], [0, 0, 1, 1], [], []>} : vector<48x32xf32>, vector<32x32xf32>, vector<48x32xf32> -> vector<48x32xf32>
    %c0_68 = arith.constant 0 : index
    %c0_69 = arith.constant 0 : index
    %93 = vector.load %arg7[%c0_68, %c0_69] : memref<1x32xf32, #tpu.memory_space<vmem>>, vector<1x32xf32>
    %94 = vector.broadcast %93 : vector<1x32xf32> to vector<48x32xf32>
    %95 = arith.addf %92, %94 : vector<48x32xf32>
    %cst_70 = arith.constant 0.000000e+00 : f32
    %96 = vector.broadcast %cst_70 : f32 to vector<48x32xf32>
    %97 = arith.maximumf %95, %96 : vector<48x32xf32>
    %98 = vector.shape_cast %97 : vector<48x32xf32> to vector<6x8x32xf32>
    %cst_71 = arith.constant 1.000000e+00 : f32
    %99 = vector.broadcast %cst_71 : f32 to vector<6x1x32xf32>
    %c1_72 = arith.constant 1 : index
    %c0_73 = arith.constant 0 : index
    %c0_74 = arith.constant 0 : index
    %c0_75 = arith.constant 0 : index
    %100 = vector.load %arg14[%c1_72, %c0_73, %c0_74, %c0_75] : memref<3x6x8x32xf32, #tpu.memory_space<vmem>>, vector<1x6x8x32xf32>
    %101 = vector.shape_cast %100 : vector<1x6x8x32xf32> to vector<6x8x32xf32>
    %102 = vector.shape_cast %98 : vector<6x8x32xf32> to vector<1x6x8x32xf32>
    tpu.vector_store %arg14[%c1_72, %c0_73, %c0_74, %c0_75], %102 {strides = array<i32>} : memref<3x6x8x32xf32, #tpu.memory_space<vmem>>, vector<1x6x8x32xf32>,
    %103 = vector.extract_strided_slice %98 {offsets = [0, 0, 0], sizes = [6, 7, 32], strides = [1, 1, 1]} : vector<6x8x32xf32> to vector<6x7x32xf32>
    %c0_76 = arith.constant 0 : index
    %c0_77 = arith.constant 0 : index
    %c1_78 = arith.constant 1 : index
    %c0_79 = arith.constant 0 : index
    %104 = vector.load %arg14[%c0_76, %c0_77, %c1_78, %c0_79] : memref<3x6x8x32xf32, #tpu.memory_space<vmem>>, vector<1x6x7x32xf32>
    %105 = vector.shape_cast %104 : vector<1x6x7x32xf32> to vector<6x7x32xf32>
    %106 = vector.shape_cast %103 : vector<6x7x32xf32> to vector<1x6x7x32xf32>
    tpu.vector_store %arg14[%c0_76, %c0_77, %c1_78, %c0_79], %106 {strides = array<i32>} : memref<3x6x8x32xf32, #tpu.memory_space<vmem>>, vector<1x6x7x32xf32>,
    %c0_80 = arith.constant 0 : index
    %c0_81 = arith.constant 0 : index
    %c0_82 = arith.constant 0 : index
    %c0_83 = arith.constant 0 : index
    %107 = vector.load %arg14[%c0_80, %c0_81, %c0_82, %c0_83] : memref<3x6x8x32xf32, #tpu.memory_space<vmem>>, vector<1x6x1x32xf32>
    %108 = vector.shape_cast %107 : vector<1x6x1x32xf32> to vector<6x1x32xf32>
    %109 = vector.shape_cast %99 : vector<6x1x32xf32> to vector<1x6x1x32xf32>
    tpu.vector_store %arg14[%c0_80, %c0_81, %c0_82, %c0_83], %109 {strides = array<i32>} : memref<3x6x8x32xf32, #tpu.memory_space<vmem>>, vector<1x6x1x32xf32>,
    %110 = vector.extract_strided_slice %98 {offsets = [0, 1, 0], sizes = [6, 7, 32], strides = [1, 1, 1]} : vector<6x8x32xf32> to vector<6x7x32xf32>
    %c2_84 = arith.constant 2 : index
    %c0_85 = arith.constant 0 : index
    %c0_86 = arith.constant 0 : index
    %c0_87 = arith.constant 0 : index
    %111 = vector.load %arg14[%c2_84, %c0_85, %c0_86, %c0_87] : memref<3x6x8x32xf32, #tpu.memory_space<vmem>>, vector<1x6x7x32xf32>
    %112 = vector.shape_cast %111 : vector<1x6x7x32xf32> to vector<6x7x32xf32>
    %113 = vector.shape_cast %110 : vector<6x7x32xf32> to vector<1x6x7x32xf32>
    tpu.vector_store %arg14[%c2_84, %c0_85, %c0_86, %c0_87], %113 {strides = array<i32>} : memref<3x6x8x32xf32, #tpu.memory_space<vmem>>, vector<1x6x7x32xf32>,
    %c2_88 = arith.constant 2 : index
    %c0_89 = arith.constant 0 : index
    %c7_90 = arith.constant 7 : index
    %c0_91 = arith.constant 0 : index
    %114 = vector.load %arg14[%c2_88, %c0_89, %c7_90, %c0_91] : memref<3x6x8x32xf32, #tpu.memory_space<vmem>>, vector<1x6x1x32xf32>
    %115 = vector.shape_cast %114 : vector<1x6x1x32xf32> to vector<6x1x32xf32>
    %116 = vector.shape_cast %99 : vector<6x1x32xf32> to vector<1x6x1x32xf32>
    tpu.vector_store %arg14[%c2_88, %c0_89, %c7_90, %c0_91], %116 {strides = array<i32>} : memref<3x6x8x32xf32, #tpu.memory_space<vmem>>, vector<1x6x1x32xf32>,
    %c0_i32_92 = arith.constant 0 : i32
    %117 = arith.cmpi eq, %arg1, %c0_i32_92 : i32
    %118 = arith.extui %117 : i1 to i32
    %c0_i32_93 = arith.constant 0 : i32
    %119 = arith.cmpi ne, %118, %c0_i32_93 : i32
    scf.if %119 {
      %cst_194 = arith.constant 1.000000e+00 : f32
      %225 = vector.broadcast %cst_194 : f32 to vector<3x1x8x32xf32>
      %c0_195 = arith.constant 0 : index
      %c0_196 = arith.constant 0 : index
      %c0_197 = arith.constant 0 : index
      %c0_198 = arith.constant 0 : index
      %226 = vector.load %arg14[%c0_195, %c0_196, %c0_197, %c0_198] : memref<3x6x8x32xf32, #tpu.memory_space<vmem>>, vector<3x1x8x32xf32>
      tpu.vector_store %arg14[%c0_195, %c0_196, %c0_197, %c0_198], %225 {strides = array<i32>} : memref<3x6x8x32xf32, #tpu.memory_space<vmem>>, vector<3x1x8x32xf32>,
    } else {
    }
    %c1_i32_94 = arith.constant 1 : i32
    %120 = arith.cmpi eq, %arg1, %c1_i32_94 : i32
    %121 = arith.extui %120 : i1 to i32
    %c0_i32_95 = arith.constant 0 : i32
    %122 = arith.cmpi ne, %121, %c0_i32_95 : i32
    scf.if %122 {
      %cst_194 = arith.constant 1.000000e+00 : f32
      %225 = vector.broadcast %cst_194 : f32 to vector<3x1x8x32xf32>
      %c0_195 = arith.constant 0 : index
      %c5_196 = arith.constant 5 : index
      %c0_197 = arith.constant 0 : index
      %c0_198 = arith.constant 0 : index
      %226 = vector.load %arg14[%c0_195, %c5_196, %c0_197, %c0_198] : memref<3x6x8x32xf32, #tpu.memory_space<vmem>>, vector<3x1x8x32xf32>
      tpu.vector_store %arg14[%c0_195, %c5_196, %c0_197, %c0_198], %225 {strides = array<i32>} : memref<3x6x8x32xf32, #tpu.memory_space<vmem>>, vector<3x1x8x32xf32>,
    } else {
    }
    %cst_96 = arith.constant 0.000000e+00 : f32
    %123 = vector.broadcast %cst_96 : f32 to vector<32x16xf32>
    %c0_97 = arith.constant 0 : index
    %c0_98 = arith.constant 0 : index
    %c0_99 = arith.constant 0 : index
    %c0_100 = arith.constant 0 : index
    %124 = vector.load %arg14[%c0_97, %c0_98, %c0_99, %c0_100] : memref<3x6x8x32xf32, #tpu.memory_space<vmem>>, vector<1x4x8x32xf32>
    %125 = vector.shape_cast %124 : vector<1x4x8x32xf32> to vector<4x8x32xf32>
    %126 = vector.shape_cast %125 : vector<4x8x32xf32> to vector<32x32xf32>
    %c0_101 = arith.constant 0 : index
    %c0_102 = arith.constant 0 : index
    %c0_103 = arith.constant 0 : index
    %127 = vector.load %arg8[%c0_101, %c0_102, %c0_103] : memref<9x32x16xf32, #tpu.memory_space<vmem>>, vector<1x32x16xf32>
    %128 = vector.shape_cast %127 : vector<1x32x16xf32> to vector<32x16xf32>
    %cst_104 = arith.constant dense<0.000000e+00> : vector<32x16xf32>
    %129 = tpu.matmul %126, %128, %cst_104 {dimension_numbers = #tpu.dot_dimension_numbers<[1], [0], [0], [1], [0, 0, 1, 1], [], []>} : vector<32x32xf32>, vector<32x16xf32>, vector<32x16xf32> -> vector<32x16xf32>
    %130 = arith.addf %123, %129 : vector<32x16xf32>
    %c1_105 = arith.constant 1 : index
    %c0_106 = arith.constant 0 : index
    %c0_107 = arith.constant 0 : index
    %c0_108 = arith.constant 0 : index
    %131 = vector.load %arg14[%c1_105, %c0_106, %c0_107, %c0_108] : memref<3x6x8x32xf32, #tpu.memory_space<vmem>>, vector<1x4x8x32xf32>
    %132 = vector.shape_cast %131 : vector<1x4x8x32xf32> to vector<4x8x32xf32>
    %133 = vector.shape_cast %132 : vector<4x8x32xf32> to vector<32x32xf32>
    %c1_109 = arith.constant 1 : index
    %c0_110 = arith.constant 0 : index
    %c0_111 = arith.constant 0 : index
    %134 = vector.load %arg8[%c1_109, %c0_110, %c0_111] : memref<9x32x16xf32, #tpu.memory_space<vmem>>, vector<1x32x16xf32>
    %135 = vector.shape_cast %134 : vector<1x32x16xf32> to vector<32x16xf32>
    %cst_112 = arith.constant dense<0.000000e+00> : vector<32x16xf32>
    %136 = tpu.matmul %133, %135, %cst_112 {dimension_numbers = #tpu.dot_dimension_numbers<[1], [0], [0], [1], [0, 0, 1, 1], [], []>} : vector<32x32xf32>, vector<32x16xf32>, vector<32x16xf32> -> vector<32x16xf32>
    %137 = arith.addf %130, %136 : vector<32x16xf32>
    %c2_113 = arith.constant 2 : index
    %c0_114 = arith.constant 0 : index
    %c0_115 = arith.constant 0 : index
    %c0_116 = arith.constant 0 : index
    %138 = vector.load %arg14[%c2_113, %c0_114, %c0_115, %c0_116] : memref<3x6x8x32xf32, #tpu.memory_space<vmem>>, vector<1x4x8x32xf32>
    %139 = vector.shape_cast %138 : vector<1x4x8x32xf32> to vector<4x8x32xf32>
    %140 = vector.shape_cast %139 : vector<4x8x32xf32> to vector<32x32xf32>
    %c2_117 = arith.constant 2 : index
    %c0_118 = arith.constant 0 : index
    %c0_119 = arith.constant 0 : index
    %141 = vector.load %arg8[%c2_117, %c0_118, %c0_119] : memref<9x32x16xf32, #tpu.memory_space<vmem>>, vector<1x32x16xf32>
    %142 = vector.shape_cast %141 : vector<1x32x16xf32> to vector<32x16xf32>
    %cst_120 = arith.constant dense<0.000000e+00> : vector<32x16xf32>
    %143 = tpu.matmul %140, %142, %cst_120 {dimension_numbers = #tpu.dot_dimension_numbers<[1], [0], [0], [1], [0, 0, 1, 1], [], []>} : vector<32x32xf32>, vector<32x16xf32>, vector<32x16xf32> -> vector<32x16xf32>
    %144 = arith.addf %137, %143 : vector<32x16xf32>
    %c0_121 = arith.constant 0 : index
    %c1_122 = arith.constant 1 : index
    %c0_123 = arith.constant 0 : index
    %c0_124 = arith.constant 0 : index
    %145 = vector.load %arg14[%c0_121, %c1_122, %c0_123, %c0_124] : memref<3x6x8x32xf32, #tpu.memory_space<vmem>>, vector<1x4x8x32xf32>
    %146 = vector.shape_cast %145 : vector<1x4x8x32xf32> to vector<4x8x32xf32>
    %147 = vector.shape_cast %146 : vector<4x8x32xf32> to vector<32x32xf32>
    %c3_125 = arith.constant 3 : index
    %c0_126 = arith.constant 0 : index
    %c0_127 = arith.constant 0 : index
    %148 = vector.load %arg8[%c3_125, %c0_126, %c0_127] : memref<9x32x16xf32, #tpu.memory_space<vmem>>, vector<1x32x16xf32>
    %149 = vector.shape_cast %148 : vector<1x32x16xf32> to vector<32x16xf32>
    %cst_128 = arith.constant dense<0.000000e+00> : vector<32x16xf32>
    %150 = tpu.matmul %147, %149, %cst_128 {dimension_numbers = #tpu.dot_dimension_numbers<[1], [0], [0], [1], [0, 0, 1, 1], [], []>} : vector<32x32xf32>, vector<32x16xf32>, vector<32x16xf32> -> vector<32x16xf32>
    %151 = arith.addf %144, %150 : vector<32x16xf32>
    %c1_129 = arith.constant 1 : index
    %c1_130 = arith.constant 1 : index
    %c0_131 = arith.constant 0 : index
    %c0_132 = arith.constant 0 : index
    %152 = vector.load %arg14[%c1_129, %c1_130, %c0_131, %c0_132] : memref<3x6x8x32xf32, #tpu.memory_space<vmem>>, vector<1x4x8x32xf32>
    %153 = vector.shape_cast %152 : vector<1x4x8x32xf32> to vector<4x8x32xf32>
    %154 = vector.shape_cast %153 : vector<4x8x32xf32> to vector<32x32xf32>
    %c4_133 = arith.constant 4 : index
    %c0_134 = arith.constant 0 : index
    %c0_135 = arith.constant 0 : index
    %155 = vector.load %arg8[%c4_133, %c0_134, %c0_135] : memref<9x32x16xf32, #tpu.memory_space<vmem>>, vector<1x32x16xf32>
    %156 = vector.shape_cast %155 : vector<1x32x16xf32> to vector<32x16xf32>
    %cst_136 = arith.constant dense<0.000000e+00> : vector<32x16xf32>
    %157 = tpu.matmul %154, %156, %cst_136 {dimension_numbers = #tpu.dot_dimension_numbers<[1], [0], [0], [1], [0, 0, 1, 1], [], []>} : vector<32x32xf32>, vector<32x16xf32>, vector<32x16xf32> -> vector<32x16xf32>
    %158 = arith.addf %151, %157 : vector<32x16xf32>
    %c2_137 = arith.constant 2 : index
    %c1_138 = arith.constant 1 : index
    %c0_139 = arith.constant 0 : index
    %c0_140 = arith.constant 0 : index
    %159 = vector.load %arg14[%c2_137, %c1_138, %c0_139, %c0_140] : memref<3x6x8x32xf32, #tpu.memory_space<vmem>>, vector<1x4x8x32xf32>
    %160 = vector.shape_cast %159 : vector<1x4x8x32xf32> to vector<4x8x32xf32>
    %161 = vector.shape_cast %160 : vector<4x8x32xf32> to vector<32x32xf32>
    %c5_141 = arith.constant 5 : index
    %c0_142 = arith.constant 0 : index
    %c0_143 = arith.constant 0 : index
    %162 = vector.load %arg8[%c5_141, %c0_142, %c0_143] : memref<9x32x16xf32, #tpu.memory_space<vmem>>, vector<1x32x16xf32>
    %163 = vector.shape_cast %162 : vector<1x32x16xf32> to vector<32x16xf32>
    %cst_144 = arith.constant dense<0.000000e+00> : vector<32x16xf32>
    %164 = tpu.matmul %161, %163, %cst_144 {dimension_numbers = #tpu.dot_dimension_numbers<[1], [0], [0], [1], [0, 0, 1, 1], [], []>} : vector<32x32xf32>, vector<32x16xf32>, vector<32x16xf32> -> vector<32x16xf32>
    %165 = arith.addf %158, %164 : vector<32x16xf32>
    %c0_145 = arith.constant 0 : index
    %c2_146 = arith.constant 2 : index
    %c0_147 = arith.constant 0 : index
    %c0_148 = arith.constant 0 : index
    %166 = vector.load %arg14[%c0_145, %c2_146, %c0_147, %c0_148] : memref<3x6x8x32xf32, #tpu.memory_space<vmem>>, vector<1x4x8x32xf32>
    %167 = vector.shape_cast %166 : vector<1x4x8x32xf32> to vector<4x8x32xf32>
    %168 = vector.shape_cast %167 : vector<4x8x32xf32> to vector<32x32xf32>
    %c6_149 = arith.constant 6 : index
    %c0_150 = arith.constant 0 : index
    %c0_151 = arith.constant 0 : index
    %169 = vector.load %arg8[%c6_149, %c0_150, %c0_151] : memref<9x32x16xf32, #tpu.memory_space<vmem>>, vector<1x32x16xf32>
    %170 = vector.shape_cast %169 : vector<1x32x16xf32> to vector<32x16xf32>
    %cst_152 = arith.constant dense<0.000000e+00> : vector<32x16xf32>
    %171 = tpu.matmul %168, %170, %cst_152 {dimension_numbers = #tpu.dot_dimension_numbers<[1], [0], [0], [1], [0, 0, 1, 1], [], []>} : vector<32x32xf32>, vector<32x16xf32>, vector<32x16xf32> -> vector<32x16xf32>
    %172 = arith.addf %165, %171 : vector<32x16xf32>
    %c1_153 = arith.constant 1 : index
    %c2_154 = arith.constant 2 : index
    %c0_155 = arith.constant 0 : index
    %c0_156 = arith.constant 0 : index
    %173 = vector.load %arg14[%c1_153, %c2_154, %c0_155, %c0_156] : memref<3x6x8x32xf32, #tpu.memory_space<vmem>>, vector<1x4x8x32xf32>
    %174 = vector.shape_cast %173 : vector<1x4x8x32xf32> to vector<4x8x32xf32>
    %175 = vector.shape_cast %174 : vector<4x8x32xf32> to vector<32x32xf32>
    %c7_157 = arith.constant 7 : index
    %c0_158 = arith.constant 0 : index
    %c0_159 = arith.constant 0 : index
    %176 = vector.load %arg8[%c7_157, %c0_158, %c0_159] : memref<9x32x16xf32, #tpu.memory_space<vmem>>, vector<1x32x16xf32>
    %177 = vector.shape_cast %176 : vector<1x32x16xf32> to vector<32x16xf32>
    %cst_160 = arith.constant dense<0.000000e+00> : vector<32x16xf32>
    %178 = tpu.matmul %175, %177, %cst_160 {dimension_numbers = #tpu.dot_dimension_numbers<[1], [0], [0], [1], [0, 0, 1, 1], [], []>} : vector<32x32xf32>, vector<32x16xf32>, vector<32x16xf32> -> vector<32x16xf32>
    %179 = arith.addf %172, %178 : vector<32x16xf32>
    %c2_161 = arith.constant 2 : index
    %c2_162 = arith.constant 2 : index
    %c0_163 = arith.constant 0 : index
    %c0_164 = arith.constant 0 : index
    %180 = vector.load %arg14[%c2_161, %c2_162, %c0_163, %c0_164] : memref<3x6x8x32xf32, #tpu.memory_space<vmem>>, vector<1x4x8x32xf32>
    %181 = vector.shape_cast %180 : vector<1x4x8x32xf32> to vector<4x8x32xf32>
    %182 = vector.shape_cast %181 : vector<4x8x32xf32> to vector<32x32xf32>
    %c8_165 = arith.constant 8 : index
    %c0_166 = arith.constant 0 : index
    %c0_167 = arith.constant 0 : index
    %183 = vector.load %arg8[%c8_165, %c0_166, %c0_167] : memref<9x32x16xf32, #tpu.memory_space<vmem>>, vector<1x32x16xf32>
    %184 = vector.shape_cast %183 : vector<1x32x16xf32> to vector<32x16xf32>
    %cst_168 = arith.constant dense<0.000000e+00> : vector<32x16xf32>
    %185 = tpu.matmul %182, %184, %cst_168 {dimension_numbers = #tpu.dot_dimension_numbers<[1], [0], [0], [1], [0, 0, 1, 1], [], []>} : vector<32x32xf32>, vector<32x16xf32>, vector<32x16xf32> -> vector<32x16xf32>
    %186 = arith.addf %179, %185 : vector<32x16xf32>
    %c0_169 = arith.constant 0 : index
    %c0_170 = arith.constant 0 : index
    %187 = vector.load %arg9[%c0_169, %c0_170] : memref<1x16xf32, #tpu.memory_space<vmem>>, vector<1x16xf32>
    %188 = vector.broadcast %187 : vector<1x16xf32> to vector<32x16xf32>
    %189 = arith.addf %186, %188 : vector<32x16xf32>
    %c0_171 = arith.constant 0 : index
    %c0_172 = arith.constant 0 : index
    %190 = vector.load %arg10[%c0_171, %c0_172] : memref<1x16xf32, #tpu.memory_space<vmem>>, vector<1x16xf32>
    %cst_173 = arith.constant 3.000000e+00 : f32
    %191 = vector.broadcast %cst_173 : f32 to vector<1x16xf32>
    %192 = arith.mulf %191, %190 : vector<1x16xf32>
    %193 = math.exp %192 : vector<1x16xf32>
    %194 = vector.broadcast %193 : vector<1x16xf32> to vector<32x16xf32>
    %195 = arith.mulf %189, %194 : vector<32x16xf32>
    %196 = vector.extract_strided_slice %195 {offsets = [0, 0], sizes = [32, 8], strides = [1, 1]} : vector<32x16xf32> to vector<32x8xf32>
    %197 = vector.extract_strided_slice %195 {offsets = [0, 8], sizes = [32, 8], strides = [1, 1]} : vector<32x16xf32> to vector<32x8xf32>
    %cst_174 = arith.constant 2.000000e+00 : f32
    %198 = vector.broadcast %cst_174 : f32 to vector<32x8xf32>
    %199 = arith.addf %197, %198 : vector<32x8xf32>
    %cst_175 = arith.constant 0.000000e+00 : f32
    %200 = vector.broadcast %cst_175 : f32 to vector<32x8xf32>
    %201 = arith.subf %200, %199 : vector<32x8xf32>
    %202 = math.exp %201 : vector<32x8xf32>
    %cst_176 = arith.constant 1.000000e+00 : f32
    %203 = vector.broadcast %cst_176 : f32 to vector<32x8xf32>
    %204 = arith.addf %203, %202 : vector<32x8xf32>
    %cst_177 = arith.constant 1.000000e+00 : f32
    %205 = vector.broadcast %cst_177 : f32 to vector<32x8xf32>
    %206 = arith.divf %205, %204 : vector<32x8xf32>
    %cst_178 = arith.constant 9.99999971E-10 : f32
    %207 = vector.broadcast %cst_178 : f32 to vector<32x8xf32>
    %208 = arith.addf %206, %207 : vector<32x8xf32>
    %c0_179 = arith.constant 0 : index
    %c0_180 = arith.constant 0 : index
    %c0_181 = arith.constant 0 : index
    %c0_182 = arith.constant 0 : index
    %209 = vector.load %arg3[%c0_179, %c0_180, %c0_181, %c0_182] : memref<1x4x8x8xf32, #tpu.memory_space<vmem>>, vector<1x4x8x8xf32>
    %210 = vector.shape_cast %209 : vector<1x4x8x8xf32> to vector<4x8x8xf32>
    %211 = vector.shape_cast %210 : vector<4x8x8xf32> to vector<32x8xf32>
    %212 = arith.addf %211, %196 : vector<32x8xf32>
    %213 = arith.mulf %212, %208 : vector<32x8xf32>
    %214 = vector.shape_cast %213 : vector<32x8xf32> to vector<1x4x8x8xf32>
    %c0_183 = arith.constant 0 : index
    %c0_184 = arith.constant 0 : index
    %c0_185 = arith.constant 0 : index
    %c0_186 = arith.constant 0 : index
    %215 = vector.load %arg11[%c0_183, %c0_184, %c0_185, %c0_186] : memref<1x4x8x8xf32, #tpu.memory_space<vmem>>, vector<1x4x8x8xf32>
    tpu.vector_store %arg11[%c0_183, %c0_184, %c0_185, %c0_186], %214 {strides = array<i32>} : memref<1x4x8x8xf32, #tpu.memory_space<vmem>>, vector<1x4x8x8xf32>,
    %c0_187 = arith.constant 0 : index
    %c0_188 = arith.constant 0 : index
    %c0_189 = arith.constant 0 : index
    %216 = vector.load %arg12[%c0_187, %c0_188, %c0_189] : memref<1x1x1xf32, #tpu.memory_space<vmem>>, vector<1x1x1xf32>
    %217 = math.log %208 : vector<32x8xf32>
    %218 = vector.shape_cast %217 : vector<32x8xf32> to vector<1x32x8xf32>
    %cst_190 = arith.constant dense<0.000000e+00> : vector<1xf32>
    %219 = vector.multi_reduction <add>, %218, %cst_190 [1, 2] : vector<1x32x8xf32> to vector<1xf32>
    %220 = vector.shape_cast %219 : vector<1xf32> to vector<1x1x1xf32>
    %221 = vector.extract %220[0, 0, 0] : f32 from vector<1x1x1xf32>
    %222 = vector.broadcast %221 : f32 to vector<1x1x1xf32>
    %223 = arith.addf %216, %222 : vector<1x1x1xf32>
    %c0_191 = arith.constant 0 : index
    %c0_192 = arith.constant 0 : index
    %c0_193 = arith.constant 0 : index
    %224 = vector.load %arg12[%c0_191, %c0_192, %c0_193] : memref<1x1x1xf32, #tpu.memory_space<vmem>>, vector<1x1x1xf32>
    tpu.vector_store %arg12[%c0_191, %c0_192, %c0_193], %223 {strides = array<i32>} : memref<1x1x1xf32, #tpu.memory_space<vmem>>, vector<1x1x1xf32>,
    return
  }
  func.func @transform_0(%arg0: i32, %arg1: i32) -> (i32, i32, i32, i32) {
    %c0_i32 = arith.constant 0 : i32
    %c0_i32_0 = arith.constant 0 : i32
    %c0_i32_1 = arith.constant 0 : i32
    %c0_i32_2 = arith.constant 0 : i32
    return %arg0, %c0_i32, %c0_i32_0, %c0_i32_1 : i32, i32, i32, i32
  }
  func.func @transform_1(%arg0: i32, %arg1: i32) -> (i32, i32, i32, i32) {
    %c0_i32 = arith.constant 0 : i32
    %c0_i32_0 = arith.constant 0 : i32
    %c0_i32_1 = arith.constant 0 : i32
    return %arg0, %arg1, %c0_i32, %c0_i32_0 : i32, i32, i32, i32
  }
  func.func @transform_2(%arg0: i32, %arg1: i32) -> (i32, i32, i32) {
    %c0_i32 = arith.constant 0 : i32
    %c0_i32_0 = arith.constant 0 : i32
    %c0_i32_1 = arith.constant 0 : i32
    %c0_i32_2 = arith.constant 0 : i32
    return %c0_i32, %c0_i32_0, %c0_i32_1 : i32, i32, i32
  }
  func.func @transform_3(%arg0: i32, %arg1: i32) -> (i32, i32) {
    %c0_i32 = arith.constant 0 : i32
    %c0_i32_0 = arith.constant 0 : i32
    %c0_i32_1 = arith.constant 0 : i32
    return %c0_i32, %c0_i32_0 : i32, i32
  }
  func.func @transform_4(%arg0: i32, %arg1: i32) -> (i32, i32) {
    %c0_i32 = arith.constant 0 : i32
    %c0_i32_0 = arith.constant 0 : i32
    %c0_i32_1 = arith.constant 0 : i32
    return %c0_i32, %c0_i32_0 : i32, i32
  }
  func.func @transform_5(%arg0: i32, %arg1: i32) -> (i32, i32) {
    %c0_i32 = arith.constant 0 : i32
    %c0_i32_0 = arith.constant 0 : i32
    %c0_i32_1 = arith.constant 0 : i32
    return %c0_i32, %c0_i32_0 : i32, i32
  }
  func.func @transform_6(%arg0: i32, %arg1: i32) -> (i32, i32, i32) {
    %c0_i32 = arith.constant 0 : i32
    %c0_i32_0 = arith.constant 0 : i32
    %c0_i32_1 = arith.constant 0 : i32
    %c0_i32_2 = arith.constant 0 : i32
    return %c0_i32, %c0_i32_0, %c0_i32_1 : i32, i32, i32
  }
  func.func @transform_7(%arg0: i32, %arg1: i32) -> (i32, i32) {
    %c0_i32 = arith.constant 0 : i32
    %c0_i32_0 = arith.constant 0 : i32
    %c0_i32_1 = arith.constant 0 : i32
    return %c0_i32, %c0_i32_0 : i32, i32
  }
  func.func @transform_8(%arg0: i32, %arg1: i32) -> (i32, i32) {
    %c0_i32 = arith.constant 0 : i32
    %c0_i32_0 = arith.constant 0 : i32
    %c0_i32_1 = arith.constant 0 : i32
    return %c0_i32, %c0_i32_0 : i32, i32
  }
  func.func @transform_9(%arg0: i32, %arg1: i32) -> (i32, i32, i32, i32) {
    %c0_i32 = arith.constant 0 : i32
    %c0_i32_0 = arith.constant 0 : i32
    %c0_i32_1 = arith.constant 0 : i32
    return %arg0, %arg1, %c0_i32, %c0_i32_0 : i32, i32, i32, i32
  }
  func.func @transform_10(%arg0: i32, %arg1: i32) -> (i32, i32, i32) {
    %c0_i32 = arith.constant 0 : i32
    %c0_i32_0 = arith.constant 0 : i32
    %c0_i32_1 = arith.constant 0 : i32
    return %arg0, %c0_i32, %c0_i32_0 : i32, i32, i32
  }
}

module attributes {stable_mosaic.version = 11 : i64} {
  func.func @_prior_logp_kernel(%arg0: i32, %arg1: memref<1x8x8x8xf32, #tpu.memory_space<vmem>>, %arg2: memref<1x8x8x8xf32, #tpu.memory_space<vmem>>, %arg3: memref<9x8x16xf32, #tpu.memory_space<vmem>>, %arg4: memref<1x16xf32, #tpu.memory_space<vmem>>, %arg5: memref<1x16xf32, #tpu.memory_space<vmem>>, %arg6: memref<1x1x1xf32, #tpu.memory_space<vmem>>, %arg7: memref<3x10x8x8xf32, #tpu.memory_space<vmem>>) attributes {dimension_semantics = [#tpu.dimension_semantics<parallel>], iteration_bounds = array<i64: 2>, scalar_prefetch = 0 : i64, scratch_operands = 1 : i64, tpu.core_type = #tpu.core_type<tc>, window_params = [{transform_indices = @transform_0, window_bounds = array<i64: 1, 8, 8, 8>}, {transform_indices = @transform_1, window_bounds = array<i64: 1, 8, 8, 8>}, {pipeline_mode = #tpu.pipeline_mode<synchronous>, transform_indices = @transform_2, window_bounds = array<i64: 9, 8, 16>}, {pipeline_mode = #tpu.pipeline_mode<synchronous>, transform_indices = @transform_3, window_bounds = array<i64: 1, 16>}, {pipeline_mode = #tpu.pipeline_mode<synchronous>, transform_indices = @transform_4, window_bounds = array<i64: 1, 16>}, {transform_indices = @transform_5, window_bounds = array<i64: 1, 1, 1>}]} {
    %c0 = arith.constant 0 : index
    %c0_0 = arith.constant 0 : index
    %c0_1 = arith.constant 0 : index
    %c0_2 = arith.constant 0 : index
    %0 = vector.load %arg1[%c0, %c0_0, %c0_1, %c0_2] : memref<1x8x8x8xf32, #tpu.memory_space<vmem>>, vector<1x8x8x8xf32>
    %1 = vector.shape_cast %0 : vector<1x8x8x8xf32> to vector<8x8x8xf32>
    %cst = arith.constant 1.000000e+00 : f32
    %2 = vector.broadcast %cst : f32 to vector<3x1x8x8xf32>
    %c0_3 = arith.constant 0 : index
    %c0_4 = arith.constant 0 : index
    %c0_5 = arith.constant 0 : index
    %c0_6 = arith.constant 0 : index
    %3 = vector.load %arg7[%c0_3, %c0_4, %c0_5, %c0_6] : memref<3x10x8x8xf32, #tpu.memory_space<vmem>>, vector<3x1x8x8xf32>
    tpu.vector_store %arg7[%c0_3, %c0_4, %c0_5, %c0_6], %2 {strides = array<i32>} : memref<3x10x8x8xf32, #tpu.memory_space<vmem>>, vector<3x1x8x8xf32>,
    %cst_7 = arith.constant 1.000000e+00 : f32
    %4 = vector.broadcast %cst_7 : f32 to vector<3x1x8x8xf32>
    %c0_8 = arith.constant 0 : index
    %c9 = arith.constant 9 : index
    %c0_9 = arith.constant 0 : index
    %c0_10 = arith.constant 0 : index
    %5 = vector.load %arg7[%c0_8, %c9, %c0_9, %c0_10] : memref<3x10x8x8xf32, #tpu.memory_space<vmem>>, vector<3x1x8x8xf32>
    tpu.vector_store %arg7[%c0_8, %c9, %c0_9, %c0_10], %4 {strides = array<i32>} : memref<3x10x8x8xf32, #tpu.memory_space<vmem>>, vector<3x1x8x8xf32>,
    %cst_11 = arith.constant 1.000000e+00 : f32
    %6 = vector.broadcast %cst_11 : f32 to vector<8x1x8xf32>
    %c1 = arith.constant 1 : index
    %c1_12 = arith.constant 1 : index
    %c0_13 = arith.constant 0 : index
    %c0_14 = arith.constant 0 : index
    %7 = vector.load %arg7[%c1, %c1_12, %c0_13, %c0_14] : memref<3x10x8x8xf32, #tpu.memory_space<vmem>>, vector<1x8x8x8xf32>
    %8 = vector.shape_cast %7 : vector<1x8x8x8xf32> to vector<8x8x8xf32>
    %9 = vector.shape_cast %1 : vector<8x8x8xf32> to vector<1x8x8x8xf32>
    tpu.vector_store %arg7[%c1, %c1_12, %c0_13, %c0_14], %9 {strides = array<i32>} : memref<3x10x8x8xf32, #tpu.memory_space<vmem>>, vector<1x8x8x8xf32>,
    %10 = vector.extract_strided_slice %1 {offsets = [0, 0, 0], sizes = [8, 7, 8], strides = [1, 1, 1]} : vector<8x8x8xf32> to vector<8x7x8xf32>
    %c0_15 = arith.constant 0 : index
    %c1_16 = arith.constant 1 : index
    %c1_17 = arith.constant 1 : index
    %c0_18 = arith.constant 0 : index
    %11 = vector.load %arg7[%c0_15, %c1_16, %c1_17, %c0_18] : memref<3x10x8x8xf32, #tpu.memory_space<vmem>>, vector<1x8x7x8xf32>
    %12 = vector.shape_cast %11 : vector<1x8x7x8xf32> to vector<8x7x8xf32>
    %13 = vector.shape_cast %10 : vector<8x7x8xf32> to vector<1x8x7x8xf32>
    tpu.vector_store %arg7[%c0_15, %c1_16, %c1_17, %c0_18], %13 {strides = array<i32>} : memref<3x10x8x8xf32, #tpu.memory_space<vmem>>, vector<1x8x7x8xf32>,
    %c0_19 = arith.constant 0 : index
    %c1_20 = arith.constant 1 : index
    %c0_21 = arith.constant 0 : index
    %c0_22 = arith.constant 0 : index
    %14 = vector.load %arg7[%c0_19, %c1_20, %c0_21, %c0_22] : memref<3x10x8x8xf32, #tpu.memory_space<vmem>>, vector<1x8x1x8xf32>
    %15 = vector.shape_cast %14 : vector<1x8x1x8xf32> to vector<8x1x8xf32>
    %16 = vector.shape_cast %6 : vector<8x1x8xf32> to vector<1x8x1x8xf32>
    tpu.vector_store %arg7[%c0_19, %c1_20, %c0_21, %c0_22], %16 {strides = array<i32>} : memref<3x10x8x8xf32, #tpu.memory_space<vmem>>, vector<1x8x1x8xf32>,
    %17 = vector.extract_strided_slice %1 {offsets = [0, 1, 0], sizes = [8, 7, 8], strides = [1, 1, 1]} : vector<8x8x8xf32> to vector<8x7x8xf32>
    %c2 = arith.constant 2 : index
    %c1_23 = arith.constant 1 : index
    %c0_24 = arith.constant 0 : index
    %c0_25 = arith.constant 0 : index
    %18 = vector.load %arg7[%c2, %c1_23, %c0_24, %c0_25] : memref<3x10x8x8xf32, #tpu.memory_space<vmem>>, vector<1x8x7x8xf32>
    %19 = vector.shape_cast %18 : vector<1x8x7x8xf32> to vector<8x7x8xf32>
    %20 = vector.shape_cast %17 : vector<8x7x8xf32> to vector<1x8x7x8xf32>
    tpu.vector_store %arg7[%c2, %c1_23, %c0_24, %c0_25], %20 {strides = array<i32>} : memref<3x10x8x8xf32, #tpu.memory_space<vmem>>, vector<1x8x7x8xf32>,
    %c2_26 = arith.constant 2 : index
    %c1_27 = arith.constant 1 : index
    %c7 = arith.constant 7 : index
    %c0_28 = arith.constant 0 : index
    %21 = vector.load %arg7[%c2_26, %c1_27, %c7, %c0_28] : memref<3x10x8x8xf32, #tpu.memory_space<vmem>>, vector<1x8x1x8xf32>
    %22 = vector.shape_cast %21 : vector<1x8x1x8xf32> to vector<8x1x8xf32>
    %23 = vector.shape_cast %6 : vector<8x1x8xf32> to vector<1x8x1x8xf32>
    tpu.vector_store %arg7[%c2_26, %c1_27, %c7, %c0_28], %23 {strides = array<i32>} : memref<3x10x8x8xf32, #tpu.memory_space<vmem>>, vector<1x8x1x8xf32>,
    %cst_29 = arith.constant 0.000000e+00 : f32
    %24 = vector.broadcast %cst_29 : f32 to vector<64x16xf32>
    %c0_30 = arith.constant 0 : index
    %c0_31 = arith.constant 0 : index
    %c0_32 = arith.constant 0 : index
    %c0_33 = arith.constant 0 : index
    %25 = vector.load %arg7[%c0_30, %c0_31, %c0_32, %c0_33] : memref<3x10x8x8xf32, #tpu.memory_space<vmem>>, vector<1x8x8x8xf32>
    %26 = vector.shape_cast %25 : vector<1x8x8x8xf32> to vector<8x8x8xf32>
    %27 = vector.shape_cast %26 : vector<8x8x8xf32> to vector<64x8xf32>
    %c0_34 = arith.constant 0 : index
    %c0_35 = arith.constant 0 : index
    %c0_36 = arith.constant 0 : index
    %28 = vector.load %arg3[%c0_34, %c0_35, %c0_36] : memref<9x8x16xf32, #tpu.memory_space<vmem>>, vector<1x8x16xf32>
    %29 = vector.shape_cast %28 : vector<1x8x16xf32> to vector<8x16xf32>
    %cst_37 = arith.constant dense<0.000000e+00> : vector<64x16xf32>
    %30 = tpu.matmul %27, %29, %cst_37 {dimension_numbers = #tpu.dot_dimension_numbers<[1], [0], [0], [1], [0, 0, 1, 1], [], []>} : vector<64x8xf32>, vector<8x16xf32>, vector<64x16xf32> -> vector<64x16xf32>
    %31 = arith.addf %24, %30 : vector<64x16xf32>
    %c1_38 = arith.constant 1 : index
    %c0_39 = arith.constant 0 : index
    %c0_40 = arith.constant 0 : index
    %c0_41 = arith.constant 0 : index
    %32 = vector.load %arg7[%c1_38, %c0_39, %c0_40, %c0_41] : memref<3x10x8x8xf32, #tpu.memory_space<vmem>>, vector<1x8x8x8xf32>
    %33 = vector.shape_cast %32 : vector<1x8x8x8xf32> to vector<8x8x8xf32>
    %34 = vector.shape_cast %33 : vector<8x8x8xf32> to vector<64x8xf32>
    %c1_42 = arith.constant 1 : index
    %c0_43 = arith.constant 0 : index
    %c0_44 = arith.constant 0 : index
    %35 = vector.load %arg3[%c1_42, %c0_43, %c0_44] : memref<9x8x16xf32, #tpu.memory_space<vmem>>, vector<1x8x16xf32>
    %36 = vector.shape_cast %35 : vector<1x8x16xf32> to vector<8x16xf32>
    %cst_45 = arith.constant dense<0.000000e+00> : vector<64x16xf32>
    %37 = tpu.matmul %34, %36, %cst_45 {dimension_numbers = #tpu.dot_dimension_numbers<[1], [0], [0], [1], [0, 0, 1, 1], [], []>} : vector<64x8xf32>, vector<8x16xf32>, vector<64x16xf32> -> vector<64x16xf32>
    %38 = arith.addf %31, %37 : vector<64x16xf32>
    %c2_46 = arith.constant 2 : index
    %c0_47 = arith.constant 0 : index
    %c0_48 = arith.constant 0 : index
    %c0_49 = arith.constant 0 : index
    %39 = vector.load %arg7[%c2_46, %c0_47, %c0_48, %c0_49] : memref<3x10x8x8xf32, #tpu.memory_space<vmem>>, vector<1x8x8x8xf32>
    %40 = vector.shape_cast %39 : vector<1x8x8x8xf32> to vector<8x8x8xf32>
    %41 = vector.shape_cast %40 : vector<8x8x8xf32> to vector<64x8xf32>
    %c2_50 = arith.constant 2 : index
    %c0_51 = arith.constant 0 : index
    %c0_52 = arith.constant 0 : index
    %42 = vector.load %arg3[%c2_50, %c0_51, %c0_52] : memref<9x8x16xf32, #tpu.memory_space<vmem>>, vector<1x8x16xf32>
    %43 = vector.shape_cast %42 : vector<1x8x16xf32> to vector<8x16xf32>
    %cst_53 = arith.constant dense<0.000000e+00> : vector<64x16xf32>
    %44 = tpu.matmul %41, %43, %cst_53 {dimension_numbers = #tpu.dot_dimension_numbers<[1], [0], [0], [1], [0, 0, 1, 1], [], []>} : vector<64x8xf32>, vector<8x16xf32>, vector<64x16xf32> -> vector<64x16xf32>
    %45 = arith.addf %38, %44 : vector<64x16xf32>
    %c0_54 = arith.constant 0 : index
    %c1_55 = arith.constant 1 : index
    %c0_56 = arith.constant 0 : index
    %c0_57 = arith.constant 0 : index
    %46 = vector.load %arg7[%c0_54, %c1_55, %c0_56, %c0_57] : memref<3x10x8x8xf32, #tpu.memory_space<vmem>>, vector<1x8x8x8xf32>
    %47 = vector.shape_cast %46 : vector<1x8x8x8xf32> to vector<8x8x8xf32>
    %48 = vector.shape_cast %47 : vector<8x8x8xf32> to vector<64x8xf32>
    %c3 = arith.constant 3 : index
    %c0_58 = arith.constant 0 : index
    %c0_59 = arith.constant 0 : index
    %49 = vector.load %arg3[%c3, %c0_58, %c0_59] : memref<9x8x16xf32, #tpu.memory_space<vmem>>, vector<1x8x16xf32>
    %50 = vector.shape_cast %49 : vector<1x8x16xf32> to vector<8x16xf32>
    %cst_60 = arith.constant dense<0.000000e+00> : vector<64x16xf32>
    %51 = tpu.matmul %48, %50, %cst_60 {dimension_numbers = #tpu.dot_dimension_numbers<[1], [0], [0], [1], [0, 0, 1, 1], [], []>} : vector<64x8xf32>, vector<8x16xf32>, vector<64x16xf32> -> vector<64x16xf32>
    %52 = arith.addf %45, %51 : vector<64x16xf32>
    %c1_61 = arith.constant 1 : index
    %c1_62 = arith.constant 1 : index
    %c0_63 = arith.constant 0 : index
    %c0_64 = arith.constant 0 : index
    %53 = vector.load %arg7[%c1_61, %c1_62, %c0_63, %c0_64] : memref<3x10x8x8xf32, #tpu.memory_space<vmem>>, vector<1x8x8x8xf32>
    %54 = vector.shape_cast %53 : vector<1x8x8x8xf32> to vector<8x8x8xf32>
    %55 = vector.shape_cast %54 : vector<8x8x8xf32> to vector<64x8xf32>
    %c4 = arith.constant 4 : index
    %c0_65 = arith.constant 0 : index
    %c0_66 = arith.constant 0 : index
    %56 = vector.load %arg3[%c4, %c0_65, %c0_66] : memref<9x8x16xf32, #tpu.memory_space<vmem>>, vector<1x8x16xf32>
    %57 = vector.shape_cast %56 : vector<1x8x16xf32> to vector<8x16xf32>
    %cst_67 = arith.constant dense<0.000000e+00> : vector<64x16xf32>
    %58 = tpu.matmul %55, %57, %cst_67 {dimension_numbers = #tpu.dot_dimension_numbers<[1], [0], [0], [1], [0, 0, 1, 1], [], []>} : vector<64x8xf32>, vector<8x16xf32>, vector<64x16xf32> -> vector<64x16xf32>
    %59 = arith.addf %52, %58 : vector<64x16xf32>
    %c2_68 = arith.constant 2 : index
    %c1_69 = arith.constant 1 : index
    %c0_70 = arith.constant 0 : index
    %c0_71 = arith.constant 0 : index
    %60 = vector.load %arg7[%c2_68, %c1_69, %c0_70, %c0_71] : memref<3x10x8x8xf32, #tpu.memory_space<vmem>>, vector<1x8x8x8xf32>
    %61 = vector.shape_cast %60 : vector<1x8x8x8xf32> to vector<8x8x8xf32>
    %62 = vector.shape_cast %61 : vector<8x8x8xf32> to vector<64x8xf32>
    %c5 = arith.constant 5 : index
    %c0_72 = arith.constant 0 : index
    %c0_73 = arith.constant 0 : index
    %63 = vector.load %arg3[%c5, %c0_72, %c0_73] : memref<9x8x16xf32, #tpu.memory_space<vmem>>, vector<1x8x16xf32>
    %64 = vector.shape_cast %63 : vector<1x8x16xf32> to vector<8x16xf32>
    %cst_74 = arith.constant dense<0.000000e+00> : vector<64x16xf32>
    %65 = tpu.matmul %62, %64, %cst_74 {dimension_numbers = #tpu.dot_dimension_numbers<[1], [0], [0], [1], [0, 0, 1, 1], [], []>} : vector<64x8xf32>, vector<8x16xf32>, vector<64x16xf32> -> vector<64x16xf32>
    %66 = arith.addf %59, %65 : vector<64x16xf32>
    %c0_75 = arith.constant 0 : index
    %c2_76 = arith.constant 2 : index
    %c0_77 = arith.constant 0 : index
    %c0_78 = arith.constant 0 : index
    %67 = vector.load %arg7[%c0_75, %c2_76, %c0_77, %c0_78] : memref<3x10x8x8xf32, #tpu.memory_space<vmem>>, vector<1x8x8x8xf32>
    %68 = vector.shape_cast %67 : vector<1x8x8x8xf32> to vector<8x8x8xf32>
    %69 = vector.shape_cast %68 : vector<8x8x8xf32> to vector<64x8xf32>
    %c6 = arith.constant 6 : index
    %c0_79 = arith.constant 0 : index
    %c0_80 = arith.constant 0 : index
    %70 = vector.load %arg3[%c6, %c0_79, %c0_80] : memref<9x8x16xf32, #tpu.memory_space<vmem>>, vector<1x8x16xf32>
    %71 = vector.shape_cast %70 : vector<1x8x16xf32> to vector<8x16xf32>
    %cst_81 = arith.constant dense<0.000000e+00> : vector<64x16xf32>
    %72 = tpu.matmul %69, %71, %cst_81 {dimension_numbers = #tpu.dot_dimension_numbers<[1], [0], [0], [1], [0, 0, 1, 1], [], []>} : vector<64x8xf32>, vector<8x16xf32>, vector<64x16xf32> -> vector<64x16xf32>
    %73 = arith.addf %66, %72 : vector<64x16xf32>
    %c1_82 = arith.constant 1 : index
    %c2_83 = arith.constant 2 : index
    %c0_84 = arith.constant 0 : index
    %c0_85 = arith.constant 0 : index
    %74 = vector.load %arg7[%c1_82, %c2_83, %c0_84, %c0_85] : memref<3x10x8x8xf32, #tpu.memory_space<vmem>>, vector<1x8x8x8xf32>
    %75 = vector.shape_cast %74 : vector<1x8x8x8xf32> to vector<8x8x8xf32>
    %76 = vector.shape_cast %75 : vector<8x8x8xf32> to vector<64x8xf32>
    %c7_86 = arith.constant 7 : index
    %c0_87 = arith.constant 0 : index
    %c0_88 = arith.constant 0 : index
    %77 = vector.load %arg3[%c7_86, %c0_87, %c0_88] : memref<9x8x16xf32, #tpu.memory_space<vmem>>, vector<1x8x16xf32>
    %78 = vector.shape_cast %77 : vector<1x8x16xf32> to vector<8x16xf32>
    %cst_89 = arith.constant dense<0.000000e+00> : vector<64x16xf32>
    %79 = tpu.matmul %76, %78, %cst_89 {dimension_numbers = #tpu.dot_dimension_numbers<[1], [0], [0], [1], [0, 0, 1, 1], [], []>} : vector<64x8xf32>, vector<8x16xf32>, vector<64x16xf32> -> vector<64x16xf32>
    %80 = arith.addf %73, %79 : vector<64x16xf32>
    %c2_90 = arith.constant 2 : index
    %c2_91 = arith.constant 2 : index
    %c0_92 = arith.constant 0 : index
    %c0_93 = arith.constant 0 : index
    %81 = vector.load %arg7[%c2_90, %c2_91, %c0_92, %c0_93] : memref<3x10x8x8xf32, #tpu.memory_space<vmem>>, vector<1x8x8x8xf32>
    %82 = vector.shape_cast %81 : vector<1x8x8x8xf32> to vector<8x8x8xf32>
    %83 = vector.shape_cast %82 : vector<8x8x8xf32> to vector<64x8xf32>
    %c8 = arith.constant 8 : index
    %c0_94 = arith.constant 0 : index
    %c0_95 = arith.constant 0 : index
    %84 = vector.load %arg3[%c8, %c0_94, %c0_95] : memref<9x8x16xf32, #tpu.memory_space<vmem>>, vector<1x8x16xf32>
    %85 = vector.shape_cast %84 : vector<1x8x16xf32> to vector<8x16xf32>
    %cst_96 = arith.constant dense<0.000000e+00> : vector<64x16xf32>
    %86 = tpu.matmul %83, %85, %cst_96 {dimension_numbers = #tpu.dot_dimension_numbers<[1], [0], [0], [1], [0, 0, 1, 1], [], []>} : vector<64x8xf32>, vector<8x16xf32>, vector<64x16xf32> -> vector<64x16xf32>
    %87 = arith.addf %80, %86 : vector<64x16xf32>
    %c0_97 = arith.constant 0 : index
    %c0_98 = arith.constant 0 : index
    %88 = vector.load %arg4[%c0_97, %c0_98] : memref<1x16xf32, #tpu.memory_space<vmem>>, vector<1x16xf32>
    %89 = vector.broadcast %88 : vector<1x16xf32> to vector<64x16xf32>
    %90 = arith.addf %87, %89 : vector<64x16xf32>
    %c0_99 = arith.constant 0 : index
    %c0_100 = arith.constant 0 : index
    %91 = vector.load %arg5[%c0_99, %c0_100] : memref<1x16xf32, #tpu.memory_space<vmem>>, vector<1x16xf32>
    %cst_101 = arith.constant 3.000000e+00 : f32
    %92 = vector.broadcast %cst_101 : f32 to vector<1x16xf32>
    %93 = arith.mulf %92, %91 : vector<1x16xf32>
    %94 = math.exp %93 : vector<1x16xf32>
    %95 = vector.broadcast %94 : vector<1x16xf32> to vector<64x16xf32>
    %96 = arith.mulf %90, %95 : vector<64x16xf32>
    %97 = vector.extract_strided_slice %96 {offsets = [0, 0], sizes = [64, 8], strides = [1, 1]} : vector<64x16xf32> to vector<64x8xf32>
    %98 = vector.extract_strided_slice %96 {offsets = [0, 8], sizes = [64, 8], strides = [1, 1]} : vector<64x16xf32> to vector<64x8xf32>
    %c0_102 = arith.constant 0 : index
    %c0_103 = arith.constant 0 : index
    %c0_104 = arith.constant 0 : index
    %c0_105 = arith.constant 0 : index
    %99 = vector.load %arg2[%c0_102, %c0_103, %c0_104, %c0_105] : memref<1x8x8x8xf32, #tpu.memory_space<vmem>>, vector<1x8x8x8xf32>
    %100 = vector.shape_cast %99 : vector<1x8x8x8xf32> to vector<8x8x8xf32>
    %101 = vector.shape_cast %100 : vector<8x8x8xf32> to vector<64x8xf32>
    %cst_106 = arith.constant -0.918938517 : f32
    %102 = vector.broadcast %cst_106 : f32 to vector<64x8xf32>
    %103 = arith.subf %102, %98 : vector<64x8xf32>
    %104 = arith.subf %101, %97 : vector<64x8xf32>
    %cst_107 = arith.constant 5.000000e-01 : f32
    %105 = vector.broadcast %cst_107 : f32 to vector<64x8xf32>
    %106 = arith.mulf %105, %104 : vector<64x8xf32>
    %107 = arith.subf %101, %97 : vector<64x8xf32>
    %108 = arith.mulf %106, %107 : vector<64x8xf32>
    %cst_108 = arith.constant -2.000000e+00 : f32
    %109 = vector.broadcast %cst_108 : f32 to vector<64x8xf32>
    %110 = arith.mulf %109, %98 : vector<64x8xf32>
    %111 = math.exp %110 : vector<64x8xf32>
    %112 = arith.mulf %108, %111 : vector<64x8xf32>
    %113 = arith.subf %103, %112 : vector<64x8xf32>
    %114 = vector.shape_cast %113 : vector<64x8xf32> to vector<1x64x8xf32>
    %cst_109 = arith.constant dense<0.000000e+00> : vector<1xf32>
    %115 = vector.multi_reduction <add>, %114, %cst_109 [1, 2] : vector<1x64x8xf32> to vector<1xf32>
    %116 = vector.shape_cast %115 : vector<1xf32> to vector<1x1x1xf32>
    %117 = vector.extract %116[0, 0, 0] : f32 from vector<1x1x1xf32>
    %118 = vector.broadcast %117 : f32 to vector<1x1x1xf32>
    %c0_110 = arith.constant 0 : index
    %c0_111 = arith.constant 0 : index
    %c0_112 = arith.constant 0 : index
    %119 = vector.load %arg6[%c0_110, %c0_111, %c0_112] : memref<1x1x1xf32, #tpu.memory_space<vmem>>, vector<1x1x1xf32>
    tpu.vector_store %arg6[%c0_110, %c0_111, %c0_112], %118 {strides = array<i32>} : memref<1x1x1xf32, #tpu.memory_space<vmem>>, vector<1x1x1xf32>,
    return
  }
  func.func @transform_0(%arg0: i32) -> (i32, i32, i32, i32) {
    %c0_i32 = arith.constant 0 : i32
    %c0_i32_0 = arith.constant 0 : i32
    %c0_i32_1 = arith.constant 0 : i32
    %c0_i32_2 = arith.constant 0 : i32
    return %arg0, %c0_i32, %c0_i32_0, %c0_i32_1 : i32, i32, i32, i32
  }
  func.func @transform_1(%arg0: i32) -> (i32, i32, i32, i32) {
    %c0_i32 = arith.constant 0 : i32
    %c0_i32_0 = arith.constant 0 : i32
    %c0_i32_1 = arith.constant 0 : i32
    %c0_i32_2 = arith.constant 0 : i32
    return %arg0, %c0_i32, %c0_i32_0, %c0_i32_1 : i32, i32, i32, i32
  }
  func.func @transform_2(%arg0: i32) -> (i32, i32, i32) {
    %c0_i32 = arith.constant 0 : i32
    %c0_i32_0 = arith.constant 0 : i32
    %c0_i32_1 = arith.constant 0 : i32
    %c0_i32_2 = arith.constant 0 : i32
    return %c0_i32, %c0_i32_0, %c0_i32_1 : i32, i32, i32
  }
  func.func @transform_3(%arg0: i32) -> (i32, i32) {
    %c0_i32 = arith.constant 0 : i32
    %c0_i32_0 = arith.constant 0 : i32
    %c0_i32_1 = arith.constant 0 : i32
    return %c0_i32, %c0_i32_0 : i32, i32
  }
  func.func @transform_4(%arg0: i32) -> (i32, i32) {
    %c0_i32 = arith.constant 0 : i32
    %c0_i32_0 = arith.constant 0 : i32
    %c0_i32_1 = arith.constant 0 : i32
    return %c0_i32, %c0_i32_0 : i32, i32
  }
  func.func @transform_5(%arg0: i32) -> (i32, i32, i32) {
    %c0_i32 = arith.constant 0 : i32
    %c0_i32_0 = arith.constant 0 : i32
    %c0_i32_1 = arith.constant 0 : i32
    return %arg0, %c0_i32, %c0_i32_0 : i32, i32, i32
  }
}

</mosaic_0001>

<bundles_post_ra>
// kernel: multi_scale_block_forward.7
= control target key start
LH: loop header
LB: loop body
LE: loop exit
PB: predicated region body
PF: predicated region fallthrough
CT: control target
= control target key end

     0   :  { %12 = vsyncpa [#allocation3], 0  ;;  %s619_s21 = smov 0   ;;  %s756_s0 = inlined_call_operand.vmem [shape: f32[128,8], index: 0, kind: input, shape index: {}]   ;;  %s757_s1 = inlined_call_operand.vmem [shape: f32[128,8], index: 1, kind: input, shape index: {}]   ;;  %s758_s2 = inlined_call_operand.vmem [shape: f32[1,8], index: 2, kind: output, shape index: {0}]   ;;  %s759_s3 = inlined_call_operand.vmem [shape: f32[1,8], index: 3, kind: output, shape index: {1}]   ;;  %s760_s4 = inlined_call_operand.vmem [shape: f32[1,8], index: 4, kind: output, shape index: {2}]   ;;  %s761_s5 = inlined_call_operand.vmem [shape: f32[1,8], index: 5, kind: output, shape index: {3}]   ;;  %s762_s6 = inlined_call_operand.hbm [shape: f32[1,1], index: 6, kind: output, shape index: {4}]  }
   0x1 LB: > { %s625_s22 = sadd.s32 4294967295, %s580_s21   ;;  %p501_p0 = scmp.ge.s32.totalorder %s580_s21, 1  ;;  %s580_s21 = sphi %s619_s21, %s18_s21  }
   0x2   : > { %p209_p1 = scmp.lt.s32.totalorder %s580_s21, 5 }
   0x4   : > { %p210_p2 = pnand %p501_p0, %p209_p1 }
   0x5   : > { %s502_s23 = sshll.u32 (!%p210_p2), %s625_s22, 2  ;;  %p506_p4 = scmp.ne.s32.totalorder (!%p210_p2), %s625_s22, 0 }
   0x6   : > { %213 = sbr.rel (%p210_p2) target bundleno = 343 (0x157), region = 28  ;;  %p240_p3 = scmp.lt.s32.totalorder (!%p210_p2), %s502_s23, 15 }
   0xd   : > { %s764_s23 = smov (!%p240_p3, %s502_s23), 15  ;;  %254 = sbr.rel (%p506_p4) target bundleno = 20 (0x14), region = 32 }
   0xe   : > { %s503_s24 = sshll.u32 %s764_s23, 3  ;;  %vm255_vm0 = vcmask (!%p506_p4), 57344   ;;  %v582_v0 = vmov (!%p506_p4), 0.0  }
   0xf   : > { %s243_s27 = scalar_lea.vmem %s756_s0, %s503_s24  ;;  %s636_s30 = scalar_lea.vmem %s757_s1, %s503_s24  ;;  %256 = vst.msk [vmem:[%s758_s2] sm:$0x1] (!%p506_p4), %vm255_vm0, %v582_v0  ;;  %257 = vst.msk [vmem:[%s759_s3] sm:$0x1] (!%p506_p4), %vm255_vm0, %v582_v0 }
  0x10   : > { %258 = vst.msk [vmem:[%s760_s4] sm:$0x1] (!%p506_p4), %vm255_vm0, %v582_v0  ;;  %259 = vst.msk [vmem:[%s761_s5] sm:$0x1] (!%p506_p4), %vm255_vm0, %v582_v0 }
  0x14 PF: > { %v260_v1 = vld [vmem:[%s243_s27] sm:$0xff]  ;;  %v261_v2 = vld [vmem:[%s243_s27 + $0x8] sm:$0xff]  ;;  %v262_v3 = vld [vmem:[%s243_s27 + $0x10] sm:$0xff]  ;;  %vm269_vm1 = vcmask 64512   ;;  %vm284_vm2 = vcmask 57344   ;;  %p507_p5 = scmp.ne.s32.totalorder %s625_s22, 3 }
  0x15   : > { %v263_v4 = vld [vmem:[%s243_s27 + $0x18] sm:$0xff]  ;;  %v270_v5 = vsel %vm269_vm1, %v260_v1, 0.0  ;;  %v271_v6 = vsel %vm269_vm1, %v261_v2, 0.0  ;;  %v273_v7 = vsel %vm269_vm1, %v262_v3, 0.0  ;;  %v287_v8 = vmul.f32 %v260_v1, %v260_v1  ;;  %v264_v13 = vld [vmem:[%s636_s30] sm:$0xff]  ;;  %v265_v16 = vld [vmem:[%s636_s30 + $0x8] sm:$0xff] }
  0x16   : > { %v272_v9 = vadd.f32 %v271_v6, %v270_v5  ;;  %v275_v10 = vsel %vm269_vm1, %v263_v4, 0.0  ;;  %v288_v11 = vmul.f32 %v261_v2, %v261_v2  ;;  %v289_v12 = vmul.f32 %v262_v3, %v262_v3  ;;  %v266_v17 = vld [vmem:[%s636_s30 + $0x10] sm:$0xff]  ;;  %v267_v23 = vld [vmem:[%s636_s30 + $0x18] sm:$0xff]  ;;  %v268_v57 = vld [vmem:[%s758_s2] sm:$0x1] }
  0x17   : > { %v290_v14 = vmul.f32 %v263_v4, %v263_v4  ;;  %v291_v15 = vsel %vm269_vm1, %v287_v8, 0.0  ;;  %v307_v18 = vsel %vm269_vm1, %v264_v13, 0.0  ;;  %v323_v19 = vmul.f32 %v264_v13, %v264_v13  ;;  %v286_v2 = vld [vmem:[%s759_s3] sm:$0x1] }
  0x18   : > { %v274_v20 = vadd.f32 %v273_v7, %v272_v9  ;;  %v292_v21 = vsel %vm269_vm1, %v288_v11, 0.0  ;;  %v294_v22 = vsel %vm269_vm1, %v289_v12, 0.0  ;;  %v308_v24 = vsel %vm269_vm1, %v265_v16, 0.0  ;;  %v306_v3 = vld [vmem:[%s760_s4] sm:$0x1] }
  0x19   : > { %v293_v25 = vadd.f32 %v292_v21, %v291_v15  ;;  %v296_v26 = vsel %vm269_vm1, %v290_v14, 0.0  ;;  %v309_v27 = vadd.f32 %v308_v24, %v307_v18  ;;  %v310_v28 = vsel %vm269_vm1, %v266_v17, 0.0 }
  0x1a   : > { %v276_v29 = vadd.f32 %v275_v10, %v274_v20  ;;  %v312_v30 = vsel %vm269_vm1, %v267_v23, 0.0  ;;  %v324_v31 = vmul.f32 %v265_v16, %v265_v16  ;;  %v325_v32 = vmul.f32 %v266_v17, %v266_v17  ;;  %v322_v10 = vld [vmem:[%s761_s5] sm:$0x1] }
  0x1b   : > { %v295_v33 = vadd.f32 %v294_v22, %v293_v25  ;;  %v311_v34 = vadd.f32 %v310_v28, %v309_v27  ;;  %v326_v35 = vmul.f32 %v267_v23, %v267_v23  ;;  %v327_v36 = vsel %vm269_vm1, %v323_v19, 0.0 }
  0x1c   : > { %v277_v37 = vrot.slane %v276_v29, 4  ;;  %v328_v38 = vsel %vm269_vm1, %v324_v31, 0.0  ;;  %v330_v39 = vsel %vm269_vm1, %v325_v32, 0.0  ;;  %vm414_vm7 = vcmask (!%p507_p5), 0  }
  0x1d   : > { %v297_v40 = vadd.f32 %v296_v26, %v295_v33  ;;  %v313_v41 = vadd.f32 %v312_v30, %v311_v34  ;;  %v329_v42 = vadd.f32 %v328_v38, %v327_v36  ;;  %v332_v44 = vsel %vm269_vm1, %v326_v35, 0.0 }
  0x1e   : > { %v278_v43 = vadd.f32 %v277_v37, %v276_v29 }
  0x1f   : > { %v298_v45 = vrot.slane %v297_v40, 4  ;;  %v314_v46 = vrot.slane %v313_v41, 4  ;;  %v331_v47 = vadd.f32 %v330_v39, %v329_v42 }
  0x20   : > { %v279_v48 = vrot.slane %v278_v43, 2 }
  0x21   : > { %v299_v49 = vadd.f32 %v298_v45, %v297_v40  ;;  %v315_v50 = vadd.f32 %v314_v46, %v313_v41  ;;  %v333_v51 = vadd.f32 %v332_v44, %v331_v47 }
  0x22   : > { %v280_v52 = vadd.f32 %v279_v48, %v278_v43 }
  0x23   : > { %v300_v53 = vrot.slane %v299_v49, 2  ;;  %v316_v54 = vrot.slane %v315_v50, 2  ;;  %v334_v55 = vrot.slane %v333_v51, 4 }
  0x24   : > { %v281_v56 = vrot.slane %v280_v52, 1 }
  0x25   : > { %v301_v58 = vadd.f32 %v300_v53, %v299_v49  ;;  %v317_v59 = vadd.f32 %v316_v54, %v315_v50  ;;  %v335_v60 = vadd.f32 %v334_v55, %v333_v51 }
  0x26   : > { %v282_v61 = vadd.f32 %v281_v56, %v280_v52 }
  0x27   : > { %v302_v62 = vrot.slane %v301_v58, 1  ;;  %v318_v63 = vrot.slane %v317_v59, 1  ;;  %v336_v0 = vrot.slane %v335_v60, 2 }
  0x28   : > { %v283_v1 = vadd.f32 %v282_v61, %v268_v57 }
  0x29   : > { %v303_v4 = vadd.f32 %v302_v62, %v301_v58  ;;  %v319_v5 = vadd.f32 %v318_v63, %v317_v59  ;;  %v337_v6 = vadd.f32 %v336_v0, %v335_v60 }
  0x2a   : > { %285 = vst.msk [vmem:[%s758_s2] sm:$0x1] %vm284_vm2, %v283_v1 }
  0x2b   : > { %v304_v7 = vadd.f32 %v303_v4, %v286_v2  ;;  %v320_v8 = vadd.f32 %v319_v5, %v306_v3  ;;  %v338_v9 = vrot.slane %v337_v6, 1  ;;  %345 = sbr.rel (%p507_p5) target bundleno = 318 (0x13e), region = 36 }
  0x2d   : > { %305 = vst.msk [vmem:[%s759_s3] sm:$0x1] %vm284_vm2, %v304_v7  ;;  %321 = vst.msk [vmem:[%s760_s4] sm:$0x1] %vm284_vm2, %v320_v8  ;;  %v339_v11 = vadd.f32 %v338_v9, %v337_v6 }
  0x2f   : > { %v340_v12 = vadd.f32 %v339_v11, %v322_v10 }
  0x31   : > { %341 = vst.msk [vmem:[%s761_s5] sm:$0x1] %vm284_vm2, %v340_v12  ;;  %v346_v13 = vld [vmem:[%s758_s2] sm:$0x1] (!%p507_p5) }
  0x32   : > { %v347_v15 = vmul.f32 0.0078125, %v346_v13 }
  0x34   : > { %v348_v14 = vld [vmem:[%s760_s4] sm:$0x1]  ;;  %v351_v17 = vmul.f32 128.0, %v347_v15  ;;  %387 = vst.msk [vmem:[%s758_s2] sm:$0x1] %vm284_vm2, %v347_v15 }
  0x35   : > { %v349_v16 = vmul.f32 0.0078125, %v348_v14  ;;  %v350_v19 = vld [vmem:[%s759_s3] sm:$0x1] }
  0x36   : > { %v352_v21 = vmul.f32 %v351_v17, %v347_v15 }
  0x37   : > { %v357_v18 = vmul.f32 128.0, %v349_v16  ;;  %389 = vst.msk [vmem:[%s760_s4] sm:$0x1] %vm284_vm2, %v349_v16 }
  0x38   : > { %v356_v20 = vld [vmem:[%s761_s5] sm:$0x1]  ;;  %v353_v23 = vsub.f32 %v350_v19, %v352_v21 }
  0x39   : > { %v358_v22 = vmul.f32 %v357_v18, %v349_v16 }
  0x3a   : > { %v355_v25 = vmul.f32 0.007874016, %v353_v23 }
  0x3b   : > { %v359_v24 = vsub.f32 %v356_v20, %v358_v22 }
  0x3c   : > { %v361_v27 = vmax.f32 %v355_v25, 0.0 }
  0x3d   : > { %v360_v26 = vmul.f32 0.007874016, %v359_v24 }
  0x3e   : > { %532 = vrsqrt.f32 %v361_v27  ;;  %vm364_vm3 = vcmp.eq.f32.partialorder %v361_v27, inf  ;;  %v367_v30 = vand.u32 2147483648, %v361_v27  ;;  %vm366_vm4 = vcmp.eq.f32.partialorder %v361_v27, 0.0 }
  0x3f   : > { %v374_v28 = vmax.f32 %v360_v26, 0.0 }
  0x41   : > { %534 = vrsqrt.f32 %v374_v28  ;;  %vm377_vm5 = vcmp.eq.f32.partialorder %v374_v28, inf  ;;  %v380_v33 = vand.u32 2147483648, %v374_v28  ;;  %vm379_vm6 = vcmp.eq.f32.partialorder %v374_v28, 0.0 }
  0x48   : > { %v533_v29 = vpop.eup %532 }
  0x49   : > { %v363_v32 = vmul.f32 %v533_v29, %v361_v27 }
  0x4b   : > { %v535_v31 = vpop.eup %534  ;;  %v365_v35 = vsel %vm364_vm3, %v361_v27, %v363_v32 }
  0x4c   : > { %v376_v34 = vmul.f32 %v535_v31, %v374_v28  ;;  %v368_v36 = vsel %vm366_vm4, %v367_v30, %v365_v35 }
  0x4d   : > { %v369_v38 = vadd.f32 1e-09, %v368_v36 }
  0x4e   : > { %v378_v37 = vsel %vm377_vm5, %v374_v28, %v376_v34 }
  0x4f   : > { %v381_v39 = vsel %vm379_vm6, %v380_v33, %v378_v37  ;;  %536 = vrcp.f32 %v369_v38 }
  0x50   : > { %v382_v40 = vadd.f32 1e-09, %v381_v39 }
  0x52   : > { %538 = vrcp.f32 %v382_v40 }
  0x59   : > { %v537_v41 = vpop.eup %536 }
  0x5a   : > { %540 = vlog2.f32 %v537_v41 }
  0x5c   : > { %v539_v42 = vpop.eup %538 }
  0x5d   : > { %542 = vlog2.f32 %v539_v42 }
  0x64   : > { %v541_v43 = vpop.eup %540 }
  0x65   : > { %v373_v45 = vmul.f32 0.6931472, %v541_v43 }
  0x67   : > { %v543_v44 = vpop.eup %542  ;;  %v391_v47 = vsel %vm284_vm2, %v373_v45, 0.0  ;;  %388 = vst.msk [vmem:[%s759_s3] sm:$0x1] %vm284_vm2, %v373_v45 }
  0x68   : > { %v386_v46 = vmul.f32 0.6931472, %v543_v44  ;;  %392 = vadd.xlane.f32.xlu0 %v391_v47 }
  0x6a   : > { %390 = vst.msk [vmem:[%s761_s5] sm:$0x1] %vm284_vm2, %v386_v46  ;;  %v401_v48 = vsel %vm284_vm2, %v386_v46, 0.0 }
  0x6c   : > { %402 = vadd.xlane.f32.xlu0 %v401_v48 }
  0xf5   : > { %v393_v49 = vpop.xlane.xlu0 %392 }
  0xf6   : > { %v394_v50 = vrot.slane %v393_v49, 4 }
  0xf8   : > { %v395_v51 = vadd.f32 %v394_v50, %v393_v49 }
  0xf9   : > { %v403_v52 = vpop.xlane.xlu0 %402 }
  0xfa   : > { %v396_v53 = vrot.slane %v395_v51, 2  ;;  %v404_v54 = vrot.slane %v403_v52, 4 }
  0xfc   : > { %v405_v55 = vadd.f32 %v404_v54, %v403_v52  ;;  %v397_v56 = vadd.f32 %v396_v53, %v395_v51 }
  0xfe   : > { %v406_v57 = vrot.slane %v405_v55, 2  ;;  %v398_v58 = vrot.slane %v397_v56, 1 }
 0x100   : > { %v407_v59 = vadd.f32 %v406_v57, %v405_v55  ;;  %v399_v60 = vadd.f32 %v398_v58, %v397_v56 }
 0x102   : > { %512 = vpush %v399_v60  ;;  %v408_v61 = vrot.slane %v407_v59, 1 }
 0x104   : > { %v409_v62 = vadd.f32 %v408_v61, %v407_v59 }
 0x106   : > { %514 = vpush %v409_v62 }
 0x133   : > { %s513_s27 = spop %512 }
 0x137   : > { %s515_s28 = spop %514 }
 0x138   : > { %s411_s29 = sadd.f32 %s515_s28, %s513_s27 }
 0x13a   : > { %s412_s30 = smul.f32 64.0, %s411_s29 }
 0x13c   : > { %v413_v63 = vstv %s412_s30 }
 0x13d   : > { %415 = vst.msk [vmem:[#allocation2] sm:$0x1] %vm414_vm7, %v413_v63 }
 0x13e PF: > { %p520_p6 = scmp.eq.s32.totalorder %s625_s22, 3  ;;  %s583_s7 = smov [#allocation2]  }
 0x13f   : > { %s435_s8 = sshll.u32 %s583_s7, 4  ;;  %s436_s8 = int_to_ptr.vmem [resolvable:$true] %s435_s8 }
 0x140   : > { %s544_s9 = scalar_lea.vmem %s436_s8, 16  ;;  %s550_s10 = scalar_lea.vmem %s436_s8, 32 }
 0x141   : > { %p545_p7 = scmp.ne.s32.totalorder %s436_s8, %s544_s9  ;;  %p551_p10 = scmp.lt.s32.totalorder %s436_s8, %s436_s8 }
 0x142   : > { %p552_p11 = scmp.lt.s32.totalorder %s550_s10, %s544_s9 }
 0x143   : > { %p546_p8 = pnand %p545_p7, %p520_p6 }
 0x144   : > { %p553_p12 = por %p552_p11, %p551_p10 }
 0x145   : > { %p547_p9 = pneg %p546_p8 }
 0x147   : > { %p554_p13 = pnand %p553_p12, %p547_p9 }
 0x149   : > { %557 = shalt.err (!%p554_p13)
}
 0x14a   : > { %s558_s13 = scalar_lea.hbm %s762_s6, 16 }
 0x14b   : > { %p559_p0 = scmp.ne.s32.totalorder %s762_s6, %s558_s13  ;;  %p564_p3 = scmp.lt.u32.totalorder %s558_s13, %s762_s6 }
 0x14d   : > { %p560_p1 = pnand %p559_p0, %p520_p6 }
 0x14f   : > { %p561_p2 = pneg %p560_p1 }
 0x151   : > { %p566_p4 = pnand %p564_p3, %p561_p2 }
 0x153   : > { %569 = shalt.err (!%p566_p4)
}
 0x154   : > { %517 = dma.vmem_to_hbm [thread:$0]  (%p520_p6), %s436_s8, 16, %s762_s6, [#allocation3]  }
 0x155   : > { %575 = dma.done.wait (%p520_p6), [#allocation3], 16  }
 0x156   : > { %577 = vsyncadd (%p520_p6), [#allocation3], 4294967280 }
 0x157 PF: > { %s18_s21 = sadd.s32 1, %s580_s21  }
 0x158   : > { %p15_p5 = scmp.ge.s32.totalorder %s18_s21, 6  }
 0x15a   :  { %17 = sbr.rel (!%p15_p5) target bundleno = 1 (0x1), region = 98 }
 0x161   :  { %460 = vsyncpa [#allocation3], 1 }
 0x162   :  { %462 = vsyncpa [#allocation3 + $0x1], 1 }

// kernel: multi_scale_block_forward.8
= control target key start
LH: loop header
LB: loop body
LE: loop exit
PB: predicated region body
PF: predicated region fallthrough
CT: control target
= control target key end

     0   :  { %s1136_s17 = smov 0   ;;  %s1213_s0 = inlined_call_operand.vmem [shape: f32[128,8], index: 0, kind: input, shape index: {}]   ;;  %s1214_s1 = inlined_call_operand.vmem [shape: f32[128,8], index: 1, kind: input, shape index: {}]   ;;  %s1215_s2 = inlined_call_operand.vmem [shape: f32[1,8], index: 2, kind: input, shape index: {}]   ;;  %s1216_s3 = inlined_call_operand.vmem [shape: f32[1,8], index: 3, kind: input, shape index: {}]   ;;  %s1217_s4 = inlined_call_operand.vmem [shape: f32[1,8], index: 4, kind: input, shape index: {}]   ;;  %s1218_s5 = inlined_call_operand.vmem [shape: f32[1,8], index: 5, kind: input, shape index: {}]   ;;  %s1219_s6 = inlined_call_operand.vmem [shape: f32[8,8], index: 6, kind: input, shape index: {}]   ;;  %s1220_s7 = inlined_call_operand.vmem [shape: f32[8,8], index: 7, kind: input, shape index: {}]   ;;  %s1221_s8 = inlined_call_operand.vmem [shape: f32[8,8], index: 8, kind: input, shape index: {}]   ;;  %s1222_s9 = inlined_call_operand.vmem [shape: f32[8,8], index: 9, kind: input, shape index: {}]   ;;  %s1223_s10 = inlined_call_operand.vmem [shape: f32[128,8], index: 10, kind: output, shape index: {0}]   ;;  %s1224_s11 = inlined_call_operand.vmem [shape: f32[128,8], index: 11, kind: output, shape index: {1}]  }
   0x1 LB: > { %s963_s18 = sadd.s32 4294967295, %s1074_s17   ;;  %p967_p0 = scmp.ge.s32.totalorder %s1074_s17, 1  ;;  %s1074_s17 = sphi %s1136_s17, %s22_s17  }
   0x2   : > { %p352_p1 = scmp.lt.s32.totalorder %s1074_s17, 5 }
   0x4   : > { %p353_p2 = pnand %p967_p0, %p352_p1 }
   0x5   : > { %v485_v0 = vld [vmem:[%s1220_s7] sm:$0xff] (!%p353_p2)  ;;  %s968_s23 = sshll.u32 (!%p353_p2), %s963_s18, 2  ;;  %v450_v8 = vlaneseq (!%p353_p2)  ;;  %vm486_vm0 = vcmask (!%p353_p2), 64512  }
   0x6   : > { %356 = sbr.rel (%p353_p2) target bundleno = 255 (0xff), region = 60  ;;  %v686_v1 = vld [vmem:[%s1222_s9] sm:$0xff] (!%p353_p2)  ;;  %1016 = vmatprep.subr.mxu0 (!%p353_p2), %v485_v0  ;;  %p403_p3 = scmp.lt.s32.totalorder (!%p353_p2), %s968_s23, 15 }
   0x7   : > { %v426_v2 = vld [vmem:[%s1216_s3] sm:$0x1] (!%p353_p2)  ;;  %1032 = vmatprep.subr.mxu1 (!%p353_p2), %v686_v1  ;;  %1017 = vmatpush3.msra.mxu0 (!%p353_p2), %v485_v0  ;;  %v451_v9 = vshrl.u32 (!%p353_p2), %v450_v8, 7 }
   0x8   : > { %v427_v3 = vmul.f32 (!%p353_p2), 1.442695, %v426_v2  ;;  %v430_v4 = vld [vmem:[%s1218_s5] sm:$0x1] (!%p353_p2)  ;;  %1033 = vmatpush3.msra.mxu1 (!%p353_p2), %v686_v1 }
   0x9   : > { %v484_v5 = vld [vmem:[%s1219_s6] sm:$0xff] (!%p353_p2)  ;;  %v431_v6 = vmul.f32 (!%p353_p2), 1.442695, %v430_v4  ;;  %v452_v14 = vsub.s32 (!%p353_p2), 0, %v451_v9 }
   0xa   : > { %v685_v7 = vld [vmem:[%s1221_s8] sm:$0xff] (!%p353_p2)  ;;  %1064 = vpow2.f32 (!%p353_p2), %v427_v3  ;;  %1024 = vmatprep.subr.mxu0 (!%p353_p2), %v484_v5 }
   0xb   : > { %1040 = vmatprep.subr.mxu1 (!%p353_p2), %v685_v7  ;;  %1066 = vpow2.f32 (!%p353_p2), %v431_v6  ;;  %v977_v11 = vld [vmem:[%s1217_s4] ss:$0 sm:$0xff] (!%p353_p2) }
   0xc   : > { %v976_v24 = vld [vmem:[%s1215_s2] ss:$0 sm:$0xff] (!%p353_p2) }
   0xd   : > { %s1226_s23 = smov (!%p403_p3, %s968_s23), 15 }
   0xe   : > { %s1162_s13 = sshll.u32 %s1226_s23, 3 }
   0xf   : > { %s412_s16 = scalar_lea.vmem %s1214_s1, %s1162_s13  ;;  %s406_s22 = scalar_lea.vmem %s1213_s0, %s1162_s13 }
  0x10   : > { %v459_v10 = vld [vmem:[%s412_s16] sm:$0xff]  ;;  %v460_v12 = vld [vmem:[%s412_s16 + $0x8] sm:$0xff]  ;;  %v461_v15 = vld [vmem:[%s412_s16 + $0x10] sm:$0xff]  ;;  %s418_s27 = scalar_lea.vmem %s1223_s10, %s1162_s13  ;;  %s424_s30 = scalar_lea.vmem %s1224_s11, %s1162_s13 }
  0x11   : > { %v470_v19 = vsub.f32 %v459_v10, %v977_v11  ;;  %v471_v20 = vsub.f32 %v460_v12, %v977_v11  ;;  %v462_v21 = vld [vmem:[%s412_s16 + $0x18] sm:$0xff]  ;;  %v472_v22 = vsub.f32 %v461_v15, %v977_v11  ;;  %v434_v23 = vld [vmem:[%s406_s22] sm:$0xff]  ;;  %v435_v30 = vld [vmem:[%s406_s22 + $0x8] sm:$0xff] }
  0x12   : > { %v473_v26 = vsub.f32 %v462_v21, %v977_v11  ;;  %v445_v31 = vsub.f32 %v434_v23, %v976_v24  ;;  %v436_v33 = vld [vmem:[%s406_s22 + $0x10] sm:$0xff]  ;;  %v446_v35 = vsub.f32 %v435_v30, %v976_v24  ;;  %v437_v38 = vld [vmem:[%s406_s22 + $0x18] sm:$0xff] }
  0x13   : > { %v447_v37 = vsub.f32 %v436_v33, %v976_v24  ;;  %v448_v40 = vsub.f32 %v437_v38, %v976_v24 }
  0x14   : > { %v1065_v13 = vpop.eup %1064 }
  0x15   : > { %v1067_v16 = vpop.eup %1066  ;;  %v429_v17 = vadd.f32 1e-09, %v1065_v13 }
  0x16   : > { %v433_v18 = vadd.f32 1e-09, %v1067_v16 }
  0x17   : > { %v453_v27 = vrot.slane %v429_v17, %v452_v14 }
  0x18   : > { %v478_v25 = vrot.slane %v433_v18, %v452_v14 }
  0x19   : > { %v455_v36 = vmul.f32 %v453_v27, %v445_v31  ;;  %v456_v39 = vmul.f32 %v453_v27, %v446_v35  ;;  %v457_v41 = vmul.f32 %v453_v27, %v447_v37  ;;  %v458_v42 = vmul.f32 %v453_v27, %v448_v40 }
  0x1a   : > { %v480_v28 = vmul.f32 %v478_v25, %v470_v19  ;;  %v481_v29 = vmul.f32 %v478_v25, %v471_v20  ;;  %v482_v32 = vmul.f32 %v478_v25, %v472_v22  ;;  %v483_v34 = vmul.f32 %v478_v25, %v473_v26 }
  0x1c   : > { %1018 = vmatprep.mubr.msk.f32.mxu0 %vm486_vm0, %v480_v28  ;;  %1034 = vmatprep.mubr.msk.f32.mxu1 %vm486_vm0, %v480_v28 }
  0x1d   : > { %1019 = vmatmul.mubr.msk.f32.vlgmr.msra.gmra.mrb[0].mxu0 %vm486_vm0, %v481_v29  ;;  %1035 = vmatmul.mubr.msk.f32.vlgmr.msra.gmra.mrb[0].mxu1 %vm486_vm0, %v481_v29 }
  0x1e   : > { %1025 = vmatpush3.msra.mxu0 %v484_v5  ;;  %1041 = vmatpush3.msra.mxu1 %v685_v7 }
  0x1f   : > { %1021 = vmatprep.mubr.msk.f32.mxu0 %vm486_vm0, %v482_v32  ;;  %1037 = vmatprep.mubr.msk.f32.mxu1 %vm486_vm0, %v482_v32 }
  0x21   : > { %1022 = vmatmul.mubr.msk.f32.gmra.mrb[2].mxu0 %vm486_vm0, %v483_v34  ;;  %1038 = vmatmul.mubr.msk.f32.gmra.mrb[2].mxu1 %vm486_vm0, %v483_v34 }
  0x22   : > { %1026 = vmatprep.mubr.msk.f32.mxu0 %vm486_vm0, %v455_v36  ;;  %1042 = vmatprep.mubr.msk.f32.mxu1 %vm486_vm0, %v455_v36 }
  0x25   : > { %1027 = vmatmul.mubr.msk.f32.vlgmr.msra.gmra.mrb[0].mxu0 %vm486_vm0, %v456_v39  ;;  %1043 = vmatmul.mubr.msk.f32.vlgmr.msra.gmra.mrb[0].mxu1 %vm486_vm0, %v456_v39 }
  0x26   : > { %1029 = vmatprep.mubr.msk.f32.mxu0 %vm486_vm0, %v457_v41  ;;  %1045 = vmatprep.mubr.msk.f32.mxu1 %vm486_vm0, %v457_v41 }
  0x29   : > { %1030 = vmatmul.mubr.msk.f32.gmra.mrb[2].mxu0 %vm486_vm0, %v458_v42  ;;  %1046 = vmatmul.mubr.msk.f32.gmra.mrb[2].mxu1 %vm486_vm0, %v458_v42 }
  0xf8   : > { %v1028_v43 = vpop.f32.mrb[0].mxu0  ;;  %v1044_v44 = vpop.f32.mrb[0].mxu1 }
  0xf9   : > { %682 = vst.msk [vmem:[%s418_s27 + $0x8] sm:$0xff] %vm486_vm0, %v1028_v43  ;;  %858 = vst.msk [vmem:[%s424_s30 + $0x8] sm:$0xff] %vm486_vm0, %v1044_v44  ;;  %v662_v45 = vpop.f32.mrb[1].mxu0  ;;  %v838_v46 = vpop.f32.mrb[1].mxu1 }
  0xfa   : > { %681 = vst.msk [vmem:[%s418_s27] sm:$0xff] %vm486_vm0, %v662_v45  ;;  %857 = vst.msk [vmem:[%s424_s30] sm:$0xff] %vm486_vm0, %v838_v46 }
  0xfc   : > { %v1031_v47 = vpop.f32.mrb[2].mxu0  ;;  %v1047_v48 = vpop.f32.mrb[2].mxu1 }
  0xfd   : > { %684 = vst.msk [vmem:[%s418_s27 + $0x18] sm:$0xff] %vm486_vm0, %v1031_v47  ;;  %860 = vst.msk [vmem:[%s424_s30 + $0x18] sm:$0xff] %vm486_vm0, %v1047_v48  ;;  %v672_v49 = vpop.f32.mrb[3].mxu0  ;;  %v848_v50 = vpop.f32.mrb[3].mxu1 }
  0xfe   : > { %683 = vst.msk [vmem:[%s418_s27 + $0x10] sm:$0xff] %vm486_vm0, %v672_v49  ;;  %859 = vst.msk [vmem:[%s424_s30 + $0x10] sm:$0xff] %vm486_vm0, %v848_v50 }
  0xff PF: > { %s22_s17 = sadd.s32 1, %s1074_s17  }
 0x100   : > { %p19_p4 = scmp.ge.s32.totalorder %s22_s17, 6  }
 0x102   :  { %21 = sbr.rel (!%p19_p4) target bundleno = 1 (0x1), region = 105 }

// kernel: multi_scale_block_forward.13
= control target key start
LH: loop header
LB: loop body
LE: loop exit
PB: predicated region body
PF: predicated region fallthrough
CT: control target
= control target key end

     0   :  { %s2348_s18 = smov 0   ;;  %s2693_s0 = inlined_call_operand.vmem [shape: f32[2,8,8,8], index: 0, kind: input, shape index: {}]   ;;  %s2694_s1 = inlined_call_operand.vmem [shape: f32[2,8,8,8], index: 1, kind: input, shape index: {}]   ;;  %s2695_s2 = inlined_call_operand.vmem [shape: f32[9,8,16], index: 2, kind: input, shape index: {}]   ;;  %s2696_s3 = inlined_call_operand.vmem [shape: f32[1,16], index: 3, kind: input, shape index: {}]   ;;  %s2697_s4 = inlined_call_operand.vmem [shape: f32[1,16], index: 4, kind: input, shape index: {}]   ;;  %s2698_s5 = inlined_call_operand.vmem [shape: f32[2,1,1], index: 5, kind: output, shape index: {}]  }
   0x1 LB: > { %s1909_s19 = sadd.s32 4294967295, %s2313_s18   ;;  %p1913_p0 = scmp.ge.s32.totalorder %s2313_s18, 1  ;;  %s2313_s18 = sphi %s2348_s18, %s15_s18  }
   0x2   : > { %p197_p1 = scmp.lt.s32.totalorder %s2313_s18, 3 }
   0x4   : > { %p198_p2 = pnand %p1913_p0, %p197_p1 }
   0x5   : > { %v1918_v0 = vld [vmem:[%s2695_s2 + $0x8] sm:$0xff] (!%p198_p2)  ;;  %v2362_v1 = vld [vmem:[%s2695_s2 + $0x20] sm:$0xff] (!%p198_p2)  ;;  %vm249_vm0 = vcmask (!%p198_p2), 64512   ;;  %p2364_p3 = scmp.lt.s32.totalorder (!%p198_p2), %s1909_s19, 1  ;;  %v2315_v2 = vmov (!%p198_p2), 1.0   ;;  %vm276_vm1 = vcmask (!%p198_p2), 57344   ;;  %v1634_v51 = vlaneseq (!%p198_p2) }
   0x6   : > { %201 = sbr.rel (%p198_p2) target bundleno = 890 (0x37a), region = 40  ;;  %2084 = vmatprep.subr.mxu1 (!%p198_p2), %v1918_v0  ;;  %2140 = vmatprep.subr.mxu0 (!%p198_p2), %v2362_v1  ;;  %251 = vst.msk [vmem:[#allocation2 + $0x50] sm:$0xff] (!%p198_p2), %vm249_vm0, %v2315_v2  ;;  %250 = vst.msk [vmem:[#allocation2] sm:$0xff] (!%p198_p2), %vm249_vm0, %v2315_v2  ;;  %v2378_v3 = vld [vmem:[%s2695_s2 + $0x28] sm:$0xff] (!%p198_p2)  ;;  %v2383_v4 = vld [vmem:[%s2695_s2] sm:$0xff] (!%p198_p2)  ;;  %vm267_vm2 = vcmask (!%p198_p2), 63488  }
   0x7   : > { %252 = vst.msk [vmem:[#allocation2 + $0xa0] sm:$0xff] (!%p198_p2), %vm249_vm0, %v2315_v2  ;;  %254 = vst.msk [vmem:[#allocation2 + $0x48] sm:$0xff] (!%p198_p2), %vm249_vm0, %v2315_v2  ;;  %2085 = vmatpush3.msra.mxu1 (!%p198_p2), %v1918_v0  ;;  %2141 = vmatpush3.msra.mxu0 (!%p198_p2), %v2362_v1  ;;  %vm286_vm3 = vcmask (!%p198_p2), 64513   ;;  %v1971_v17 = vld [vmem:[%s2695_s2 + $0x30] sm:$0xff] (!%p198_p2)  ;;  %v1980_v25 = vld [vmem:[%s2695_s2 + $0x38] sm:$0xff] (!%p198_p2)  ;;  %v1635_v54 = vshrl.u32 (!%p198_p2), %v1634_v51, 7 }
   0x8   : > { %255 = vst.msk [vmem:[#allocation2 + $0x98] sm:$0xff] (!%p198_p2), %vm249_vm0, %v2315_v2  ;;  %256 = vst.msk [vmem:[#allocation2 + $0xe8] sm:$0xff] (!%p198_p2), %vm249_vm0, %v2315_v2  ;;  %2154 = vmatprep.subr.mxu0 (!%p198_p2), %v2378_v3  ;;  %2098 = vmatprep.subr.mxu1 (!%p198_p2), %v2383_v4  ;;  %v1935_v18 = vld [vmem:[%s2695_s2 + $0x10] sm:$0xff] (!%p198_p2)  ;;  %v1944_v34 = vld [vmem:[%s2695_s2 + $0x18] sm:$0xff] (!%p198_p2)  ;;  %s2316_s24 = smov (!%p198_p2), 120   ;;  %s2317_s28 = smov (!%p198_p2), 8  }
   0x9   : > { %295 = vst.msk [vmem:[#allocation2 + $0xaf] sm:$0x1] (!%p198_p2), %vm276_vm1, %v2315_v2  ;;  %277 = vst.msk [vmem:[#allocation2 + $0x8] sm:$0x1] (!%p198_p2), %vm276_vm1, %v2315_v2  ;;  %v1989_v40 = vld [vmem:[%s2695_s2 + $0x40] sm:$0xff] (!%p198_p2)  ;;  %v1636_v57 = vsub.s32 (!%p198_p2), 0, %v1635_v54 }
   0xa   : > { %278 = vst.msk [vmem:[#allocation2 + $0x10] sm:$0x1] (!%p198_p2), %vm276_vm1, %v2315_v2  ;;  %279 = vst.msk [vmem:[#allocation2 + $0x18] sm:$0x1] (!%p198_p2), %vm276_vm1, %v2315_v2  ;;  %v1629_v48 = vld [vmem:[%s2697_s4] sm:$0x1] (!%p198_p2) }
   0xb   : > { %280 = vst.msk [vmem:[#allocation2 + $0x20] sm:$0x1] (!%p198_p2), %vm276_vm1, %v2315_v2  ;;  %281 = vst.msk [vmem:[#allocation2 + $0x28] sm:$0x1] (!%p198_p2), %vm276_vm1, %v2315_v2  ;;  %v1630_v49 = vmul.f32 (!%p198_p2), 3.0, %v1629_v48  ;;  %vm1848_vm4 = vcmask (!%p198_p2), 0  }
   0xc   : > { %282 = vst.msk [vmem:[#allocation2 + $0x30] sm:$0x1] (!%p198_p2), %vm276_vm1, %v2315_v2  ;;  %283 = vst.msk [vmem:[#allocation2 + $0x38] sm:$0x1] (!%p198_p2), %vm276_vm1, %v2315_v2  ;;  %v1998_v60 = vld [vmem:[%s2696_s3] ss:$0 sm:$0xff] (!%p198_p2) }
   0xd   : > { %s2701_s19 = smov (!%p2364_p3, %s1909_s19), 1  ;;  %284 = vst.msk [vmem:[#allocation2 + $0x40] sm:$0x1] %vm276_vm1, %v2315_v2  ;;  %296 = vst.msk [vmem:[#allocation2 + $0xb7] sm:$0x1] %vm276_vm1, %v2315_v2  ;;  %v313_v11 = vld [vmem:[#allocation2 + $0x50] sm:$0xff] }
   0xe   : > { %297 = vst.msk [vmem:[#allocation2 + $0xbf] sm:$0x1] %vm276_vm1, %v2315_v2  ;;  %298 = vst.msk [vmem:[#allocation2 + $0xc7] sm:$0x1] %vm276_vm1, %v2315_v2  ;;  %s2001_s29 = sshll.u32 %s2701_s19, 6  ;;  %2086 = vmatprep.mubr.msk.f32.mxu1 %vm249_vm0, %v313_v11  ;;  %v303_v28 = vld [vmem:[#allocation2] sm:$0xff]  ;;  %s240_s6 = scalar_lea.vmem %s2698_s5, %s2701_s19 }
   0xf   : > { %299 = vst.msk [vmem:[#allocation2 + $0xcf] sm:$0x1] %vm276_vm1, %v2315_v2  ;;  %300 = vst.msk [vmem:[#allocation2 + $0xd7] sm:$0x1] %vm276_vm1, %v2315_v2  ;;  %s2414_s7 = scalar_lea.vmem %s2693_s0, %s2001_s29  ;;  %v582_v42 = vld [vmem:[#allocation2 + $0xa0] sm:$0xff]  ;;  %v1178_v44 = vld [vmem:[#allocation2 + $0x48] sm:$0xff]  ;;  %s237_s27 = scalar_lea.vmem %s2694_s1, %s2001_s29 }
  0x10   : > { %301 = vst.msk [vmem:[#allocation2 + $0xdf] sm:$0x1] %vm276_vm1, %v2315_v2  ;;  %302 = vst.msk [vmem:[#allocation2 + $0xe7] sm:$0x1] %vm276_vm1, %v2315_v2  ;;  %v241_v5 = vld [vmem:[%s2414_s7] sm:$0xff]  ;;  %v242_v6 = vld [vmem:[%s2414_s7 + $0x8] sm:$0xff] }
  0x11   : > { %v243_v7 = vld [vmem:[%s2414_s7 + $0x10] sm:$0xff]  ;;  %258 = vst.msk [vmem:[#allocation2 + $0x58] sm:$0xff] %vm249_vm0, %v241_v5  ;;  %259 = vst.msk [vmem:[#allocation2 + $0x60] sm:$0xff] %vm249_vm0, %v242_v6  ;;  %v244_v8 = vld [vmem:[%s2414_s7 + $0x18] sm:$0xff]  ;;  %v1631_v50 = vmul.f32 1.442695, %v1630_v49 }
  0x12   : > { %268 = vst.msk [vmem:[#allocation2 + $0x9] sm:$0x7f] %vm267_vm2, %v241_v5  ;;  %269 = vst.msk [vmem:[#allocation2 + $0x11] sm:$0x7f] %vm267_vm2, %v242_v6  ;;  %v245_v9 = vld [vmem:[%s2414_s7 + $0x20] sm:$0xff]  ;;  %v246_v10 = vld [vmem:[%s2414_s7 + $0x28] sm:$0xff] }
  0x13   : > { %288 = vst.msk [vmem:[#allocation2 + $0xaf] sm:$0xfe] %vm286_vm3, %v242_v6  ;;  %287 = vst.msk [vmem:[#allocation2 + $0xa7] sm:$0xfe] %vm286_vm3, %v241_v5  ;;  %v247_v12 = vld [vmem:[%s2414_s7 + $0x30] sm:$0xff]  ;;  %v248_v13 = vld [vmem:[%s2414_s7 + $0x38] sm:$0xff]  ;;  %2289 = vpow2.f32 %v1631_v50 }
  0x14   : > { %260 = vst.msk [vmem:[#allocation2 + $0x68] sm:$0xff] %vm249_vm0, %v243_v7  ;;  %261 = vst.msk [vmem:[#allocation2 + $0x70] sm:$0xff] %vm249_vm0, %v244_v8  ;;  %v1326_v46 = vld [vmem:[#allocation2 + $0x98] sm:$0xff]  ;;  %v1474_v47 = vld [vmem:[#allocation2 + $0xe8] sm:$0xff] }
  0x15   : > { %270 = vst.msk [vmem:[#allocation2 + $0x19] sm:$0x7f] %vm267_vm2, %v243_v7  ;;  %271 = vst.msk [vmem:[#allocation2 + $0x21] sm:$0x7f] %vm267_vm2, %v244_v8 }
  0x16   : > { %289 = vst.msk [vmem:[#allocation2 + $0xb7] sm:$0xfe] %vm286_vm3, %v243_v7  ;;  %290 = vst.msk [vmem:[#allocation2 + $0xbf] sm:$0xfe] %vm286_vm3, %v244_v8 }
  0x17   : > { %262 = vst.msk [vmem:[#allocation2 + $0x78] sm:$0xff] %vm249_vm0, %v245_v9  ;;  %263 = vst.msk [vmem:[#allocation2 + $0x80] sm:$0xff] %vm249_vm0, %v246_v10 }
  0x18   : > { %272 = vst.msk [vmem:[#allocation2 + $0x29] sm:$0x7f] %vm267_vm2, %v245_v9  ;;  %273 = vst.msk [vmem:[#allocation2 + $0x31] sm:$0x7f] %vm267_vm2, %v246_v10  ;;  %v314_v14 = vld [vmem:[#allocation2 + $0x58] sm:$0xff]  ;;  %v2449_v15 = vld [vmem:[#allocation2 + $0x60] sm:$0xff] }
  0x19   : > { %291 = vst.msk [vmem:[#allocation2 + $0xc7] sm:$0xfe] %vm286_vm3, %v245_v9  ;;  %292 = vst.msk [vmem:[#allocation2 + $0xcf] sm:$0xfe] %vm286_vm3, %v246_v10  ;;  %2087 = vmatmul.mubr.msk.f32.vlgmr.msra.gmra.mrb[0].mxu1 %vm249_vm0, %v314_v14  ;;  %2142 = vmatprep.mubr.msk.f32.mxu0 %vm249_vm0, %v314_v14  ;;  %v304_v30 = vld [vmem:[#allocation2 + $0x8] sm:$0xff]  ;;  %v305_v32 = vld [vmem:[#allocation2 + $0x10] sm:$0xff] }
  0x1a   : > { %264 = vst.msk [vmem:[#allocation2 + $0x88] sm:$0xff] %vm249_vm0, %v247_v12  ;;  %265 = vst.msk [vmem:[#allocation2 + $0x90] sm:$0xff] %vm249_vm0, %v248_v13  ;;  %2143 = vmatmul.mubr.msk.f32.vlgmr.msra.gmra.mrb[0].mxu0 %vm249_vm0, %v2449_v15  ;;  %2089 = vmatprep.mubr.msk.f32.mxu1 %vm249_vm0, %v2449_v15  ;;  %v1023_v20 = vld [vmem:[#allocation2 + $0xa8] sm:$0xff]  ;;  %v2480_v22 = vld [vmem:[#allocation2 + $0xb0] sm:$0xff] }
  0x1b   : > { %274 = vst.msk [vmem:[#allocation2 + $0x39] sm:$0x7f] %vm267_vm2, %v247_v12  ;;  %275 = vst.msk [vmem:[#allocation2 + $0x41] sm:$0x7f] %vm267_vm2, %v248_v13  ;;  %v2453_v16 = vld [vmem:[#allocation2 + $0x68] sm:$0xff]  ;;  %2155 = vmatpush3.msra.mxu0 %v2378_v3  ;;  %2099 = vmatpush3.msra.mxu1 %v2383_v4  ;;  %v2467_v19 = vld [vmem:[#allocation2 + $0x70] sm:$0xff] }
  0x1c   : > { %293 = vst.msk [vmem:[#allocation2 + $0xd7] sm:$0xfe] %vm286_vm3, %v247_v12  ;;  %294 = vst.msk [vmem:[#allocation2 + $0xdf] sm:$0xfe] %vm286_vm3, %v248_v13  ;;  %2145 = vmatprep.mubr.msk.f32.mxu0 %vm249_vm0, %v2453_v16  ;;  %2168 = vmatprep.subr.mxu0 %v1971_v17  ;;  %v306_v35 = vld [vmem:[#allocation2 + $0x18] sm:$0xff]  ;;  %v307_v37 = vld [vmem:[#allocation2 + $0x20] sm:$0xff] }
  0x1d   : > { %2090 = vmatmul.mubr.msk.f32.gmra.mrb[2].mxu1 %vm249_vm0, %v2453_v16  ;;  %2112 = vmatprep.subr.mxu1 %v1935_v18  ;;  %v2484_v24 = vld [vmem:[#allocation2 + $0xb8] sm:$0xff]  ;;  %v2499_v27 = vld [vmem:[#allocation2 + $0xc0] sm:$0xff]  ;;  %v2290_v58 = vpop.eup %2289 }
  0x1e   : > { %2146 = vmatmul.mubr.msk.f32.gmra.mrb[2].mxu0 %vm249_vm0, %v2467_v19  ;;  %2092 = vmatprep.mubr.msk.f32.mxu1 %vm249_vm0, %v2467_v19  ;;  %v2477_v21 = vld [vmem:[#allocation2 + $0x78] sm:$0xff]  ;;  %v2482_v23 = vld [vmem:[#allocation2 + $0x80] sm:$0xff]  ;;  %v1637_v62 = vrot.slane %v2290_v58, %v1636_v57 }
  0x1f   : > { %2156 = vmatprep.mubr.msk.f32.mxu0 %vm249_vm0, %v1023_v20  ;;  %v308_v38 = vld [vmem:[#allocation2 + $0x28] sm:$0xff]  ;;  %v309_v39 = vld [vmem:[#allocation2 + $0x30] sm:$0xff]  ;;  %v1647_v57 = vld [vmem:[%s237_s27] sm:$0xff] }
  0x20   : > { %v2501_v29 = vld [vmem:[#allocation2 + $0xc8] sm:$0xff]  ;;  %v2510_v31 = vld [vmem:[#allocation2 + $0xd0] sm:$0xff] }
  0x21   : > { %2093 = vmatmul.mubr.msk.f32.gmra.mrb[4].mxu1 %vm249_vm0, %v2477_v21  ;;  %v2495_v26 = vld [vmem:[#allocation2 + $0x88] sm:$0xff]  ;;  %v1325_v45 = vld [vmem:[#allocation2 + $0x90] sm:$0xff] }
  0x22   : > { %2157 = vmatmul.mubr.msk.f32.vlgmr.msra.gmra.mrb[0].mxu0 %vm249_vm0, %v2480_v22  ;;  %2095 = vmatprep.mubr.msk.f32.mxu1 %vm249_vm0, %v2482_v23  ;;  %v310_v41 = vld [vmem:[#allocation2 + $0x38] sm:$0xff]  ;;  %v1177_v43 = vld [vmem:[#allocation2 + $0x40] sm:$0xff] }
  0x23   : > { %2169 = vmatpush3.msra.mxu0 %v1971_v17  ;;  %2159 = vmatprep.mubr.msk.f32.mxu0 %vm249_vm0, %v2484_v24  ;;  %v2512_v33 = vld [vmem:[#allocation2 + $0xd8] sm:$0xff]  ;;  %v2523_v36 = vld [vmem:[#allocation2 + $0xe0] sm:$0xff] }
  0x24   : > { %2182 = vmatprep.subr.mxu0 %v1980_v25 }
  0x25   : > { %2096 = vmatmul.mubr.msk.f32.gmra.mrb[6].mxu1 %vm249_vm0, %v2495_v26 }
  0x26   : > { %2160 = vmatmul.mubr.msk.f32.gmra.mrb[2].mxu0 %vm249_vm0, %v2499_v27  ;;  %2100 = vmatprep.mubr.msk.f32.mxu1 %vm249_vm0, %v303_v28 }
  0x27   : > { %2162 = vmatprep.mubr.msk.f32.mxu0 %vm249_vm0, %v2501_v29 }
  0x29   : > { %2101 = vmatmul.mubr.msk.f32.vlgmr.msra.gmra.mrb[0].mxu1 %vm249_vm0, %v304_v30 }
  0x2a   : > { %2163 = vmatmul.mubr.msk.f32.gmra.mrb[4].mxu0 %vm249_vm0, %v2510_v31  ;;  %2103 = vmatprep.mubr.msk.f32.mxu1 %vm249_vm0, %v305_v32 }
  0x2b   : > { %2113 = vmatpush3.msra.mxu1 %v1935_v18  ;;  %2165 = vmatprep.mubr.msk.f32.mxu0 %vm249_vm0, %v2512_v33 }
  0x2c   : > { %2126 = vmatprep.subr.mxu1 %v1944_v34 }
  0x2d   : > { %2104 = vmatmul.mubr.msk.f32.gmra.mrb[2].mxu1 %vm249_vm0, %v306_v35 }
  0x2e   : > { %2166 = vmatmul.mubr.msk.f32.gmra.mrb[6].mxu0 %vm249_vm0, %v2523_v36  ;;  %2106 = vmatprep.mubr.msk.f32.mxu1 %vm249_vm0, %v307_v37 }
  0x2f   : > { %2170 = vmatprep.mubr.msk.f32.mxu0 %vm249_vm0, %v305_v32 }
  0x31   : > { %2107 = vmatmul.mubr.msk.f32.gmra.mrb[4].mxu1 %vm249_vm0, %v308_v38 }
  0x32   : > { %2171 = vmatmul.mubr.msk.f32.vlgmr.msra.gmra.mrb[0].mxu0 %vm249_vm0, %v306_v35  ;;  %2109 = vmatprep.mubr.msk.f32.mxu1 %vm249_vm0, %v309_v39 }
  0x33   : > { %2183 = vmatpush3.msra.mxu0 %v1980_v25  ;;  %2173 = vmatprep.mubr.msk.f32.mxu0 %vm249_vm0, %v307_v37 }
  0x34   : > { %2196 = vmatprep.subr.mxu0 %v1989_v40 }
  0x35   : > { %2110 = vmatmul.mubr.msk.f32.gmra.mrb[6].mxu1 %vm249_vm0, %v310_v41 }
  0x36   : > { %2174 = vmatmul.mubr.msk.f32.gmra.mrb[2].mxu0 %vm249_vm0, %v308_v38  ;;  %2114 = vmatprep.mubr.msk.f32.mxu1 %vm249_vm0, %v582_v42 }
  0x37   : > { %2176 = vmatprep.mubr.msk.f32.mxu0 %vm249_vm0, %v309_v39 }
  0x39   : > { %2115 = vmatmul.mubr.msk.f32.vlgmr.msra.gmra.mrb[0].mxu1 %vm249_vm0, %v1023_v20 }
  0x3a   : > { %2177 = vmatmul.mubr.msk.f32.gmra.mrb[4].mxu0 %vm249_vm0, %v310_v41  ;;  %2117 = vmatprep.mubr.msk.f32.mxu1 %vm249_vm0, %v2480_v22 }
  0x3b   : > { %2127 = vmatpush3.msra.mxu1 %v1944_v34  ;;  %2179 = vmatprep.mubr.msk.f32.mxu0 %vm249_vm0, %v1177_v43 }
  0x3c   : > { %2210 = vmatprep.subr.mxu1 %v2362_v1 }
  0x3d   : > { %2118 = vmatmul.mubr.msk.f32.gmra.mrb[2].mxu1 %vm249_vm0, %v2484_v24 }
  0x3e   : > { %2180 = vmatmul.mubr.msk.f32.gmra.mrb[6].mxu0 %vm249_vm0, %v1178_v44  ;;  %2120 = vmatprep.mubr.msk.f32.mxu1 %vm249_vm0, %v2499_v27 }
  0x3f   : > { %2184 = vmatprep.mubr.msk.f32.mxu0 %vm249_vm0, %v2449_v15 }
  0x41   : > { %2121 = vmatmul.mubr.msk.f32.gmra.mrb[4].mxu1 %vm249_vm0, %v2501_v29 }
  0x42   : > { %2185 = vmatmul.mubr.msk.f32.vlgmr.msra.gmra.mrb[0].mxu0 %vm249_vm0, %v2453_v16  ;;  %2123 = vmatprep.mubr.msk.f32.mxu1 %vm249_vm0, %v2510_v31 }
  0x43   : > { %2197 = vmatpush3.msra.mxu0 %v1989_v40  ;;  %2187 = vmatprep.mubr.msk.f32.mxu0 %vm249_vm0, %v2467_v19 }
  0x45   : > { %2124 = vmatmul.mubr.msk.f32.gmra.mrb[6].mxu1 %vm249_vm0, %v2512_v33 }
  0x46   : > { %2188 = vmatmul.mubr.msk.f32.gmra.mrb[2].mxu0 %vm249_vm0, %v2477_v21  ;;  %2128 = vmatprep.mubr.msk.f32.mxu1 %vm249_vm0, %v304_v30 }
  0x47   : > { %2190 = vmatprep.mubr.msk.f32.mxu0 %vm249_vm0, %v2482_v23 }
  0x49   : > { %2129 = vmatmul.mubr.msk.f32.vlgmr.msra.gmra.mrb[0].mxu1 %vm249_vm0, %v305_v32 }
  0x4a   : > { %2191 = vmatmul.mubr.msk.f32.gmra.mrb[4].mxu0 %vm249_vm0, %v2495_v26  ;;  %2131 = vmatprep.mubr.msk.f32.mxu1 %vm249_vm0, %v306_v35 }
  0x4b   : > { %2211 = vmatpush3.msra.mxu1 %v2362_v1  ;;  %2193 = vmatprep.mubr.msk.f32.mxu0 %vm249_vm0, %v1325_v45 }
  0x4d   : > { %2132 = vmatmul.mubr.msk.f32.gmra.mrb[2].mxu1 %vm249_vm0, %v307_v37 }
  0x4e   : > { %2194 = vmatmul.mubr.msk.f32.gmra.mrb[6].mxu0 %vm249_vm0, %v1326_v46  ;;  %2134 = vmatprep.mubr.msk.f32.mxu1 %vm249_vm0, %v308_v38 }
  0x4f   : > { %2198 = vmatprep.mubr.msk.f32.mxu0 %vm249_vm0, %v2480_v22 }
  0x51   : > { %2135 = vmatmul.mubr.msk.f32.gmra.mrb[4].mxu1 %vm249_vm0, %v309_v39 }
  0x52   : > { %2199 = vmatmul.mubr.msk.f32.vlgmr.msra.gmra.mrb[0].mxu0 %vm249_vm0, %v2484_v24  ;;  %2137 = vmatprep.mubr.msk.f32.mxu1 %vm249_vm0, %v310_v41 }
  0x53   : > { %2201 = vmatprep.mubr.msk.f32.mxu0 %vm249_vm0, %v2499_v27 }
  0x55   : > { %2138 = vmatmul.mubr.msk.f32.gmra.mrb[6].mxu1 %vm249_vm0, %v1177_v43 }
  0x56   : > { %2202 = vmatmul.mubr.msk.f32.gmra.mrb[2].mxu0 %vm249_vm0, %v2501_v29  ;;  %2148 = vmatprep.mubr.msk.f32.mxu1 %vm249_vm0, %v2477_v21 }
  0x57   : > { %2204 = vmatprep.mubr.msk.f32.mxu0 %vm249_vm0, %v2510_v31 }
  0x59   : > { %2149 = vmatmul.mubr.msk.f32.vlgmr.msra.gmra.mrb[4].mxu1 %vm249_vm0, %v2482_v23 }
  0x5a   : > { %2205 = vmatmul.mubr.msk.f32.gmra.mrb[4].mxu0 %vm249_vm0, %v2512_v33  ;;  %2151 = vmatprep.mubr.msk.f32.mxu1 %vm249_vm0, %v2495_v26 }
  0x5b   : > { %2207 = vmatprep.mubr.msk.f32.mxu0 %vm249_vm0, %v2523_v36 }
  0x5d   : > { %2152 = vmatmul.mubr.msk.f32.gmra.mrb[6].mxu1 %vm249_vm0, %v1325_v45 }
  0x5e   : > { %2208 = vmatmul.mubr.msk.f32.gmra.mrb[6].mxu0 %vm249_vm0, %v1474_v47 }
 0x11c   : > { %v2130_v52 = vpop.f32.mrb[0].mxu1 }
 0x11d   : > { %v829_v53 = vpop.f32.mrb[1].mxu1 }
 0x120   : > { %v2133_v55 = vpop.f32.mrb[2].mxu1 }
 0x121   : > { %v839_v56 = vpop.f32.mrb[3].mxu1 }
 0x125   : > { %v2200_v59 = vpop.f32.mrb[0].mxu0 }
 0x126   : > { %v2212_v61 = vadd.f32 %v2200_v59, %v2130_v52  ;;  %v1567_v63 = vpop.f32.mrb[1].mxu0  ;;  %v1648_v59 = vld [vmem:[%s237_s27 + $0x8] sm:$0xff] }
 0x127   : > { %v2213_v0 = vadd.f32 %v1567_v63, %v829_v53 }
 0x128   : > { %v1622_v1 = vadd.f32 %v2212_v61, %v1998_v60 }
 0x129   : > { %v1621_v2 = vadd.f32 %v2213_v0, %v1998_v60  ;;  %v2203_v3 = vpop.f32.mrb[2].mxu0  ;;  %v1650_v0 = vld [vmem:[%s237_s27 + $0x18] sm:$0xff] }
 0x12a   : > { %v2609_v4 = vmul.f32 %v1637_v62, %v1622_v1  ;;  %v2214_v5 = vadd.f32 %v2203_v3, %v2133_v55  ;;  %v1577_v6 = vpop.f32.mrb[3].mxu0  ;;  %v1651_v1 = vld [vmem:[%s237_s27 + $0x20] sm:$0xff] }
 0x12b   : > { %v2611_v7 = vmul.f32 %v1637_v62, %v1621_v2  ;;  %v2215_v8 = vadd.f32 %v1577_v6, %v839_v56 }
 0x12c   : > { %v1688_v9 = vmul.f32 -2.0, %v2609_v4  ;;  %v1624_v10 = vadd.f32 %v2214_v5, %v1998_v60  ;;  %v2150_v11 = vpop.f32.mrb[4].mxu1  ;;  %v1664_v61 = vsub.f32 %v1648_v59, %v2609_v4 }
 0x12d   : > { %v1687_v12 = vmul.f32 -2.0, %v2611_v7  ;;  %v1623_v13 = vadd.f32 %v2215_v8, %v1998_v60  ;;  %v996_v14 = vpop.f32.mrb[5].mxu1  ;;  %v2206_v15 = vpop.f32.mrb[4].mxu0  ;;  %v1663_v58 = vsub.f32 %v1647_v57, %v2611_v7 }
 0x12e   : > { %v2615_v16 = vmul.f32 %v1637_v62, %v1624_v10  ;;  %v2216_v17 = vadd.f32 %v2206_v15, %v2150_v11  ;;  %v1587_v18 = vpop.f32.mrb[5].mxu0  ;;  %v1697_v22 = vmul.f32 1.442695, %v1688_v9  ;;  %v1672_v2 = vmul.f32 0.5, %v1664_v61  ;;  %v1652_v10 = vld [vmem:[%s237_s27 + $0x28] sm:$0xff]  ;;  %v1653_v11 = vld [vmem:[%s237_s27 + $0x30] sm:$0xff] }
 0x12f   : > { %v1695_v19 = vmul.f32 1.442695, %v1687_v12  ;;  %v2617_v20 = vmul.f32 %v1637_v62, %v1623_v13  ;;  %v2217_v21 = vadd.f32 %v1587_v18, %v996_v14 }
 0x130   : > { %v1690_v23 = vmul.f32 -2.0, %v2615_v16  ;;  %v1626_v24 = vadd.f32 %v2216_v17, %v1998_v60  ;;  %v2153_v25 = vpop.f32.mrb[6].mxu1  ;;  %v1666_v3 = vsub.f32 %v1650_v0, %v2615_v16  ;;  %v1680_v13 = vmul.f32 %v1672_v2, %v1664_v61 }
 0x131   : > { %2291 = vpow2.f32 %v1695_v19  ;;  %v1689_v26 = vmul.f32 -2.0, %v2617_v20  ;;  %v1625_v27 = vadd.f32 %v2217_v21, %v1998_v60  ;;  %v1006_v28 = vpop.f32.mrb[7].mxu1  ;;  %v2209_v29 = vpop.f32.mrb[6].mxu0 }
 0x132   : > { %v2621_v30 = vmul.f32 %v1637_v62, %v1626_v24  ;;  %v2218_v31 = vadd.f32 %v2209_v29, %v2153_v25  ;;  %v1597_v32 = vpop.f32.mrb[7].mxu0  ;;  %2293 = vpow2.f32 %v1697_v22  ;;  %v1701_v36 = vmul.f32 1.442695, %v1690_v23  ;;  %v1654_v23 = vld [vmem:[%s237_s27 + $0x38] sm:$0xff] }
 0x133   : > { %v1699_v33 = vmul.f32 1.442695, %v1689_v26  ;;  %v2623_v34 = vmul.f32 %v1637_v62, %v1625_v27  ;;  %v2219_v35 = vadd.f32 %v1597_v32, %v1006_v28  ;;  %v1674_v14 = vmul.f32 0.5, %v1666_v3 }
 0x134   : > { %v1692_v37 = vmul.f32 -2.0, %v2621_v30  ;;  %v1628_v38 = vadd.f32 %v2218_v31, %v1998_v60  ;;  %v1668_v18 = vsub.f32 %v1652_v10, %v2621_v30 }
 0x135   : > { %2295 = vpow2.f32 %v1699_v33  ;;  %v1691_v39 = vmul.f32 -2.0, %v2623_v34  ;;  %v1627_v40 = vadd.f32 %v2219_v35, %v1998_v60  ;;  %v1649_v60 = vld [vmem:[%s237_s27 + $0x10] sm:$0xff]  ;;  %v1667_v8 = vsub.f32 %v1651_v1, %v2623_v34 }
 0x136   : > { %v2627_v41 = vmul.f32 %v1637_v62, %v1628_v38  ;;  %2297 = vpow2.f32 %v1701_v36  ;;  %v1705_v44 = vmul.f32 1.442695, %v1692_v37  ;;  %v1665_v63 = vsub.f32 %v1649_v60, %v2617_v20 }
 0x137   : > { %v1703_v42 = vmul.f32 1.442695, %v1691_v39  ;;  %v2629_v43 = vmul.f32 %v1637_v62, %v1627_v40  ;;  %v1671_v62 = vmul.f32 0.5, %v1663_v58  ;;  %v1675_v17 = vmul.f32 0.5, %v1667_v8 }
 0x138   : > { %v1694_v45 = vmul.f32 -2.0, %v2627_v41  ;;  %v1673_v6 = vmul.f32 0.5, %v1665_v63  ;;  %v1682_v26 = vmul.f32 %v1674_v14, %v1666_v3  ;;  %v1676_v28 = vmul.f32 0.5, %v1668_v18 }
 0x139   : > { %2299 = vpow2.f32 %v1703_v42  ;;  %v1693_v46 = vmul.f32 -2.0, %v2629_v43  ;;  %v1679_v5 = vmul.f32 %v1671_v62, %v1663_v58  ;;  %v1669_v19 = vsub.f32 %v1653_v11, %v2629_v43 }
 0x13a   : > { %2301 = vpow2.f32 %v1705_v44  ;;  %v1709_v49 = vmul.f32 1.442695, %v1694_v45  ;;  %v1681_v15 = vmul.f32 %v1673_v6, %v1665_v63  ;;  %v1683_v27 = vmul.f32 %v1675_v17, %v1667_v8 }
 0x13b   : > { %v2292_v47 = vpop.eup %2291  ;;  %v1707_v48 = vmul.f32 1.442695, %v1693_v46  ;;  %v1677_v29 = vmul.f32 0.5, %v1669_v19  ;;  %v1670_v31 = vsub.f32 %v1654_v23, %v2627_v41  ;;  %v1684_v37 = vmul.f32 %v1676_v28, %v1668_v18 }
 0x13c   : > { %1719 = vrot.lane.b32.xlu0 %v2292_v47, %s2316_s24  ;;  %v2294_v50 = vpop.eup %2293  ;;  %v1658_v58 = vsub.f32 -0.9189385, %v2615_v16  ;;  %v1662_v16 = vsub.f32 -0.9189385, %v2627_v41 }
 0x13d   : > { %2303 = vpow2.f32 %v1707_v48  ;;  %v1685_v38 = vmul.f32 %v1677_v29, %v1669_v19  ;;  %v1678_v39 = vmul.f32 0.5, %v1670_v31 }
 0x13e   : > { %2305 = vpow2.f32 %v1709_v49  ;;  %v1655_v49 = vsub.f32 -0.9189385, %v2611_v7  ;;  %v1659_v7 = vsub.f32 -0.9189385, %v2623_v34 }
 0x13f   : > { %v2296_v51 = vpop.eup %2295  ;;  %v1686_v46 = vmul.f32 %v1678_v39, %v1670_v31 }
 0x140   : > { %1721 = vrot.lane.b32.xlu0 %v2294_v50, %s2316_s24  ;;  %1723 = vrot.lane.b32.xlu1 %v2296_v51, %s2316_s24  ;;  %v2298_v52 = vpop.eup %2297 }
 0x143   : > { %v2300_v53 = vpop.eup %2299 }
 0x144   : > { %1725 = vrot.lane.b32.xlu1 %v2298_v52, %s2316_s24  ;;  %1727 = vrot.lane.b32.xlu0 %v2300_v53, %s2316_s24  ;;  %v2302_v54 = vpop.eup %2301  ;;  %v1656_v52 = vsub.f32 -0.9189385, %v2609_v4  ;;  %v1657_v53 = vsub.f32 -0.9189385, %v2617_v20  ;;  %v1660_v4 = vsub.f32 -0.9189385, %v2621_v30 }
 0x145   : > { %v1661_v20 = vsub.f32 -0.9189385, %v2629_v43 }
 0x147   : > { %v2304_v55 = vpop.eup %2303 }
 0x148   : > { %1729 = vrot.lane.b32.xlu1 %v2302_v54, %s2316_s24  ;;  %1731 = vrot.lane.b32.xlu0 %v2304_v55, %s2316_s24  ;;  %v2306_v56 = vpop.eup %2305 }
 0x14c   : > { %1733 = vrot.lane.b32.xlu1 %v2306_v56, %s2316_s24 }
 0x1ae   : > { %v1720_v9 = vpop.permute.xlu0 %1719 }
 0x1af   : > { %v1743_v12 = vmul.f32 %v1720_v9, %v1679_v5 }
 0x1b1   : > { %1759 = vrot.lane.b32.xlu0 %v1743_v12, %s2317_s28 }
 0x1b2   : > { %v1722_v21 = vpop.permute.xlu0 %1721  ;;  %v1724_v22 = vpop.permute.xlu1 %1723 }
 0x1b3   : > { %v1744_v24 = vmul.f32 %v1722_v21, %v1680_v13  ;;  %v1745_v25 = vmul.f32 %v1724_v22, %v1681_v15 }
 0x1b5   : > { %1761 = vrot.lane.b32.xlu1 %v1744_v24, %s2317_s28  ;;  %1763 = vrot.lane.b32.xlu0 %v1745_v25, %s2317_s28 }
 0x1b6   : > { %v1726_v32 = vpop.permute.xlu1 %1725  ;;  %v1728_v33 = vpop.permute.xlu0 %1727 }
 0x1b7   : > { %v1746_v35 = vmul.f32 %v1726_v32, %v1682_v26  ;;  %v1747_v36 = vmul.f32 %v1728_v33, %v1683_v27 }
 0x1b9   : > { %1765 = vrot.lane.b32.xlu1 %v1746_v35, %s2317_s28  ;;  %1767 = vrot.lane.b32.xlu0 %v1747_v36, %s2317_s28 }
 0x1ba   : > { %v1730_v40 = vpop.permute.xlu1 %1729  ;;  %v1732_v42 = vpop.permute.xlu0 %1731 }
 0x1bb   : > { %v1748_v44 = vmul.f32 %v1730_v40, %v1684_v37  ;;  %v1749_v45 = vmul.f32 %v1732_v42, %v1685_v38 }
 0x1bd   : > { %1769 = vrot.lane.b32.xlu1 %v1748_v44, %s2317_s28  ;;  %1771 = vrot.lane.b32.xlu0 %v1749_v45, %s2317_s28 }
 0x1be   : > { %v1734_v47 = vpop.permute.xlu1 %1733 }
 0x1bf   : > { %v1750_v48 = vmul.f32 %v1734_v47, %v1686_v46 }
 0x1c1   : > { %1773 = vrot.lane.b32.xlu1 %v1750_v48, %s2317_s28 }
 0x223   : > { %v1760_v50 = vpop.permute.xlu0 %1759 }
 0x224   : > { %v1783_v51 = vsub.f32 %v1655_v49, %v1760_v50 }
 0x226   : > { %1799 = vrot.lane.b32.xlu0 %v1783_v51, %s2316_s24 }
 0x227   : > { %v1762_v54 = vpop.permute.xlu1 %1761  ;;  %v1764_v55 = vpop.permute.xlu0 %1763 }
 0x228   : > { %v1784_v56 = vsub.f32 %v1656_v52, %v1762_v54  ;;  %v1785_v57 = vsub.f32 %v1657_v53, %v1764_v55 }
 0x22a   : > { %1801 = vrot.lane.b32.xlu1 %v1784_v56, %s2316_s24  ;;  %1803 = vrot.lane.b32.xlu0 %v1785_v57, %s2316_s24 }
 0x22b   : > { %v1766_v59 = vpop.permute.xlu1 %1765  ;;  %v1768_v60 = vpop.permute.xlu0 %1767 }
 0x22c   : > { %v1786_v61 = vsub.f32 %v1658_v58, %v1766_v59  ;;  %v1787_v62 = vsub.f32 %v1659_v7, %v1768_v60 }
 0x22e   : > { %1805 = vrot.lane.b32.xlu1 %v1786_v61, %s2316_s24  ;;  %1807 = vrot.lane.b32.xlu0 %v1787_v62, %s2316_s24 }
 0x22f   : > { %v1770_v63 = vpop.permute.xlu1 %1769  ;;  %v1772_v0 = vpop.permute.xlu0 %1771 }
 0x230   : > { %v1788_v1 = vsub.f32 %v1660_v4, %v1770_v63  ;;  %v1789_v2 = vsub.f32 %v1661_v20, %v1772_v0 }
 0x232   : > { %1809 = vrot.lane.b32.xlu1 %v1788_v1, %s2316_s24  ;;  %1811 = vrot.lane.b32.xlu0 %v1789_v2, %s2316_s24 }
 0x233   : > { %v1774_v34 = vpop.permute.xlu1 %1773 }
 0x234   : > { %v1790_v3 = vsub.f32 %v1662_v16, %v1774_v34 }
 0x236   : > { %1813 = vrot.lane.b32.xlu1 %v1790_v3, %s2316_s24 }
 0x298   : > { %v1800_v5 = vpop.permute.xlu0 %1799 }
 0x299   : > { %v1823_v30 = vsel %vm249_vm0, %v1800_v5, 0.0 }
 0x29c   : > { %v1802_v6 = vpop.permute.xlu1 %1801  ;;  %v1804_v8 = vpop.permute.xlu0 %1803 }
 0x29d   : > { %v1824_v43 = vsel %vm249_vm0, %v1802_v6, 0.0  ;;  %v1826_v10 = vsel %vm249_vm0, %v1804_v8, 0.0 }
 0x29e   : > { %v1825_v9 = vadd.f32 %v1824_v43, %v1823_v30 }
 0x2a0   : > { %v1827_v11 = vadd.f32 %v1826_v10, %v1825_v9  ;;  %v1806_v12 = vpop.permute.xlu1 %1805  ;;  %v1808_v13 = vpop.permute.xlu0 %1807 }
 0x2a1   : > { %v1828_v14 = vsel %vm249_vm0, %v1806_v12, 0.0  ;;  %v1830_v15 = vsel %vm249_vm0, %v1808_v13, 0.0 }
 0x2a2   : > { %v1829_v41 = vadd.f32 %v1828_v14, %v1827_v11 }
 0x2a4   : > { %v1831_v17 = vadd.f32 %v1830_v15, %v1829_v41  ;;  %v1810_v18 = vpop.permute.xlu1 %1809  ;;  %v1812_v19 = vpop.permute.xlu0 %1811 }
 0x2a5   : > { %v1832_v21 = vsel %vm249_vm0, %v1810_v18, 0.0  ;;  %v1834_v23 = vsel %vm249_vm0, %v1812_v19, 0.0 }
 0x2a6   : > { %v1833_v22 = vadd.f32 %v1832_v21, %v1831_v17 }
 0x2a8   : > { %v1835_v24 = vadd.f32 %v1834_v23, %v1833_v22  ;;  %v1814_v25 = vpop.permute.xlu1 %1813 }
 0x2a9   : > { %v1836_v26 = vsel %vm249_vm0, %v1814_v25, 0.0 }
 0x2aa   : > { %v1837_v27 = vadd.f32 %v1836_v26, %v1835_v24 }
 0x2ac   : > { %1838 = vadd.xlane.f32.xlu0 %v1837_v27 }
 0x339   : > { %v1839_v28 = vpop.xlane.xlu0 %1838 }
 0x33a   : > { %v1840_v29 = vrot.slane %v1839_v28, 4 }
 0x33c   : > { %v1841_v31 = vadd.f32 %v1840_v29, %v1839_v28 }
 0x33e   : > { %v1842_v32 = vrot.slane %v1841_v31, 2 }
 0x340   : > { %v1843_v33 = vadd.f32 %v1842_v32, %v1841_v31 }
 0x342   : > { %v1844_v35 = vrot.slane %v1843_v33, 1 }
 0x344   : > { %v1845_v36 = vadd.f32 %v1844_v35, %v1843_v33 }
 0x346   : > { %2276 = vpush %v1845_v36 }
 0x377   : > { %s2277_s7 = spop %2276 }
 0x378   : > { %v1847_v37 = vstv %s2277_s7 }
 0x379   : > { %1849 = vst.msk [vmem:[%s240_s6] sm:$0x1] %vm1848_vm4, %v1847_v37 }
 0x37a PF: > { %s15_s18 = sadd.s32 1, %s2313_s18  }
 0x37b   : > { %p12_p4 = scmp.ge.s32.totalorder %s15_s18, 4  }
 0x37d   :  { %14 = sbr.rel (!%p12_p4) target bundleno = 1 (0x1), region = 90 }

// kernel: multi_scale_block_forward.9
= control target key start
LH: loop header
LB: loop body
LE: loop exit
PB: predicated region body
PF: predicated region fallthrough
CT: control target
= control target key end

     0   :  { %s4086_s13 = smov 0   ;;  %s4088_s14 = smov 0   ;;  %s4626_s0 = inlined_call_operand.vmem [shape: f32[2,8,8,8], index: 0, kind: input, shape index: {}]   ;;  %s4627_s1 = inlined_call_operand.vmem [shape: f32[2,8,8,8], index: 1, kind: input, shape index: {}]   ;;  %s4628_s2 = inlined_call_operand.vmem [shape: f32[9,8,32], index: 2, kind: input, shape index: {}]   ;;  %s4629_s3 = inlined_call_operand.vmem [shape: f32[1,32], index: 3, kind: input, shape index: {}]   ;;  %s4630_s4 = inlined_call_operand.vmem [shape: f32[32,32], index: 4, kind: input, shape index: {}]   ;;  %s4631_s5 = inlined_call_operand.vmem [shape: f32[1,32], index: 5, kind: input, shape index: {}]   ;;  %s4632_s6 = inlined_call_operand.vmem [shape: f32[9,32,16], index: 6, kind: input, shape index: {}]   ;;  %s4633_s7 = inlined_call_operand.vmem [shape: f32[1,16], index: 7, kind: input, shape index: {}]   ;;  %s4634_s8 = inlined_call_operand.vmem [shape: f32[1,16], index: 8, kind: input, shape index: {}]   ;;  %s4635_s9 = inlined_call_operand.vmem [shape: f32[2,8,8,8], index: 9, kind: output, shape index: {0}]   ;;  %s4636_s10 = inlined_call_operand.vmem [shape: f32[2,1,1], index: 10, kind: output, shape index: {1}]  }
   0x1   :  { %s4090_s15 = smov 0   ;;  %s4092_s16 = smov 0  }
   0x2   :  { %s4094_s17 = smov 0  }
   0x3 LB: > { %4639 = sst [smem:[#allocation4_spill]] %s4016_s15  ;;  %s30_s18 = sadd.s32 1, %s4016_s15  ;;  %s4024_s17 = sphi %s4094_s17, %s21_s17   ;;  %s4020_s16 = sphi %s4092_s16, %s4646_s16   ;;  %s4016_s15 = sphi %s4090_s15, %s4645_s15   ;;  %s4012_s14 = sphi %s4088_s14, %s4644_s14   ;;  %s4008_s13 = sphi %s4086_s13, %s4643_s13  }
   0x4   : > { %4640 = sst [smem:[#allocation5_spill]] %s4020_s16  ;;  %s33_s19 = sadd.s32 1, %s4020_s16 }
   0x5   : > { %p31_p0 = scmp.ge.s32.totalorder %s30_s18, 2  ;;  %p3141_p1 = scmp.ge.s32.totalorder %s4024_s17, 1 }
   0x6   : > { %p346_p2 = scmp.lt.s32.totalorder %s4024_s17, 5 }
   0x7   : > { %s4648_s18 = smov (%p31_p0, %s30_s18), 0  ;;  %s4650_s19 = smov (!%p31_p0, %s33_s19), %s4020_s16 }
   0x8   : > { %4641 = sst [smem:[#allocation6_spill]] %s4648_s18  ;;  %p347_p3 = pnand %p3141_p1, %p346_p2 }
   0x9   : > { %p35_p4 = scmp.ge.s32.totalorder %s4650_s19, 2  ;;  %p400_p5 = scmp.lt.s32.totalorder (!%p347_p3), %s4012_s14, 1 }
   0xa   : > { %350 = sbr.rel (%p347_p3) target bundleno = 1267 (0x4f3), region = 56  ;;  %s3144_s20 = sshll.u32 (!%p347_p3), %s4008_s13, 2 }
   0xb   : > { %s4652_s19 = smov (%p35_p4, %s4650_s19), 0  ;;  %p408_p6 = scmp.lt.s32.totalorder (!%p347_p3), %s3144_s20, 7 }
   0xc   : > { %4642 = sst [smem:[#allocation7_spill]] %s4652_s19  ;;  %p3150_p7 = scmp.ne.s32.totalorder (!%p347_p3), %s4008_s13, 0 }
  0x11   : > { %s4654_s14 = smov (!%p400_p5, %s4012_s14), 1  ;;  %s4656_s20 = smov (!%p408_p6, %s3144_s20), 7 }
  0x12   : > { %s3358_s21 = sshll.u32 %s4654_s14, 6  ;;  %s3145_s22 = sshll.u32 %s4654_s14, 3  ;;  %vm440_vm0 = vcmask (!%p3150_p7), 64512   ;;  %vm468_vm1 = vcmask (!%p3150_p7), 63488   ;;  %v4026_v3 = vmov (!%p3150_p7), 0.0   ;;  %vm477_vm2 = vcmask (!%p3150_p7), 57344  }
  0x13   : > { %s4122_s25 = scalar_lea.vmem %s4626_s0, %s3358_s21  ;;  %s411_s26 = sadd.s32 %s3145_s22, %s4656_s20  ;;  %441 = vst.msk [vmem:[#allocation2] sm:$0xff] (!%p3150_p7), %vm440_vm0, %v4026_v3  ;;  %442 = vst.msk [vmem:[#allocation2 + $0x8] sm:$0xff] (!%p3150_p7), %vm440_vm0, %v4026_v3  ;;  %vm487_vm3 = vcmask (!%p3150_p7), 64513   ;;  %vm504_vm4 = vcmask (!%p3150_p7), 0  }
  0x14   : > { %s3146_s27 = sshll.u32 %s411_s26, 3  ;;  %s4127_s30 = scalar_lea.vmem %s4636_s10, %s4654_s14  ;;  %v432_v0 = vld [vmem:[%s4122_s25] sm:$0xff] (!%p3150_p7)  ;;  %v433_v1 = vld [vmem:[%s4122_s25 + $0x8] sm:$0xff] (!%p3150_p7)  ;;  %v434_v2 = vld [vmem:[%s4122_s25 + $0x10] sm:$0xff] (!%p3150_p7)  ;;  %444 = vst.msk [vmem:[#allocation2 + $0x50] sm:$0xff] (!%p3150_p7), %vm440_vm0, %v4026_v3 }
  0x15   : > { %s4132_s19 = scalar_lea.vmem %s4627_s1, %s3146_s27  ;;  %s4137_s15 = scalar_lea.vmem %s4635_s9, %s3146_s27  ;;  %445 = vst.msk [vmem:[#allocation2 + $0x58] sm:$0xff] (!%p3150_p7), %vm440_vm0, %v4026_v3  ;;  %447 = vst.msk [vmem:[#allocation2 + $0x60] sm:$0xff] (!%p3150_p7), %vm440_vm0, %v4026_v3  ;;  %v435_v4 = vld [vmem:[%s4122_s25 + $0x18] sm:$0xff] (!%p3150_p7)  ;;  %v436_v5 = vld [vmem:[%s4122_s25 + $0x20] sm:$0xff] (!%p3150_p7) }
  0x16   : > { %431 = sbr.rel (%p3150_p7) target bundleno = 47 (0x2f), region = 60  ;;  %448 = vst.msk [vmem:[#allocation2 + $0x68] sm:$0xff] (!%p3150_p7), %vm440_vm0, %v4026_v3  ;;  %450 = vst.msk [vmem:[#allocation2 + $0xb0] sm:$0xff] (!%p3150_p7), %vm440_vm0, %v4026_v3  ;;  %v437_v6 = vld [vmem:[%s4122_s25 + $0x28] sm:$0xff] (!%p3150_p7)  ;;  %v438_v7 = vld [vmem:[%s4122_s25 + $0x30] sm:$0xff] (!%p3150_p7) }
  0x17   : > { %451 = vst.msk [vmem:[#allocation2 + $0xb8] sm:$0xff] (!%p3150_p7), %vm440_vm0, %v4026_v3  ;;  %453 = vst.msk [vmem:[#allocation2 + $0xc0] sm:$0xff] (!%p3150_p7), %vm440_vm0, %v4026_v3  ;;  %v439_v8 = vld [vmem:[%s4122_s25 + $0x38] sm:$0xff] (!%p3150_p7) }
  0x18   : > { %454 = vst.msk [vmem:[#allocation2 + $0xc8] sm:$0xff] (!%p3150_p7), %vm440_vm0, %v4026_v3  ;;  %456 = vst.msk [vmem:[#allocation2 + $0x110] sm:$0xff] (!%p3150_p7), %vm440_vm0, %v4026_v3 }
  0x19   : > { %457 = vst.msk [vmem:[#allocation2 + $0x118] sm:$0xff] (!%p3150_p7), %vm440_vm0, %v4026_v3  ;;  %459 = vst.msk [vmem:[#allocation2 + $0x70] sm:$0xff] (!%p3150_p7), %vm440_vm0, %v432_v0 }
  0x1a   : > { %460 = vst.msk [vmem:[#allocation2 + $0x78] sm:$0xff] (!%p3150_p7), %vm440_vm0, %v433_v1  ;;  %461 = vst.msk [vmem:[#allocation2 + $0x80] sm:$0xff] (!%p3150_p7), %vm440_vm0, %v434_v2 }
  0x1b   : > { %469 = vst.msk [vmem:[#allocation2 + $0x11] sm:$0x7f] (!%p3150_p7), %vm468_vm1, %v432_v0  ;;  %470 = vst.msk [vmem:[#allocation2 + $0x19] sm:$0x7f] (!%p3150_p7), %vm468_vm1, %v433_v1 }
  0x1c   : > { %471 = vst.msk [vmem:[#allocation2 + $0x21] sm:$0x7f] (!%p3150_p7), %vm468_vm1, %v434_v2  ;;  %472 = vst.msk [vmem:[#allocation2 + $0x29] sm:$0x7f] (!%p3150_p7), %vm468_vm1, %v435_v4 }
  0x1d   : > { %462 = vst.msk [vmem:[#allocation2 + $0x88] sm:$0xff] %vm440_vm0, %v435_v4  ;;  %463 = vst.msk [vmem:[#allocation2 + $0x90] sm:$0xff] %vm440_vm0, %v436_v5 }
  0x1e   : > { %464 = vst.msk [vmem:[#allocation2 + $0x98] sm:$0xff] %vm440_vm0, %v437_v6  ;;  %465 = vst.msk [vmem:[#allocation2 + $0xa0] sm:$0xff] %vm440_vm0, %v438_v7 }
  0x1f   : > { %473 = vst.msk [vmem:[#allocation2 + $0x31] sm:$0x7f] %vm468_vm1, %v436_v5  ;;  %474 = vst.msk [vmem:[#allocation2 + $0x39] sm:$0x7f] %vm468_vm1, %v437_v6 }
  0x20   : > { %478 = vst.msk [vmem:[#allocation2 + $0x10] sm:$0x1] %vm477_vm2, %v4026_v3  ;;  %479 = vst.msk [vmem:[#allocation2 + $0x18] sm:$0x1] %vm477_vm2, %v4026_v3 }
  0x21   : > { %480 = vst.msk [vmem:[#allocation2 + $0x20] sm:$0x1] %vm477_vm2, %v4026_v3  ;;  %481 = vst.msk [vmem:[#allocation2 + $0x28] sm:$0x1] %vm477_vm2, %v4026_v3 }
  0x22   : > { %482 = vst.msk [vmem:[#allocation2 + $0x30] sm:$0x1] %vm477_vm2, %v4026_v3  ;;  %483 = vst.msk [vmem:[#allocation2 + $0x38] sm:$0x1] %vm477_vm2, %v4026_v3 }
  0x23   : > { %484 = vst.msk [vmem:[#allocation2 + $0x40] sm:$0x1] %vm477_vm2, %v4026_v3  ;;  %485 = vst.msk [vmem:[#allocation2 + $0x48] sm:$0x1] %vm477_vm2, %v4026_v3 }
  0x24   : > { %496 = vst.msk [vmem:[#allocation2 + $0xd7] sm:$0x1] %vm477_vm2, %v4026_v3  ;;  %497 = vst.msk [vmem:[#allocation2 + $0xdf] sm:$0x1] %vm477_vm2, %v4026_v3 }
  0x25   : > { %498 = vst.msk [vmem:[#allocation2 + $0xe7] sm:$0x1] %vm477_vm2, %v4026_v3  ;;  %499 = vst.msk [vmem:[#allocation2 + $0xef] sm:$0x1] %vm477_vm2, %v4026_v3 }
  0x26   : > { %500 = vst.msk [vmem:[#allocation2 + $0xf7] sm:$0x1] %vm477_vm2, %v4026_v3  ;;  %501 = vst.msk [vmem:[#allocation2 + $0xff] sm:$0x1] %vm477_vm2, %v4026_v3 }
  0x27   : > { %502 = vst.msk [vmem:[#allocation2 + $0x107] sm:$0x1] %vm477_vm2, %v4026_v3  ;;  %503 = vst.msk [vmem:[#allocation2 + $0x10f] sm:$0x1] %vm477_vm2, %v4026_v3 }
  0x28   : > { %488 = vst.msk [vmem:[#allocation2 + $0xcf] sm:$0xfe] %vm487_vm3, %v432_v0  ;;  %489 = vst.msk [vmem:[#allocation2 + $0xd7] sm:$0xfe] %vm487_vm3, %v433_v1 }
  0x29   : > { %490 = vst.msk [vmem:[#allocation2 + $0xdf] sm:$0xfe] %vm487_vm3, %v434_v2  ;;  %491 = vst.msk [vmem:[#allocation2 + $0xe7] sm:$0xfe] %vm487_vm3, %v435_v4 }
  0x2a   : > { %492 = vst.msk [vmem:[#allocation2 + $0xef] sm:$0xfe] %vm487_vm3, %v436_v5  ;;  %493 = vst.msk [vmem:[#allocation2 + $0xf7] sm:$0xfe] %vm487_vm3, %v437_v6 }
  0x2b   : > { %505 = vst.msk [vmem:[%s4127_s30] sm:$0x1] %vm504_vm4, %v4026_v3 }
  0x2c   : > { %466 = vst.msk [vmem:[#allocation2 + $0xa8] sm:$0xff] %vm440_vm0, %v439_v8 }
  0x2d   : > { %475 = vst.msk [vmem:[#allocation2 + $0x41] sm:$0x7f] %vm468_vm1, %v438_v7  ;;  %476 = vst.msk [vmem:[#allocation2 + $0x49] sm:$0x7f] %vm468_vm1, %v439_v8 }
  0x2e   : > { %494 = vst.msk [vmem:[#allocation2 + $0xff] sm:$0xfe] %vm487_vm3, %v438_v7  ;;  %495 = vst.msk [vmem:[#allocation2 + $0x107] sm:$0xfe] %vm487_vm3, %v439_v8 }
  0x2f PF: > { %v515_v9 = vld [vmem:[%s4628_s2] sm:$0xff]  ;;  %s3359_s18 = sshll.u32 %s4008_s13, 5  ;;  %vm526_vm5 = vcmask 64512   ;;  %v3180_v10 = vld [vmem:[%s4628_s2 + $0x10] sm:$0xff]  ;;  %v3195_v14 = vld [vmem:[%s4628_s2 + $0x18] sm:$0xff]  ;;  %vm1688_vm6 = vcmask 261120  }
  0x30   : > { %3522 = vmatprep.subr.mxu0 %v515_v9  ;;  %s4211_s22 = scalar_lea.vmem [#allocation2], %s3359_s18  ;;  %v3160_v19 = vld [vmem:[%s4628_s2 + $0x8] sm:$0xff]  ;;  %v1677_v21 = vld [vmem:[%s4630_s4] sm:$0xff]  ;;  %v3240_v37 = vld [vmem:[%s4628_s2 + $0x30] sm:$0xff]  ;;  %vm1822_vm7 = vcmask 253952   ;;  %vm1815_vm8 = vcmask 260096  }
  0x31   : > { %3523 = vmatpush3.msra.mxu0 %v515_v9  ;;  %3511 = vmatprep.subr.mxu1 %v3160_v19  ;;  %v1678_v22 = vld [vmem:[%s4630_s4 + $0x8] sm:$0xff]  ;;  %v3210_v28 = vld [vmem:[%s4628_s2 + $0x20] sm:$0xff]  ;;  %v3255_v39 = vld [vmem:[%s4628_s2 + $0x38] sm:$0xff]  ;;  %vm1830_vm9 = vcmask 261121  }
  0x32   : > { %3533 = vmatprep.subr.mxu0 %v3180_v10  ;;  %3512 = vmatpush3.msra.mxu1 %v3160_v19  ;;  %v3753_v24 = vpack.c.bf16 %v1678_v22, %v1677_v21  ;;  %v3225_v35 = vld [vmem:[%s4628_s2 + $0x28] sm:$0xff]  ;;  %v3270_v41 = vld [vmem:[%s4628_s2 + $0x40] sm:$0xff]  ;;  %v1679_v45 = vld [vmem:[%s4630_s4 + $0x10] sm:$0xff] }
  0x33   : > { %v1680_v46 = vld [vmem:[%s4630_s4 + $0x18] sm:$0xff]  ;;  %v3277_v55 = vld [vmem:[%s4629_s3] ss:$0 sm:$0xff] }
  0x34   : > { %3754 = vmatprep.subr.bf16.mxu1 %v3753_v24  ;;  %v3757_v47 = vpack.c.bf16 %v1680_v46, %v1679_v45 }
  0x35   : > { %v509_v11 = vld [vmem:[%s4211_s22] sm:$0xff]  ;;  %v510_v12 = vld [vmem:[%s4211_s22 + $0x8] sm:$0xff]  ;;  %v4216_v13 = vld [vmem:[%s4211_s22 + $0x10] sm:$0xff] }
  0x36   : > { %3524 = vmatprep.mubr.msk.f32.mxu0 %vm526_vm5, %v509_v11  ;;  %v4226_v15 = vld [vmem:[%s4211_s22 + $0x18] sm:$0xff]  ;;  %v4229_v16 = vld [vmem:[%s4211_s22 + $0x20] sm:$0xff]  ;;  %v4236_v17 = vld [vmem:[%s4211_s22 + $0x28] sm:$0xff] }
  0x37   : > { %3525 = vmatmul.mubr.msk.f32.vlgmr.msra.gmra.mrb[0].mxu0 %vm526_vm5, %v510_v12  ;;  %v3174_v18 = vld [vmem:[%s4211_s22 + $0xc0] sm:$0xff]  ;;  %v3204_v23 = vld [vmem:[%s4211_s22 + $0x68] sm:$0xff]  ;;  %v4256_v26 = vld [vmem:[%s4211_s22 + $0x70] sm:$0xff] }
  0x38   : > { %3534 = vmatpush3.msra.mxu0 %v3180_v10  ;;  %3527 = vmatprep.mubr.msk.f32.mxu0 %vm526_vm5, %v4216_v13  ;;  %v3154_v20 = vld [vmem:[%s4211_s22 + $0x60] sm:$0xff]  ;;  %v3175_v25 = vld [vmem:[%s4211_s22 + $0xc8] sm:$0xff]  ;;  %v4260_v27 = vld [vmem:[%s4211_s22 + $0xd0] sm:$0xff] }
  0x39   : > { %3544 = vmatprep.subr.mxu0 %v3195_v14  ;;  %3513 = vmatprep.mubr.msk.f32.mxu1 %vm526_vm5, %v3154_v20  ;;  %v3177_v29 = vld [vmem:[%s4211_s22 + $0xd8] sm:$0xff]  ;;  %v3178_v31 = vld [vmem:[%s4211_s22 + $0xe0] sm:$0xff]  ;;  %v3179_v33 = vld [vmem:[%s4211_s22 + $0xe8] sm:$0xff] }
  0x3a   : > { %3514 = vmatmul.mubr.msk.f32.vlgmr.msra.gmra.mrb[0].mxu1 %vm526_vm5, %v3204_v23  ;;  %v3206_v30 = vld [vmem:[%s4211_s22 + $0x78] sm:$0xff]  ;;  %v3207_v32 = vld [vmem:[%s4211_s22 + $0x80] sm:$0xff]  ;;  %v3208_v34 = vld [vmem:[%s4211_s22 + $0x88] sm:$0xff] }
  0x3b   : > { %3528 = vmatmul.mubr.msk.f32.gmra.mrb[2].mxu0 %vm526_vm5, %v4226_v15  ;;  %3516 = vmatprep.mubr.msk.f32.mxu1 %vm526_vm5, %v4256_v26  ;;  %v3194_v36 = vld [vmem:[%s4211_s22 + $0x30] sm:$0xff]  ;;  %v3239_v42 = vld [vmem:[%s4211_s22 + $0x38] sm:$0xff] }
  0x3c   : > { %3530 = vmatprep.mubr.msk.f32.mxu0 %vm526_vm5, %v4229_v16  ;;  %3756 = vmatpush3.bf16.msra.mxu1 %v3753_v24  ;;  %v3209_v38 = vld [vmem:[%s4211_s22 + $0x90] sm:$0xff]  ;;  %v3254_v43 = vld [vmem:[%s4211_s22 + $0x98] sm:$0xff] }
  0x3d   : > { %v3224_v40 = vld [vmem:[%s4211_s22 + $0xf0] sm:$0xff]  ;;  %v3269_v44 = vld [vmem:[%s4211_s22 + $0xf8] sm:$0xff]  ;;  %3758 = vmatprep.subr.bf16.mxu1 %v3757_v47 }
  0x3e   : > { %3517 = vmatmul.mubr.msk.f32.gmra.mrb[2].mxu1 %vm526_vm5, %v3206_v30 }
  0x3f   : > { %3531 = vmatmul.mubr.msk.f32.gmra.mrb[4].mxu0 %vm526_vm5, %v4236_v17  ;;  %3519 = vmatprep.mubr.msk.f32.mxu1 %vm526_vm5, %v3207_v32 }
  0x40   : > { %3535 = vmatprep.mubr.msk.f32.mxu0 %vm526_vm5, %v3174_v18  ;;  %3760 = vmatpush3.bf16.msra.mxu1 %v3757_v47 }
  0x42   : > { %3520 = vmatmul.mubr.msk.f32.gmra.mrb[4].mxu1 %vm526_vm5, %v3208_v34 }
  0x43   : > { %3536 = vmatmul.mubr.msk.f32.vlgmr.msra.gmra.mrb[0].mxu0 %vm526_vm5, %v3175_v25 }
  0x44   : > { %3545 = vmatpush3.msra.mxu0 %v3195_v14  ;;  %3538 = vmatprep.mubr.msk.f32.mxu0 %vm526_vm5, %v4260_v27 }
  0x45   : > { %3555 = vmatprep.subr.mxu0 %v3210_v28 }
  0x47   : > { %3539 = vmatmul.mubr.msk.f32.gmra.mrb[2].mxu0 %vm526_vm5, %v3177_v29 }
  0x48   : > { %3541 = vmatprep.mubr.msk.f32.mxu0 %vm526_vm5, %v3178_v31 }
  0x4b   : > { %3542 = vmatmul.mubr.msk.f32.gmra.mrb[4].mxu0 %vm526_vm5, %v3179_v33 }
  0x4c   : > { %3546 = vmatprep.mubr.msk.f32.mxu0 %vm526_vm5, %v510_v12 }
  0x4f   : > { %3547 = vmatmul.mubr.msk.f32.vlgmr.msra.gmra.mrb[0].mxu0 %vm526_vm5, %v4216_v13 }
  0x50   : > { %3556 = vmatpush3.msra.mxu0 %v3210_v28  ;;  %3549 = vmatprep.mubr.msk.f32.mxu0 %vm526_vm5, %v4226_v15 }
  0x51   : > { %3566 = vmatprep.subr.mxu0 %v3225_v35 }
  0x53   : > { %3550 = vmatmul.mubr.msk.f32.gmra.mrb[2].mxu0 %vm526_vm5, %v4229_v16 }
  0x54   : > { %3552 = vmatprep.mubr.msk.f32.mxu0 %vm526_vm5, %v4236_v17 }
  0x57   : > { %3553 = vmatmul.mubr.msk.f32.gmra.mrb[4].mxu0 %vm526_vm5, %v3194_v36 }
  0x58   : > { %3557 = vmatprep.mubr.msk.f32.mxu0 %vm526_vm5, %v3204_v23 }
  0x5b   : > { %3558 = vmatmul.mubr.msk.f32.vlgmr.msra.gmra.mrb[0].mxu0 %vm526_vm5, %v4256_v26 }
  0x5c   : > { %3567 = vmatpush3.msra.mxu0 %v3225_v35  ;;  %3560 = vmatprep.mubr.msk.f32.mxu0 %vm526_vm5, %v3206_v30  ;;  %v4028_v35 = vmov (!%p3150_p7), 1.0  }
  0x5d   : > { %3577 = vmatprep.subr.mxu0 %v3240_v37 }
  0x5f   : > { %3561 = vmatmul.mubr.msk.f32.gmra.mrb[2].mxu0 %vm526_vm5, %v3207_v32 }
  0x60   : > { %3563 = vmatprep.mubr.msk.f32.mxu0 %vm526_vm5, %v3208_v34 }
  0x63   : > { %3564 = vmatmul.mubr.msk.f32.gmra.mrb[4].mxu0 %vm526_vm5, %v3209_v38 }
  0x64   : > { %3568 = vmatprep.mubr.msk.f32.mxu0 %vm526_vm5, %v3175_v25 }
  0x67   : > { %3569 = vmatmul.mubr.msk.f32.vlgmr.msra.gmra.mrb[0].mxu0 %vm526_vm5, %v4260_v27 }
  0x68   : > { %3578 = vmatpush3.msra.mxu0 %v3240_v37  ;;  %3571 = vmatprep.mubr.msk.f32.mxu0 %vm526_vm5, %v3177_v29 }
  0x69   : > { %3588 = vmatprep.subr.mxu0 %v3255_v39 }
  0x6b   : > { %3572 = vmatmul.mubr.msk.f32.gmra.mrb[2].mxu0 %vm526_vm5, %v3178_v31 }
  0x6c   : > { %3574 = vmatprep.mubr.msk.f32.mxu0 %vm526_vm5, %v3179_v33 }
  0x6f   : > { %3575 = vmatmul.mubr.msk.f32.gmra.mrb[4].mxu0 %vm526_vm5, %v3224_v40 }
  0x70   : > { %3579 = vmatprep.mubr.msk.f32.mxu0 %vm526_vm5, %v4216_v13 }
  0x73   : > { %3580 = vmatmul.mubr.msk.f32.vlgmr.msra.gmra.mrb[0].mxu0 %vm526_vm5, %v4226_v15  ;;  %v4027_v15 = vmov 1.0  }
  0x74   : > { %3589 = vmatpush3.msra.mxu0 %v3255_v39  ;;  %3582 = vmatprep.mubr.msk.f32.mxu0 %vm526_vm5, %v4229_v16  ;;  %1823 = vst.msk [vmem:[#allocation3] sm:$0x1] %vm1822_vm7, %v4027_v15  ;;  %1824 = vst.msk [vmem:[#allocation3 + $0x8] sm:$0x1] %vm1822_vm7, %v4027_v15  ;;  %v3278_v16 = vld [vmem:[%s4631_s5] ss:$0 sm:$0xff] }
  0x75   : > { %3599 = vmatprep.subr.mxu0 %v3270_v41  ;;  %1825 = vst.msk [vmem:[#allocation3 + $0x10] sm:$0x1] %vm1822_vm7, %v4027_v15  ;;  %1826 = vst.msk [vmem:[#allocation3 + $0x18] sm:$0x1] %vm1822_vm7, %v4027_v15 }
  0x76   : > { %1827 = vst.msk [vmem:[#allocation3 + $0x20] sm:$0x1] %vm1822_vm7, %v4027_v15  ;;  %1828 = vst.msk [vmem:[#allocation3 + $0x28] sm:$0x1] %vm1822_vm7, %v4027_v15 }
  0x77   : > { %3583 = vmatmul.mubr.msk.f32.gmra.mrb[2].mxu0 %vm526_vm5, %v4236_v17  ;;  %1837 = vst.msk [vmem:[#allocation3 + $0x67] sm:$0x1] %vm1822_vm7, %v4027_v15  ;;  %1838 = vst.msk [vmem:[#allocation3 + $0x6f] sm:$0x1] %vm1822_vm7, %v4027_v15 }
  0x78   : > { %3585 = vmatprep.mubr.msk.f32.mxu0 %vm526_vm5, %v3194_v36  ;;  %1839 = vst.msk [vmem:[#allocation3 + $0x77] sm:$0x1] %vm1822_vm7, %v4027_v15  ;;  %1840 = vst.msk [vmem:[#allocation3 + $0x7f] sm:$0x1] %vm1822_vm7, %v4027_v15 }
  0x79   : > { %1841 = vst.msk [vmem:[#allocation3 + $0x87] sm:$0x1] %vm1822_vm7, %v4027_v15  ;;  %1842 = vst.msk [vmem:[#allocation3 + $0x8f] sm:$0x1] %vm1822_vm7, %v4027_v15 }
  0x7b   : > { %3586 = vmatmul.mubr.msk.f32.gmra.mrb[4].mxu0 %vm526_vm5, %v3239_v42 }
  0x7c   : > { %3590 = vmatprep.mubr.msk.f32.mxu0 %vm526_vm5, %v4256_v26 }
  0x7f   : > { %3591 = vmatmul.mubr.msk.f32.vlgmr.msra.gmra.mrb[0].mxu0 %vm526_vm5, %v3206_v30 }
  0x80   : > { %3600 = vmatpush3.msra.mxu0 %v3270_v41  ;;  %3593 = vmatprep.mubr.msk.f32.mxu0 %vm526_vm5, %v3207_v32 }
  0x83   : > { %3594 = vmatmul.mubr.msk.f32.gmra.mrb[2].mxu0 %vm526_vm5, %v3208_v34 }
  0x84   : > { %3596 = vmatprep.mubr.msk.f32.mxu0 %vm526_vm5, %v3209_v38 }
  0x87   : > { %3597 = vmatmul.mubr.msk.f32.gmra.mrb[4].mxu0 %vm526_vm5, %v3254_v43 }
  0x88   : > { %3601 = vmatprep.mubr.msk.f32.mxu0 %vm526_vm5, %v4260_v27 }
  0x8b   : > { %3602 = vmatmul.mubr.msk.f32.vlgmr.msra.gmra.mrb[0].mxu0 %vm526_vm5, %v3177_v29 }
  0x8c   : > { %3604 = vmatprep.mubr.msk.f32.mxu0 %vm526_vm5, %v3178_v31 }
  0x8f   : > { %3605 = vmatmul.mubr.msk.f32.gmra.mrb[2].mxu0 %vm526_vm5, %v3179_v33 }
  0x90   : > { %3607 = vmatprep.mubr.msk.f32.mxu0 %vm526_vm5, %v3224_v40 }
  0x93   : > { %3608 = vmatmul.mubr.msk.f32.gmra.mrb[4].mxu0 %vm526_vm5, %v3269_v44 }
 0x10d   : > { %v3515_v48 = vpop.f32.mrb[0].mxu1 }
 0x10e   : > { %v611_v49 = vpop.f32.mrb[1].mxu1 }
 0x111   : > { %v3518_v50 = vpop.f32.mrb[2].mxu1 }
 0x112   : > { %v621_v51 = vpop.f32.mrb[3].mxu1 }
 0x115   : > { %v3521_v52 = vpop.f32.mrb[4].mxu1 }
 0x116   : > { %v631_v53 = vpop.f32.mrb[5].mxu1 }
 0x15e   : > { %v3603_v54 = vpop.f32.mrb[0].mxu0 }
 0x15f   : > { %v3833_v56 = vadd.f32 %v3603_v54, %v3515_v48  ;;  %v1623_v57 = vpop.f32.mrb[1].mxu0 }
 0x160   : > { %v3834_v58 = vadd.f32 %v1623_v57, %v611_v49 }
 0x161   : > { %v1666_v59 = vadd.f32 %v3833_v56, %v3277_v55 }
 0x162   : > { %v1665_v60 = vadd.f32 %v3834_v58, %v3277_v55  ;;  %v3606_v61 = vpop.f32.mrb[2].mxu0 }
 0x163   : > { %v3835_v62 = vadd.f32 %v3606_v61, %v3518_v50  ;;  %v1633_v63 = vpop.f32.mrb[3].mxu0  ;;  %v1672_v2 = vmax.f32 %v1666_v59, 0.0 }
 0x164   : > { %v1671_v0 = vmax.f32 %v1665_v60, 0.0  ;;  %v3836_v1 = vadd.f32 %v1633_v63, %v621_v51 }
 0x165   : > { %v1668_v3 = vadd.f32 %v3835_v62, %v3277_v55 }
 0x166   : > { %v1667_v4 = vadd.f32 %v3836_v1, %v3277_v55  ;;  %v3609_v5 = vpop.f32.mrb[4].mxu0  ;;  %3618 = vmatprep.mubr.msk.f32.mxu1 %vm1688_vm6, %v1671_v0 }
 0x167   : > { %v3837_v6 = vadd.f32 %v3609_v5, %v3521_v52  ;;  %v1643_v7 = vpop.f32.mrb[5].mxu0  ;;  %3619 = vmatmul.mubr.msk.f32.vlgmr.msra.gmra.mrb[6].mxu1 %vm1688_vm6, %v1672_v2  ;;  %v1674_v10 = vmax.f32 %v1668_v3, 0.0 }
 0x168   : > { %v1673_v8 = vmax.f32 %v1667_v4, 0.0  ;;  %v3838_v9 = vadd.f32 %v1643_v7, %v631_v53 }
 0x169   : > { %v1670_v11 = vadd.f32 %v3837_v6, %v3277_v55 }
 0x16a   : > { %v1669_v12 = vadd.f32 %v3838_v9, %v3277_v55  ;;  %3621 = vmatprep.mubr.msk.f32.mxu1 %vm1688_vm6, %v1673_v8 }
 0x16b   : > { %3622 = vmatmul.mubr.msk.f32.gmra.mrb[8].mxu1 %vm1688_vm6, %v1674_v10  ;;  %v1676_v14 = vmax.f32 %v1670_v11, 0.0 }
 0x16c   : > { %v1675_v13 = vmax.f32 %v1669_v12, 0.0 }
 0x16e   : > { %3624 = vmatprep.mubr.msk.f32.mxu1 %vm1688_vm6, %v1675_v13 }
 0x16f   : > { %3625 = vmatmul.mubr.msk.f32.gmra.mrb[10].mxu1 %vm1688_vm6, %v1676_v14 }
 0x23a   : > { %v3620_v17 = vpop.f32.mrb[6].mxu1 }
 0x23b   : > { %v1779_v18 = vadd.f32 %v3620_v17, %v3278_v16  ;;  %v1773_v19 = vpop.f32.mrb[7].mxu1 }
 0x23c   : > { %v1774_v20 = vadd.f32 %v3278_v16, %v1773_v19 }
 0x23d   : > { %v1803_v21 = vmax.f32 %v1779_v18, 0.0 }
 0x23e   : > { %v1802_v22 = vmax.f32 %v1774_v20, 0.0  ;;  %v3623_v23 = vpop.f32.mrb[8].mxu1 }
 0x23f   : > { %1810 = vst.msk [vmem:[#allocation3 + $0x38] sm:$0xff] %vm1688_vm6, %v1803_v21  ;;  %v1789_v24 = vadd.f32 %v3623_v23, %v3278_v16  ;;  %v1783_v25 = vpop.f32.mrb[9].mxu1 }
 0x240   : > { %1817 = vst.msk [vmem:[#allocation3 + $0x9] sm:$0x7f] %vm1815_vm8, %v1803_v21  ;;  %1816 = vst.msk [vmem:[#allocation3 + $0x1] sm:$0x7f] %vm1815_vm8, %v1802_v22  ;;  %v1784_v26 = vadd.f32 %v3278_v16, %v1783_v25 }
 0x241   : > { %1832 = vst.msk [vmem:[#allocation3 + $0x67] sm:$0xfe] %vm1830_vm9, %v1803_v21  ;;  %1831 = vst.msk [vmem:[#allocation3 + $0x5f] sm:$0xfe] %vm1830_vm9, %v1802_v22  ;;  %v1805_v27 = vmax.f32 %v1789_v24, 0.0 }
 0x242   : > { %1809 = vst.msk [vmem:[#allocation3 + $0x30] sm:$0xff] %vm1688_vm6, %v1802_v22  ;;  %v1804_v28 = vmax.f32 %v1784_v26, 0.0  ;;  %v3626_v29 = vpop.f32.mrb[10].mxu1  ;;  %1846 = vst.msk [vmem:[#allocation3] sm:$0xff] (!%p3150_p7), %vm1688_vm6, %v4028_v35 }
 0x243   : > { %1812 = vst.msk [vmem:[#allocation3 + $0x48] sm:$0xff] %vm1688_vm6, %v1805_v27  ;;  %v1799_v30 = vadd.f32 %v3626_v29, %v3278_v16  ;;  %v1793_v31 = vpop.f32.mrb[11].mxu1  ;;  %1847 = vst.msk [vmem:[#allocation3 + $0x30] sm:$0xff] (!%p3150_p7), %vm1688_vm6, %v4028_v35 }
 0x244   : > { %1819 = vst.msk [vmem:[#allocation3 + $0x19] sm:$0x7f] %vm1815_vm8, %v1805_v27  ;;  %1818 = vst.msk [vmem:[#allocation3 + $0x11] sm:$0x7f] %vm1815_vm8, %v1804_v28  ;;  %v1794_v32 = vadd.f32 %v3278_v16, %v1793_v31  ;;  %1845 = sbr.rel (%p3150_p7) target bundleno = 587 (0x24b), region = 64 }
 0x245   : > { %1834 = vst.msk [vmem:[#allocation3 + $0x77] sm:$0xfe] %vm1830_vm9, %v1805_v27  ;;  %1833 = vst.msk [vmem:[#allocation3 + $0x6f] sm:$0xfe] %vm1830_vm9, %v1804_v28  ;;  %v1807_v33 = vmax.f32 %v1799_v30, 0.0 }
 0x246   : > { %1811 = vst.msk [vmem:[#allocation3 + $0x40] sm:$0xff] %vm1688_vm6, %v1804_v28  ;;  %v1806_v34 = vmax.f32 %v1794_v32, 0.0  ;;  %1848 = vst.msk [vmem:[#allocation3 + $0x60] sm:$0xff] (!%p3150_p7), %vm1688_vm6, %v4028_v35 }
 0x247   : > { %1814 = vst.msk [vmem:[#allocation3 + $0x58] sm:$0xff] %vm1688_vm6, %v1807_v33 }
 0x248   : > { %1821 = vst.msk [vmem:[#allocation3 + $0x29] sm:$0x7f] %vm1815_vm8, %v1807_v33  ;;  %1820 = vst.msk [vmem:[#allocation3 + $0x21] sm:$0x7f] %vm1815_vm8, %v1806_v34 }
 0x249   : > { %1836 = vst.msk [vmem:[#allocation3 + $0x87] sm:$0xfe] %vm1830_vm9, %v1807_v33  ;;  %1835 = vst.msk [vmem:[#allocation3 + $0x7f] sm:$0xfe] %vm1830_vm9, %v1806_v34 }
 0x24a   : > { %1813 = vst.msk [vmem:[#allocation3 + $0x50] sm:$0xff] %vm1688_vm6, %v1806_v34 }
 0x24b PF: > { %p3286_p8 = scmp.ne.s32.totalorder %s4008_s13, 1 }
 0x24c   : > { %v4029_v36 = vmov (!%p3286_p8), 1.0  }
 0x24d   : > { %1852 = sbr.rel (%p3286_p8) target bundleno = 596 (0x254), region = 68  ;;  %1854 = vst.msk [vmem:[#allocation3 + $0x28] sm:$0xff] (!%p3286_p8), %vm1688_vm6, %v4029_v36  ;;  %1855 = vst.msk [vmem:[#allocation3 + $0x58] sm:$0xff] (!%p3286_p8), %vm1688_vm6, %v4029_v36 }
 0x24e   : > { %1856 = vst.msk [vmem:[#allocation3 + $0x88] sm:$0xff] (!%p3286_p8), %vm1688_vm6, %v4029_v36 }
 0x254 PF: > { %v3287_v37 = vld [vmem:[%s4632_s6 + $0x20] sm:$0xff]  ;;  %v3288_v38 = vld [vmem:[%s4632_s6 + $0x28] sm:$0xff]  ;;  %v3289_v39 = vld [vmem:[%s4632_s6 + $0x30] sm:$0xff]  ;;  %s4030_s22 = smov 120   ;;  %vm2976_vm10 = vcmask 0  }
 0x255   : > { %v3761_v40 = vpack.c.bf16 %v3288_v38, %v3287_v37  ;;  %v3290_v41 = vld [vmem:[%s4632_s6 + $0x38] sm:$0xff]  ;;  %v1865_v42 = vld [vmem:[#allocation3 + $0x30] sm:$0xff]  ;;  %v1861_v44 = vld [vmem:[%s4632_s6] sm:$0xff] }
 0x256   : > { %v3765_v43 = vpack.c.bf16 %v3290_v41, %v3289_v39  ;;  %3635 = vmatprep.mubr.msk.f32.mxu1 %vm1688_vm6, %v1865_v42  ;;  %v1862_v45 = vld [vmem:[%s4632_s6 + $0x8] sm:$0xff]  ;;  %v1863_v47 = vld [vmem:[%s4632_s6 + $0x10] sm:$0xff]  ;;  %v1864_v48 = vld [vmem:[%s4632_s6 + $0x18] sm:$0xff] }
 0x257   : > { %3762 = vmatprep.subr.bf16.mxu1 %v3761_v40  ;;  %v3769_v46 = vpack.c.bf16 %v1862_v45, %v1861_v44  ;;  %v4418_v49 = vld [vmem:[#allocation3 + $0x38] sm:$0xff]  ;;  %v4420_v50 = vld [vmem:[#allocation3 + $0x40] sm:$0xff]  ;;  %v3773_v51 = vpack.c.bf16 %v1864_v48, %v1863_v47  ;;  %v3300_v53 = vld [vmem:[%s4632_s6 + $0x48] sm:$0xff]  ;;  %v2860_v48 = vlaneseq }
 0x258   : > { %3764 = vmatpush3.bf16.msra.mxu1 %v3761_v40  ;;  %v3299_v52 = vld [vmem:[%s4632_s6 + $0x40] sm:$0xff]  ;;  %v4432_v54 = vld [vmem:[#allocation3 + $0x48] sm:$0xff]  ;;  %v3301_v57 = vld [vmem:[%s4632_s6 + $0x50] sm:$0xff] }
 0x259   : > { %3766 = vmatprep.subr.bf16.mxu1 %v3765_v43  ;;  %v1857_v55 = vld [vmem:[#allocation3] sm:$0xff]  ;;  %v3777_v56 = vpack.c.bf16 %v3300_v53, %v3299_v52  ;;  %v3302_v58 = vld [vmem:[%s4632_s6 + $0x58] sm:$0xff]  ;;  %v1858_v59 = vld [vmem:[#allocation3 + $0x8] sm:$0xff] }
 0x25a   : > { %v4443_v60 = vld [vmem:[#allocation3 + $0x10] sm:$0xff]  ;;  %v3781_v61 = vpack.c.bf16 %v3302_v58, %v3301_v57  ;;  %v3307_v62 = vld [vmem:[%s4632_s6 + $0x60] sm:$0xff]  ;;  %v3308_v63 = vld [vmem:[%s4632_s6 + $0x68] sm:$0xff] }
 0x25b   : > { %v4454_v0 = vld [vmem:[#allocation3 + $0x18] sm:$0xff]  ;;  %v2068_v1 = vld [vmem:[#allocation3 + $0x60] sm:$0xff]  ;;  %v3785_v2 = vpack.c.bf16 %v3308_v63, %v3307_v62  ;;  %v3309_v3 = vld [vmem:[%s4632_s6 + $0x70] sm:$0xff] }
 0x25c   : > { %3768 = vmatpush3.bf16.msra.mxu1 %v3765_v43  ;;  %v3310_v4 = vld [vmem:[%s4632_s6 + $0x78] sm:$0xff]  ;;  %v2069_v5 = vld [vmem:[#allocation3 + $0x68] sm:$0xff]  ;;  %v4465_v6 = vld [vmem:[#allocation3 + $0x70] sm:$0xff] }
 0x25d   : > { %3770 = vmatprep.subr.bf16.mxu1 %v3769_v46  ;;  %v3789_v7 = vpack.c.bf16 %v3310_v4, %v3309_v3  ;;  %v3315_v8 = vld [vmem:[%s4632_s6 + $0x80] sm:$0xff]  ;;  %v3316_v9 = vld [vmem:[%s4632_s6 + $0x88] sm:$0xff]  ;;  %v4476_v10 = vld [vmem:[#allocation3 + $0x78] sm:$0xff] }
 0x25e   : > { %v3793_v11 = vpack.c.bf16 %v3316_v9, %v3315_v8  ;;  %v3317_v12 = vld [vmem:[%s4632_s6 + $0x90] sm:$0xff]  ;;  %v3318_v13 = vld [vmem:[%s4632_s6 + $0x98] sm:$0xff]  ;;  %v3323_v15 = vld [vmem:[%s4632_s6 + $0xa0] sm:$0xff] }
 0x25f   : > { %3636 = vmatmul.mubr.msk.f32.vlgmr.msra.gmra.mrb[12].mxu1 %vm1688_vm6, %v4418_v49  ;;  %v3797_v14 = vpack.c.bf16 %v3318_v13, %v3317_v12  ;;  %v3324_v16 = vld [vmem:[%s4632_s6 + $0xa8] sm:$0xff]  ;;  %v2182_v17 = vld [vmem:[#allocation3 + $0x20] sm:$0xff]  ;;  %v3325_v19 = vld [vmem:[%s4632_s6 + $0xb0] sm:$0xff] }
 0x260   : > { %3772 = vmatpush3.bf16.msra.mxu1 %v3769_v46  ;;  %3638 = vmatprep.mubr.msk.f32.mxu1 %vm1688_vm6, %v4420_v50  ;;  %v3801_v18 = vpack.c.bf16 %v3324_v16, %v3323_v15  ;;  %v3326_v20 = vld [vmem:[%s4632_s6 + $0xb8] sm:$0xff]  ;;  %v3331_v22 = vld [vmem:[%s4632_s6 + $0xc0] sm:$0xff]  ;;  %v3332_v23 = vld [vmem:[%s4632_s6 + $0xc8] sm:$0xff] }
 0x261   : > { %3774 = vmatprep.subr.bf16.mxu1 %v3773_v51  ;;  %v3805_v21 = vpack.c.bf16 %v3326_v20, %v3325_v19  ;;  %v2293_v24 = vld [vmem:[#allocation3 + $0x50] sm:$0xff]  ;;  %v3809_v25 = vpack.c.bf16 %v3332_v23, %v3331_v22  ;;  %v3334_v27 = vld [vmem:[%s4632_s6 + $0xd8] sm:$0xff]  ;;  %v3339_v29 = vld [vmem:[%s4632_s6 + $0xe0] sm:$0xff] }
 0x262   : > { %v3333_v26 = vld [vmem:[%s4632_s6 + $0xd0] sm:$0xff]  ;;  %v3340_v30 = vld [vmem:[%s4632_s6 + $0xe8] sm:$0xff]  ;;  %v2404_v31 = vld [vmem:[#allocation3 + $0x80] sm:$0xff] }
 0x263   : > { %3639 = vmatmul.mubr.msk.f32.gmra.mrb[14].mxu1 %vm1688_vm6, %v4432_v54  ;;  %v3813_v28 = vpack.c.bf16 %v3334_v27, %v3333_v26  ;;  %v3817_v32 = vpack.c.bf16 %v3340_v30, %v3339_v29  ;;  %v3341_v33 = vld [vmem:[%s4632_s6 + $0xf0] sm:$0xff]  ;;  %v3342_v34 = vld [vmem:[%s4632_s6 + $0xf8] sm:$0xff]  ;;  %v3347_v36 = vld [vmem:[%s4632_s6 + $0x100] sm:$0xff] }
 0x264   : > { %3776 = vmatpush3.bf16.msra.mxu1 %v3773_v51  ;;  %3649 = vmatprep.mubr.msk.f32.mxu1 %vm1688_vm6, %v1857_v55  ;;  %v3821_v35 = vpack.c.bf16 %v3342_v34, %v3341_v33  ;;  %v3348_v37 = vld [vmem:[%s4632_s6 + $0x108] sm:$0xff]  ;;  %v3349_v40 = vld [vmem:[%s4632_s6 + $0x110] sm:$0xff]  ;;  %v3350_v41 = vld [vmem:[%s4632_s6 + $0x118] sm:$0xff] }
 0x265   : > { %3778 = vmatprep.subr.bf16.mxu1 %v3777_v56  ;;  %v2515_v38 = vld [vmem:[#allocation3 + $0x28] sm:$0xff]  ;;  %v3825_v39 = vpack.c.bf16 %v3348_v37, %v3347_v36  ;;  %v3829_v42 = vpack.c.bf16 %v3350_v41, %v3349_v40  ;;  %v2626_v43 = vld [vmem:[#allocation3 + $0x58] sm:$0xff]  ;;  %v2855_v45 = vld [vmem:[%s4634_s8] sm:$0x1] }
 0x266   : > { %v2737_v44 = vld [vmem:[#allocation3 + $0x88] sm:$0xff]  ;;  %v2856_v46 = vmul.f32 3.0, %v2855_v45  ;;  %v3355_v52 = vld [vmem:[%s4633_s7] ss:$0 sm:$0xff] }
 0x267   : > { %3650 = vmatmul.mubr.msk.f32.vlgmr.msra.gmra.mrb[12].mxu1 %vm1688_vm6, %v1858_v59 }
 0x268   : > { %3780 = vmatpush3.bf16.msra.mxu1 %v3777_v56  ;;  %3652 = vmatprep.mubr.msk.f32.mxu1 %vm1688_vm6, %v4443_v60  ;;  %v2857_v47 = vmul.f32 1.442695, %v2856_v46 }
 0x269   : > { %3782 = vmatprep.subr.bf16.mxu1 %v3781_v61 }
 0x26a   : > { %3960 = vpow2.f32 %v2857_v47  ;;  %v2901_v47 = vld [vmem:[%s4132_s19] sm:$0xff] }
 0x26b   : > { %3653 = vmatmul.mubr.msk.f32.gmra.mrb[14].mxu1 %vm1688_vm6, %v4454_v0 }
 0x26c   : > { %3784 = vmatpush3.bf16.msra.mxu1 %v3781_v61  ;;  %3663 = vmatprep.mubr.msk.f32.mxu1 %vm1688_vm6, %v2068_v1 }
 0x26d   : > { %3786 = vmatprep.subr.bf16.mxu1 %v3785_v2 }
 0x26f   : > { %3664 = vmatmul.mubr.msk.f32.vlgmr.msra.gmra.mrb[12].mxu1 %vm1688_vm6, %v2069_v5 }
 0x270   : > { %3788 = vmatpush3.bf16.msra.mxu1 %v3785_v2  ;;  %3666 = vmatprep.mubr.msk.f32.mxu1 %vm1688_vm6, %v4465_v6 }
 0x271   : > { %3790 = vmatprep.subr.bf16.mxu1 %v3789_v7 }
 0x273   : > { %3667 = vmatmul.mubr.msk.f32.gmra.mrb[14].mxu1 %vm1688_vm6, %v4476_v10 }
 0x274   : > { %3792 = vmatpush3.bf16.msra.mxu1 %v3789_v7  ;;  %3677 = vmatprep.mubr.msk.f32.mxu1 %vm1688_vm6, %v1858_v59  ;;  %v3961_v51 = vpop.eup %3960 }
 0x275   : > { %3794 = vmatprep.subr.bf16.mxu1 %v3793_v11 }
 0x277   : > { %3678 = vmatmul.mubr.msk.f32.vlgmr.msra.gmra.mrb[12].mxu1 %vm1688_vm6, %v4443_v60 }
 0x278   : > { %3796 = vmatpush3.bf16.msra.mxu1 %v3793_v11  ;;  %3680 = vmatprep.mubr.msk.f32.mxu1 %vm1688_vm6, %v4454_v0 }
 0x279   : > { %3798 = vmatprep.subr.bf16.mxu1 %v3797_v14 }
 0x27b   : > { %3681 = vmatmul.mubr.msk.f32.gmra.mrb[14].mxu1 %vm1688_vm6, %v2182_v17 }
 0x27c   : > { %3800 = vmatpush3.bf16.msra.mxu1 %v3797_v14  ;;  %3691 = vmatprep.mubr.msk.f32.mxu1 %vm1688_vm6, %v4418_v49  ;;  %v2861_v49 = vshrl.u32 %v2860_v48, 7 }
 0x27d   : > { %3802 = vmatprep.subr.bf16.mxu1 %v3801_v18 }
 0x27f   : > { %3692 = vmatmul.mubr.msk.f32.vlgmr.msra.gmra.mrb[12].mxu1 %vm1688_vm6, %v4420_v50 }
 0x280   : > { %3804 = vmatpush3.bf16.msra.mxu1 %v3801_v18  ;;  %3694 = vmatprep.mubr.msk.f32.mxu1 %vm1688_vm6, %v4432_v54 }
 0x281   : > { %3806 = vmatprep.subr.bf16.mxu1 %v3805_v21 }
 0x283   : > { %3695 = vmatmul.mubr.msk.f32.gmra.mrb[14].mxu1 %vm1688_vm6, %v2293_v24 }
 0x284   : > { %3808 = vmatpush3.bf16.msra.mxu1 %v3805_v21  ;;  %3705 = vmatprep.mubr.msk.f32.mxu1 %vm1688_vm6, %v2069_v5 }
 0x285   : > { %3810 = vmatprep.subr.bf16.mxu1 %v3809_v25 }
 0x287   : > { %3706 = vmatmul.mubr.msk.f32.vlgmr.msra.gmra.mrb[12].mxu1 %vm1688_vm6, %v4465_v6 }
 0x288   : > { %3812 = vmatpush3.bf16.msra.mxu1 %v3809_v25  ;;  %3708 = vmatprep.mubr.msk.f32.mxu1 %vm1688_vm6, %v4476_v10 }
 0x289   : > { %3814 = vmatprep.subr.bf16.mxu1 %v3813_v28 }
 0x28b   : > { %3709 = vmatmul.mubr.msk.f32.gmra.mrb[14].mxu1 %vm1688_vm6, %v2404_v31 }
 0x28c   : > { %3816 = vmatpush3.bf16.msra.mxu1 %v3813_v28  ;;  %3719 = vmatprep.mubr.msk.f32.mxu1 %vm1688_vm6, %v4443_v60 }
 0x28d   : > { %3818 = vmatprep.subr.bf16.mxu1 %v3817_v32 }
 0x28f   : > { %3720 = vmatmul.mubr.msk.f32.vlgmr.msra.gmra.mrb[12].mxu1 %vm1688_vm6, %v4454_v0 }
 0x290   : > { %3820 = vmatpush3.bf16.msra.mxu1 %v3817_v32  ;;  %3722 = vmatprep.mubr.msk.f32.mxu1 %vm1688_vm6, %v2182_v17 }
 0x291   : > { %3822 = vmatprep.subr.bf16.mxu1 %v3821_v35 }
 0x293   : > { %3723 = vmatmul.mubr.msk.f32.gmra.mrb[14].mxu1 %vm1688_vm6, %v2515_v38 }
 0x294   : > { %3824 = vmatpush3.bf16.msra.mxu1 %v3821_v35  ;;  %3733 = vmatprep.mubr.msk.f32.mxu1 %vm1688_vm6, %v4420_v50  ;;  %v2862_v50 = vsub.s32 0, %v2861_v49 }
 0x295   : > { %3826 = vmatprep.subr.bf16.mxu1 %v3825_v39 }
 0x296   : > { %v2863_v53 = vrot.slane %v3961_v51, %v2862_v50 }
 0x297   : > { %3734 = vmatmul.mubr.msk.f32.vlgmr.msra.gmra.mrb[12].mxu1 %vm1688_vm6, %v4432_v54 }
 0x298   : > { %3828 = vmatpush3.bf16.msra.mxu1 %v3825_v39  ;;  %3736 = vmatprep.mubr.msk.f32.mxu1 %vm1688_vm6, %v2293_v24 }
 0x299   : > { %3830 = vmatprep.subr.bf16.mxu1 %v3829_v42 }
 0x29b   : > { %3737 = vmatmul.mubr.msk.f32.gmra.mrb[14].mxu1 %vm1688_vm6, %v2626_v43 }
 0x29c   : > { %3832 = vmatpush3.bf16.msra.mxu1 %v3829_v42  ;;  %3747 = vmatprep.mubr.msk.f32.mxu1 %vm1688_vm6, %v4465_v6 }
 0x29f   : > { %3748 = vmatmul.mubr.msk.f32.vlgmr.msra.gmra.mrb[12].mxu1 %vm1688_vm6, %v4476_v10 }
 0x2a0   : > { %3750 = vmatprep.mubr.msk.f32.mxu1 %vm1688_vm6, %v2404_v31 }
 0x2a3   : > { %3751 = vmatmul.mubr.msk.f32.gmra.mrb[14].mxu1 %vm1688_vm6, %v2737_v44 }
 0x372   : > { %v3749_v54 = vpop.f32.mrb[12].mxu1 }
 0x373   : > { %v2852_v55 = vadd.f32 %v3749_v54, %v3355_v52  ;;  %v2821_v56 = vpop.f32.mrb[13].mxu1 }
 0x374   : > { %v2851_v57 = vadd.f32 %v3355_v52, %v2821_v56  ;;  %v2903_v56 = vld [vmem:[%s4132_s19 + $0x10] sm:$0xff] }
 0x375   : > { %v4577_v58 = vmul.f32 %v2863_v53, %v2852_v55 }
 0x376   : > { %v4579_v59 = vmul.f32 %v2863_v53, %v2851_v57  ;;  %v3752_v60 = vpop.f32.mrb[14].mxu1 }
 0x377   : > { %v2870_v61 = vadd.f32 2.0, %v4577_v58  ;;  %v2854_v62 = vadd.f32 %v3752_v60, %v3355_v52  ;;  %v2831_v63 = vpop.f32.mrb[15].mxu1 }
 0x378   : > { %v2869_v0 = vadd.f32 2.0, %v4579_v59  ;;  %v2853_v1 = vadd.f32 %v3355_v52, %v2831_v63  ;;  %v2905_v50 = vadd.f32 %v2901_v47, %v4579_v59  ;;  %v2902_v52 = vld [vmem:[%s4132_s19 + $0x8] sm:$0xff] }
 0x379   : > { %v2874_v2 = vsub.f32 0.0, %v2870_v61  ;;  %v4583_v3 = vmul.f32 %v2863_v53, %v2854_v62  ;;  %v2906_v54 = vadd.f32 %v2902_v52, %v4577_v58  ;;  %v2904_v62 = vld [vmem:[%s4132_s19 + $0x18] sm:$0xff] }
 0x37a   : > { %v2873_v4 = vsub.f32 0.0, %v2869_v0  ;;  %v4585_v5 = vmul.f32 %v2863_v53, %v2853_v1 }
 0x37b   : > { %v2879_v6 = vmul.f32 1.442695, %v2874_v2  ;;  %v2872_v7 = vadd.f32 2.0, %v4583_v3  ;;  %v2908_v63 = vadd.f32 %v2904_v62, %v4583_v3 }
 0x37c   : > { %v2877_v8 = vmul.f32 1.442695, %v2873_v4  ;;  %v2871_v9 = vadd.f32 2.0, %v4585_v5  ;;  %v2907_v60 = vadd.f32 %v2903_v56, %v4585_v5 }
 0x37d   : > { %3962 = vpow2.f32 %v2879_v6  ;;  %v2876_v10 = vsub.f32 0.0, %v2872_v7 }
 0x37e   : > { %3964 = vpow2.f32 %v2877_v8  ;;  %v2875_v11 = vsub.f32 0.0, %v2871_v9  ;;  %v2933_v9 = vld [vmem:[%s4127_s30] sm:$0x1] }
 0x37f   : > { %v2883_v12 = vmul.f32 1.442695, %v2876_v10 }
 0x380   : > { %v2881_v13 = vmul.f32 1.442695, %v2875_v11 }
 0x381   : > { %3966 = vpow2.f32 %v2883_v12 }
 0x382   : > { %3968 = vpow2.f32 %v2881_v13 }
 0x387   : > { %v3963_v14 = vpop.eup %3962 }
 0x388   : > { %v3965_v15 = vpop.eup %3964  ;;  %v2886_v16 = vadd.f32 1.0, %v3963_v14 }
 0x389   : > { %v2885_v17 = vadd.f32 1.0, %v3965_v15 }
 0x38a   : > { %3970 = vrcp.f32 %v2886_v16 }
 0x38b   : > { %v3967_v18 = vpop.eup %3966  ;;  %3972 = vrcp.f32 %v2885_v17 }
 0x38c   : > { %v3969_v19 = vpop.eup %3968  ;;  %v2888_v20 = vadd.f32 1.0, %v3967_v18 }
 0x38d   : > { %v2887_v21 = vadd.f32 1.0, %v3969_v19 }
 0x38e   : > { %3974 = vrcp.f32 %v2888_v20 }
 0x38f   : > { %3976 = vrcp.f32 %v2887_v21 }
 0x394   : > { %v3971_v22 = vpop.eup %3970 }
 0x395   : > { %v3973_v23 = vpop.eup %3972  ;;  %v2898_v25 = vadd.f32 1e-09, %v3971_v22 }
 0x396   : > { %v2897_v24 = vadd.f32 1e-09, %v3973_v23 }
 0x398   : > { %v3975_v26 = vpop.eup %3974  ;;  %3978 = vlog2.f32 %v2897_v24 }
 0x399   : > { %v3977_v27 = vpop.eup %3976  ;;  %3980 = vlog2.f32 %v2898_v25  ;;  %v2900_v29 = vadd.f32 1e-09, %v3975_v26 }
 0x39a   : > { %v2899_v28 = vadd.f32 1e-09, %v3977_v27 }
 0x39c   : > { %3982 = vlog2.f32 %v2899_v28 }
 0x39d   : > { %3984 = vlog2.f32 %v2900_v29 }
 0x3a2   : > { %v3979_v30 = vpop.eup %3978 }
 0x3a3   : > { %v2935_v31 = vmul.f32 0.6931472, %v3979_v30  ;;  %v3981_v32 = vpop.eup %3980 }
 0x3a4   : > { %v2937_v34 = vmul.f32 0.6931472, %v3981_v32 }
 0x3a5   : > { %2946 = vrot.lane.b32.xlu0 %v2935_v31, %s4030_s22 }
 0x3a6   : > { %v3983_v33 = vpop.eup %3982 }
 0x3a7   : > { %v2939_v35 = vmul.f32 0.6931472, %v3983_v33  ;;  %v3985_v36 = vpop.eup %3984 }
 0x3a8   : > { %v2941_v37 = vmul.f32 0.6931472, %v3985_v36 }
 0x3a9   : > { %2948 = vrot.lane.b32.xlu0 %v2937_v34, %s4030_s22  ;;  %2950 = vrot.lane.b32.xlu1 %v2939_v35, %s4030_s22 }
 0x3ad   : > { %2952 = vrot.lane.b32.xlu1 %v2941_v37, %s4030_s22 }
 0x3b1   : > { %2913 = vrot.lane.b32.xlu1 %v2897_v24, %s4030_s22 }
 0x3b5   : > { %2915 = vrot.lane.b32.xlu1 %v2898_v25, %s4030_s22 }
 0x3b9   : > { %2917 = vrot.lane.b32.xlu1 %v2899_v28, %s4030_s22 }
 0x3bd   : > { %2919 = vrot.lane.b32.xlu1 %v2900_v29, %s4030_s22 }
 0x417   : > { %v2947_v38 = vpop.permute.xlu0 %2946 }
 0x418   : > { %v2958_v41 = vsel %vm526_vm5, %v2947_v38, 0.0 }
 0x41b   : > { %v2949_v39 = vpop.permute.xlu0 %2948  ;;  %v2951_v40 = vpop.permute.xlu1 %2950 }
 0x41c   : > { %v2959_v42 = vsel %vm526_vm5, %v2949_v39, 0.0  ;;  %v2961_v44 = vsel %vm526_vm5, %v2951_v40, 0.0 }
 0x41d   : > { %v2960_v43 = vadd.f32 %v2959_v42, %v2958_v41 }
 0x41f   : > { %v2962_v45 = vadd.f32 %v2961_v44, %v2960_v43  ;;  %v2953_v46 = vpop.permute.xlu1 %2952 }
 0x420   : > { %v2963_v48 = vsel %vm526_vm5, %v2953_v46, 0.0 }
 0x421   : > { %v2964_v49 = vadd.f32 %v2963_v48, %v2962_v45 }
 0x423   : > { %2965 = vadd.xlane.f32.xlu0 %v2964_v49  ;;  %v2914_v51 = vpop.permute.xlu1 %2913 }
 0x424   : > { %v2925_v53 = vmul.f32 %v2914_v51, %v2905_v50 }
 0x426   : > { %2929 = vst.msk [vmem:[%s4137_s15] sm:$0xff] %vm526_vm5, %v2925_v53 }
 0x427   : > { %v2916_v55 = vpop.permute.xlu1 %2915 }
 0x428   : > { %v2926_v57 = vmul.f32 %v2916_v55, %v2906_v54 }
 0x42a   : > { %2930 = vst.msk [vmem:[%s4137_s15 + $0x8] sm:$0xff] %vm526_vm5, %v2926_v57 }
 0x42b   : > { %v2918_v61 = vpop.permute.xlu1 %2917 }
 0x42c   : > { %v2927_v59 = vmul.f32 %v2918_v61, %v2907_v60 }
 0x42e   : > { %2931 = vst.msk [vmem:[%s4137_s15 + $0x10] sm:$0xff] %vm526_vm5, %v2927_v59 }
 0x42f   : > { %v2920_v0 = vpop.permute.xlu1 %2919 }
 0x430   : > { %v2928_v1 = vmul.f32 %v2920_v0, %v2908_v63 }
 0x432   : > { %2932 = vst.msk [vmem:[%s4137_s15 + $0x18] sm:$0xff] %vm526_vm5, %v2928_v1 }
 0x4b0   : > { %v2966_v58 = vpop.xlane.xlu0 %2965 }
 0x4b1   : > { %v2967_v2 = vrot.slane %v2966_v58, 4 }
 0x4b3   : > { %v2968_v4 = vadd.f32 %v2967_v2, %v2966_v58 }
 0x4b5   : > { %v2969_v6 = vrot.slane %v2968_v4, 2 }
 0x4b7   : > { %v2970_v7 = vadd.f32 %v2969_v6, %v2968_v4 }
 0x4b9   : > { %v2971_v8 = vrot.slane %v2970_v7, 1 }
 0x4bb   : > { %v2972_v5 = vadd.f32 %v2971_v8, %v2970_v7 }
 0x4bd   : > { %3913 = vpush %v2972_v5 }
 0x4ee   : > { %s3914_s19 = spop %3913 }
 0x4ef   : > { %v2974_v10 = vstv %s3914_s19 }
 0x4f0   : > { %v2975_v11 = vadd.f32 %v2974_v10, %v2933_v9 }
 0x4f2   : > { %2977 = vst.msk [vmem:[%s4127_s30] sm:$0x1] %vm2976_vm10, %v2975_v11 }
 0x4f3 PF: > { %s21_s17 = sadd.s32 1, %s4024_s17   ;;  %s4643_s13 = sld [smem:[#allocation4_spill]] }
 0x4f4   : > { %p18_p9 = scmp.ge.s32.totalorder %s21_s17, 6   ;;  %s4644_s14 = sld [smem:[#allocation5_spill]] }
 0x4f5   : > { %s4645_s15 = sld [smem:[#allocation6_spill]]  ;;  %s4646_s16 = sld [smem:[#allocation7_spill]] }
 0x4f6   :  { %20 = sbr.rel (!%p18_p9) target bundleno = 3 (0x3), region = 155 }

</bundles_post_ra>
